<compile_context>
chip_gen: v6e
topology: v6e:2x2x1
jax: 0.10.0
libtpu: 0.0.40
codegen_flags: <defaults>
</compile_context>

<pallas_src>
import functools
import math

import jax
import jax.numpy as jnp
import numpy as np
from jax.experimental import pallas as pl
from jax.experimental.pallas import tpu as pltpu


# ================================================================== kernels
def _attn_block_kernel(x_ref, g_ref, b_ref, wqkv_ref, wout_ref,
                       cos_ref, sinlo_ref, sinhi_ref, o_ref, *, n_heads, head_dim):
    x = x_ref[0]                                             # (S, D) fp32
    S, D = x.shape
    H, hd = n_heads, head_dim
    d_rot = hd // 4
    scale = 1.0 / math.sqrt(hd)
    lane_axis = 1                                            # pltpu.roll needs a non-negative axis

    # LayerNorm (fp32 statistics, eps=1e-5, elementwise affine).
    mean = jnp.mean(x, axis=-1, keepdims=True)
    var = jnp.mean(jnp.square(x - mean), axis=-1, keepdims=True)
    xn = (x - mean) * jax.lax.rsqrt(var + 1e-5)
    xn = xn * g_ref[...] + b_ref[...]

    # QKV projection on the MXU (bf16 inputs, fp32 accumulation).
    qkv = jnp.dot(xn.astype(jnp.bfloat16), wqkv_ref[...],
                  preferred_element_type=jnp.float32)        # (S, 3D) fp32
    q = qkv[:, :D]
    k = qkv[:, D:2 * D]
    v = qkv[:, 2 * D:]

    # Axial RoPE: precomputed lane-dense tables; two lane rolls (XLU) + elementwise VPU.
    cos = cos_ref[...]
    sin_lo = sinlo_ref[...]
    sin_hi = sinhi_ref[...]

    def rope(t):
        # partner at +d_rot lanes (roll by -d_rot == D - d_rot) and at -d_rot lanes.
        return (t * cos
                + pltpu.roll(t, D - d_rot, axis=lane_axis) * sin_lo
                + pltpu.roll(t, d_rot, axis=lane_axis) * sin_hi)

    q = rope(q)
    k = rope(k)

    # Stack heads (128-lane-aligned slices) and run one batched matmul per SDPA stage.
    def to_heads(t):
        return jnp.stack([t[:, h * hd:(h + 1) * hd] for h in range(H)],
                         axis=0).astype(jnp.bfloat16)           # (H, S, hd) bf16

    qh, kh, vh = to_heads(q), to_heads(k), to_heads(v)

    s = jnp.einsum("hqd,hkd->hqk", qh, kh,
                   preferred_element_type=jnp.float32) * scale  # (H, S, S) fp32
    row = jax.lax.broadcasted_iota(jnp.int32, (H, S, S), 1)
    col = jax.lax.broadcasted_iota(jnp.int32, (H, S, S), 2)
    s = jnp.where(row >= col, s, -1e30)                         # causal mask (fp32)

    # Softmax in fp32; normalization via the EUP approximate reciprocal.
    m = jnp.max(s, axis=-1, keepdims=True)
    p = jnp.exp(s - m)
    p = p * pl.reciprocal(jnp.sum(p, axis=-1, keepdims=True), approx=True)

    oh = jnp.einsum("hqk,hkd->hqd", p.astype(jnp.bfloat16), vh,
                    preferred_element_type=jnp.float32)         # (H, S, hd) fp32
    # Re-assemble (S, D); each piece is a full 128-lane tile, so this is a cheap copy.
    attn = jnp.concatenate([oh[h] for h in range(H)], axis=-1)

    out = jnp.dot(attn.astype(jnp.bfloat16), wout_ref[...],
                  preferred_element_type=jnp.float32)
    o_ref[0] = (out + x).astype(o_ref.dtype)


def _ff_block_kernel(x_ref, g_ref, b_ref, wup_ref, wdown_ref, o_ref, *, hidden_dim):
    x = x_ref[0]                                             # (S, D) fp32
    mean = jnp.mean(x, axis=-1, keepdims=True)
    var = jnp.mean(jnp.square(x - mean), axis=-1, keepdims=True)
    xn = (x - mean) * jax.lax.rsqrt(var + 1e-5)
    xn = xn * g_ref[...] + b_ref[...]

    h = jnp.dot(xn.astype(jnp.bfloat16), wup_ref[...],
                preferred_element_type=jnp.float32)          # (S, 2*hidden) fp32
    val = h[:, :hidden_dim]
    gate = h[:, hidden_dim:]
    act = val * (gate * jax.nn.sigmoid(gate))                # SwiGLU, fp32 VPU/EUP

    out = jnp.dot(act.astype(jnp.bfloat16), wdown_ref[...],
                  preferred_element_type=jnp.float32)
    o_ref[0] = (out + x).astype(o_ref.dtype)


def _final_norm_proj_kernel(x_ref, g_ref, b_ref, wvocab_ref, o_ref):
    x = x_ref[0]                                             # (S, D) fp32
    mean = jnp.mean(x, axis=-1, keepdims=True)
    var = jnp.mean(jnp.square(x - mean), axis=-1, keepdims=True)
    xn = (x - mean) * jax.lax.rsqrt(var + 1e-5)
    xn = xn * g_ref[...] + b_ref[...]
    o_ref[0] = jnp.dot(xn.astype(jnp.bfloat16), wvocab_ref[...],
                       preferred_element_type=jnp.float32).astype(o_ref.dtype)


# ================================================================== pallas_call plumbing
def _const_spec(shape):
    zeros = (0,) * len(shape)
    return pl.BlockSpec(shape, lambda b: zeros)


def _run_batched(kernel, x, consts, out_shape):
    """Grid over the batch dim; `consts` are broadcast (constant index maps)."""
    B = x.shape[0]
    x_block = (1,) + tuple(x.shape[1:])
    o_block = (1,) + tuple(out_shape.shape[1:])
    nx, no = len(x_block) - 1, len(o_block) - 1

    call = pl.pallas_call(
        kernel,
        out_shape=out_shape,
        grid_spec=pltpu.PrefetchScalarGridSpec(
            num_scalar_prefetch=0,
            grid=(B,),
            in_specs=[pl.BlockSpec(x_block, lambda b: (b,) + (0,) * nx)]
                     + [_const_spec(tuple(c.shape)) for c in consts],
            out_specs=pl.BlockSpec(o_block, lambda b: (b,) + (0,) * no),
        ),
        compiler_params=pltpu.CompilerParams(
            dimension_semantics=("parallel",),
        ),
    )
    return call(x, *consts)


# ================================================================== wrappers / glue
def make_axial_pos(h, w):
    h_pos = jnp.linspace(-1.0, 1.0, h + 1)
    w_pos = jnp.linspace(-1.0, 1.0, w + 1)
    h_pos = (h_pos[:-1] + h_pos[1:]) / 2
    w_pos = (w_pos[:-1] + w_pos[1:]) / 2
    hh, ww = jnp.meshgrid(h_pos, w_pos, indexing="ij")
    return jnp.stack([hh, ww], axis=-1).reshape(h * w, 2)


def make_theta(dim, head_dim, seq_len):
    """RoPE angles (H, S, head_dim//4), matching SelfAttention.__init__ (32x32 axial grid)."""
    n_heads = dim // head_dim
    log_min, log_max = math.log(math.pi), math.log(10 * math.pi)
    freqs = jnp.exp(jnp.linspace(log_min, log_max, head_dim // 8 * n_heads + 1)[:-1])
    freqs = freqs.reshape(head_dim // 8, n_heads).T                      # (H, hd//8)
    pos = make_axial_pos(32, 32)
    pos = jnp.concatenate([jnp.zeros((1, 2)), pos], axis=0)              # (1025, 2)
    theta_h = pos[:, None, 0:1] * freqs                                  # (1025, H, hd//8)
    theta_w = pos[:, None, 1:2] * freqs
    theta = jnp.concatenate([theta_h, theta_w], axis=-1)                 # (1025, H, hd//4)
    return jnp.transpose(theta[:seq_len], (1, 0, 2)).astype(jnp.float32)  # (H, S, hd//4)


def make_rope_tables(theta, head_dim):
    """Lane-dense (S, D) cos/sin tables for the roll-based in-kernel RoPE."""
    H, S, d = theta.shape
    cos, sin = jnp.cos(theta), jnp.sin(theta)
    one = jnp.ones((H, S, head_dim - 2 * d), jnp.float32)
    zer = jnp.zeros((H, S, head_dim - 2 * d), jnp.float32)
    zd = jnp.zeros((H, S, d), jnp.float32)
    cos_t = jnp.concatenate([cos, cos, one], axis=-1)     # multiplies t
    sin_lo = jnp.concatenate([-sin, zd, zer], axis=-1)    # multiplies the +d_rot partner
    sin_hi = jnp.concatenate([zd, sin, zer], axis=-1)     # multiplies the -d_rot partner
    to_sd = lambda t: jnp.transpose(t, (1, 0, 2)).reshape(S, H * head_dim).astype(jnp.float32)
    return to_sd(cos_t), to_sd(sin_lo), to_sd(sin_hi)


def attention_block(x, gamma, beta, w_qkv, w_out, rope_tables, *, n_heads, head_dim):
    B, S, D = x.shape
    cos_t, sin_lo, sin_hi = rope_tables
    consts = (gamma.reshape(1, D).astype(jnp.float32),
              beta.reshape(1, D).astype(jnp.float32),
              jnp.transpose(w_qkv).astype(jnp.bfloat16),      # (D, 3D) bf16
              jnp.transpose(w_out).astype(jnp.bfloat16),      # (D, D)  bf16
              cos_t, sin_lo, sin_hi)
    kernel = functools.partial(_attn_block_kernel, n_heads=n_heads, head_dim=head_dim)
    return _run_batched(kernel, x, consts, jax.ShapeDtypeStruct((B, S, D), x.dtype))


def feedforward_block(x, gamma, beta, w_up, w_down, *, hidden_dim):
    B, S, D = x.shape
    consts = (gamma.reshape(1, D).astype(jnp.float32),
              beta.reshape(1, D).astype(jnp.float32),
              jnp.transpose(w_up).astype(jnp.bfloat16),       # (D, 2*hidden) bf16
              jnp.transpose(w_down).astype(jnp.bfloat16))     # (hidden, D)   bf16
    kernel = functools.partial(_ff_block_kernel, hidden_dim=hidden_dim)
    return _run_batched(kernel, x, consts, jax.ShapeDtypeStruct((B, S, D), x.dtype))


def final_norm_proj(x, gamma, beta, w_vocab):
    B, S, D = x.shape
    V = w_vocab.shape[0]
    consts = (gamma.reshape(1, D).astype(jnp.float32),
              beta.reshape(1, D).astype(jnp.float32),
              jnp.transpose(w_vocab).astype(jnp.bfloat16))    # (D, V) bf16
    return _run_batched(_final_norm_proj_kernel, x, consts,
                        jax.ShapeDtypeStruct((B, S, V), x.dtype))


def embed_tokens(params, tokens, labels):
    # Embedding lookups are data-dependent gathers; left to XLA (jnp.take).
    x_img = jnp.take(params["image_embed"], tokens, axis=0)      # (B, L, D)
    y_cls = jnp.take(params["class_embed"], labels, axis=0)      # (B, D)
    return jnp.concatenate([y_cls[:, None, :], x_img], axis=1).astype(jnp.float32)


def transformer_forward(params, tokens, labels, *, head_dim):
    x = embed_tokens(params, tokens, labels)                     # (B, S, D)
    B, S, D = x.shape
    n_heads = D // head_dim
    theta = make_theta(D, head_dim, S)                           # (H, S, hd//4)
    rope_tables = make_rope_tables(theta, head_dim)              # three (S, D) fp32 tables
    for blk in params["blocks"]:
        x = attention_block(x, blk["attn_g"], blk["attn_b"], blk["w_qkv"], blk["w_out"],
                            rope_tables, n_heads=n_heads, head_dim=head_dim)
        x = feedforward_block(x, blk["ff_g"], blk["ff_b"], blk["w_up"], blk["w_down"],
                              hidden_dim=params["hidden_dim"])
    # out_proj weight is tied to image_embed, as in the PyTorch module.
    return final_norm_proj(x, params["out_g"], params["out_b"], params["image_embed"])


# ================================================================== fp32 references
def _ref_ln(x, g, b):
    mu = x.mean(-1, keepdims=True)
    var = ((x - mu) ** 2).mean(-1, keepdims=True)
    return (x - mu) / jnp.sqrt(var + 1e-5) * g + b


def ref_attention_block(x, gamma, beta, w_qkv, w_out, theta, *, n_heads, head_dim):
    B, S, D = x.shape
    d = theta.shape[-1]
    xn = _ref_ln(x, gamma, beta)
    qkv = (xn @ w_qkv.T).reshape(B, S, 3, n_heads, head_dim)
    q = jnp.transpose(qkv[:, :, 0], (0, 2, 1, 3))
    k = jnp.transpose(qkv[:, :, 1], (0, 2, 1, 3))
    v = jnp.transpose(qkv[:, :, 2], (0, 2, 1, 3))
    cos, sin = jnp.cos(theta)[None], jnp.sin(theta)[None]

    def rope(t):
        return jnp.concatenate(
            [t[..., :d] * cos - t[..., d:2 * d] * sin,
             t[..., d:2 * d] * cos + t[..., :d] * sin,
             t[..., 2 * d:]], axis=-1)

    q, k = rope(q), rope(k)
    s = jnp.einsum("bhqd,bhkd->bhqk", q, k) / math.sqrt(head_dim)
    s = jnp.where(jnp.tril(jnp.ones((S, S), bool)), s, -1e30)
    p = jax.nn.softmax(s, axis=-1)
    o = jnp.einsum("bhqk,bhkd->bhqd", p, v)
    o = jnp.transpose(o, (0, 2, 1, 3)).reshape(B, S, D)
    return o @ w_out.T + x


def ref_feedforward_block(x, gamma, beta, w_up, w_down, *, hidden_dim):
    xn = _ref_ln(x, gamma, beta)
    h = xn @ w_up.T
    act = h[..., :hidden_dim] * jax.nn.silu(h[..., hidden_dim:])
    return act @ w_down.T + x


def ref_final_norm_proj(x, gamma, beta, w_vocab):
    return _ref_ln(x, gamma, beta) @ w_vocab.T


def ref_transformer(params, tokens, labels, *, head_dim):
    x = embed_tokens(params, tokens, labels)
    D = x.shape[-1]
    n_heads = D // head_dim
    theta = make_theta(D, head_dim, x.shape[1])
    for blk in params["blocks"]:
        x = ref_attention_block(x, blk["attn_g"], blk["attn_b"], blk["w_qkv"], blk["w_out"],
                                theta, n_heads=n_heads, head_dim=head_dim)
        x = ref_feedforward_block(x, blk["ff_g"], blk["ff_b"], blk["w_up"], blk["w_down"],
                                  hidden_dim=params["hidden_dim"])
    return ref_final_norm_proj(x, params["out_g"], params["out_b"], params["image_embed"])


# ================================================================== main
def _check(actual, desired, name, rel):
    # Kernels use bf16 MXU inputs (fp32 accumulate) vs the pure-fp32 reference,
    # so the tolerance is scaled to the reference's magnitude.
    actual = np.asarray(jax.block_until_ready(actual))
    desired = np.asarray(desired)
    atol = rel * float(np.std(desired)) + 1e-6
    np.testing.assert_allclose(actual, desired, rtol=rel, atol=atol, err_msg=name)


if __name__ == "__main__":
    depth, dim, hidden_dim, head_dim, vocab_size = 2, 256, 512, 128, 256
    n_heads = dim // head_dim
    B, L = 2, 127
    S = L + 1                      # class token + image tokens

    key = jax.random.PRNGKey(0)
    k_embed, k_cls, k_tok, k_lab, k_og, k_ob, key = jax.random.split(key, 7)
    params = {
        "hidden_dim": hidden_dim,
        "image_embed": 0.3 * jax.random.normal(k_embed, (vocab_size, dim), jnp.float32),
        "class_embed": 0.3 * jax.random.normal(k_cls, (10, dim), jnp.float32),
        "out_g": 1.0 + 0.01 * jax.random.normal(k_og, (dim,), jnp.float32),
        "out_b": 0.01 * jax.random.normal(k_ob, (dim,), jnp.float32),
        "blocks": [],
    }
    for _ in range(depth):
        key, *ks = jax.random.split(key, 9)
        params["blocks"].append({
            "attn_g": 1.0 + 0.01 * jax.random.normal(ks[0], (dim,), jnp.float32),
            "attn_b": 0.01 * jax.random.normal(ks[1], (dim,), jnp.float32),
            # NOTE: the PyTorch module zero-inits out_proj / down; small random weights
            # are used here so those matmul paths are actually exercised.
            "w_qkv": 0.04 * jax.random.normal(ks[2], (3 * dim, dim), jnp.float32),
            "w_out": 0.04 * jax.random.normal(ks[3], (dim, dim), jnp.float32),
            "ff_g": 1.0 + 0.01 * jax.random.normal(ks[4], (dim,), jnp.float32),
            "ff_b": 0.01 * jax.random.normal(ks[5], (dim,), jnp.float32),
            "w_up": 0.04 * jax.random.normal(ks[6], (2 * hidden_dim, dim), jnp.float32),
            "w_down": 0.04 * jax.random.normal(ks[7], (dim, hidden_dim), jnp.float32),
        })

    tokens = jax.random.randint(k_tok, (B, L), 0, vocab_size)
    labels = jax.random.randint(k_lab, (B,), 0, 10)

    # --- per-kernel checks against the fp32 reference ---
    x0 = embed_tokens(params, tokens, labels)                 # (B, S, D)
    theta = make_theta(dim, head_dim, S)
    rope_tables = make_rope_tables(theta, head_dim)
    blk0 = params["blocks"][0]

    _check(attention_block(x0, blk0["attn_g"], blk0["attn_b"], blk0["w_qkv"], blk0["w_out"],
                           rope_tables, n_heads=n_heads, head_dim=head_dim),
           ref_attention_block(x0, blk0["attn_g"], blk0["attn_b"], blk0["w_qkv"],
                               blk0["w_out"], theta, n_heads=n_heads, head_dim=head_dim),
           "attention block", rel=5e-2)

    _check(feedforward_block(x0, blk0["ff_g"], blk0["ff_b"], blk0["w_up"], blk0["w_down"],
                             hidden_dim=hidden_dim),
           ref_feedforward_block(x0, blk0["ff_g"], blk0["ff_b"], blk0["w_up"], blk0["w_down"],
                                 hidden_dim=hidden_dim),
           "feedforward block", rel=5e-2)

    _check(final_norm_proj(x0, params["out_g"], params["out_b"], params["image_embed"]),
           ref_final_norm_proj(x0, params["out_g"], params["out_b"], params["image_embed"]),
           "final norm+proj", rel=5e-2)

    # --- full forward (depth=2) ---
    logits = transformer_forward(params, tokens, labels, head_dim=head_dim)
    logits = jax.block_until_ready(logits)
    assert logits.shape == (B, S, vocab_size)
    _check(logits, ref_transformer(params, tokens, labels, head_dim=head_dim),
           "transformer forward", rel=1e-1)   # bf16-vs-fp32 accumulates over 2 blocks

    print("KERNEL_OK")
</pallas_src>

<mosaic_0001>
module attributes {stable_mosaic.version = 11 : i64} {
  func.func @_attn_block_kernel(%arg0: i32, %arg1: memref<1x128x256xf32, #tpu.memory_space<vmem>>, %arg2: memref<1x256xf32, #tpu.memory_space<vmem>>, %arg3: memref<1x256xf32, #tpu.memory_space<vmem>>, %arg4: memref<256x768xbf16, #tpu.memory_space<vmem>>, %arg5: memref<256x256xbf16, #tpu.memory_space<vmem>>, %arg6: memref<128x256xf32, #tpu.memory_space<vmem>>, %arg7: memref<128x256xf32, #tpu.memory_space<vmem>>, %arg8: memref<128x256xf32, #tpu.memory_space<vmem>>, %arg9: memref<1x128x256xf32, #tpu.memory_space<vmem>>) attributes {dimension_semantics = [#tpu.dimension_semantics<parallel>], iteration_bounds = array<i64: 2>, scalar_prefetch = 0 : i64, scratch_operands = 0 : i64, tpu.core_type = #tpu.core_type<tc>, window_params = [{transform_indices = @transform_0, window_bounds = array<i64: 1, 128, 256>}, {pipeline_mode = #tpu.pipeline_mode<synchronous>, transform_indices = @transform_1, window_bounds = array<i64: 1, 256>}, {pipeline_mode = #tpu.pipeline_mode<synchronous>, transform_indices = @transform_2, window_bounds = array<i64: 1, 256>}, {pipeline_mode = #tpu.pipeline_mode<synchronous>, transform_indices = @transform_3, window_bounds = array<i64: 256, 768>}, {pipeline_mode = #tpu.pipeline_mode<synchronous>, transform_indices = @transform_4, window_bounds = array<i64: 256, 256>}, {pipeline_mode = #tpu.pipeline_mode<synchronous>, transform_indices = @transform_5, window_bounds = array<i64: 128, 256>}, {pipeline_mode = #tpu.pipeline_mode<synchronous>, transform_indices = @transform_6, window_bounds = array<i64: 128, 256>}, {pipeline_mode = #tpu.pipeline_mode<synchronous>, transform_indices = @transform_7, window_bounds = array<i64: 128, 256>}, {transform_indices = @transform_8, window_bounds = array<i64: 1, 128, 256>}]} {
    %c0 = arith.constant 0 : index
    %c0_0 = arith.constant 0 : index
    %c0_1 = arith.constant 0 : index
    %0 = vector.load %arg1[%c0, %c0_0, %c0_1] : memref<1x128x256xf32, #tpu.memory_space<vmem>>, vector<1x128x256xf32>
    %1 = vector.shape_cast %0 : vector<1x128x256xf32> to vector<128x256xf32>
    %cst = arith.constant dense<0.000000e+00> : vector<128xf32>
    %2 = vector.multi_reduction <add>, %1, %cst [1] : vector<128x256xf32> to vector<128xf32>
    %3 = vector.shape_cast %2 : vector<128xf32> to vector<128x1xf32>
    %cst_2 = arith.constant 2.560000e+02 : f32
    %4 = vector.broadcast %cst_2 : f32 to vector<128x1xf32>
    %5 = arith.divf %3, %4 : vector<128x1xf32>
    %6 = vector.broadcast %5 : vector<128x1xf32> to vector<128x256xf32>
    %7 = arith.subf %1, %6 : vector<128x256xf32>
    %8 = arith.mulf %7, %7 : vector<128x256xf32>
    %cst_3 = arith.constant dense<0.000000e+00> : vector<128xf32>
    %9 = vector.multi_reduction <add>, %8, %cst_3 [1] : vector<128x256xf32> to vector<128xf32>
    %10 = vector.shape_cast %9 : vector<128xf32> to vector<128x1xf32>
    %cst_4 = arith.constant 2.560000e+02 : f32
    %11 = vector.broadcast %cst_4 : f32 to vector<128x1xf32>
    %12 = arith.divf %10, %11 : vector<128x1xf32>
    %13 = vector.broadcast %5 : vector<128x1xf32> to vector<128x256xf32>
    %14 = arith.subf %1, %13 : vector<128x256xf32>
    %cst_5 = arith.constant 9.99999974E-6 : f32
    %15 = vector.broadcast %cst_5 : f32 to vector<128x1xf32>
    %16 = arith.addf %12, %15 : vector<128x1xf32>
    %17 = math.rsqrt %16 : vector<128x1xf32>
    %18 = vector.broadcast %17 : vector<128x1xf32> to vector<128x256xf32>
    %19 = arith.mulf %14, %18 : vector<128x256xf32>
    %c0_6 = arith.constant 0 : index
    %c0_7 = arith.constant 0 : index
    %20 = vector.load %arg2[%c0_6, %c0_7] : memref<1x256xf32, #tpu.memory_space<vmem>>, vector<1x256xf32>
    %21 = vector.broadcast %20 : vector<1x256xf32> to vector<128x256xf32>
    %22 = arith.mulf %19, %21 : vector<128x256xf32>
    %c0_8 = arith.constant 0 : index
    %c0_9 = arith.constant 0 : index
    %23 = vector.load %arg3[%c0_8, %c0_9] : memref<1x256xf32, #tpu.memory_space<vmem>>, vector<1x256xf32>
    %24 = vector.broadcast %23 : vector<1x256xf32> to vector<128x256xf32>
    %25 = arith.addf %22, %24 : vector<128x256xf32>
    %26 = arith.truncf %25 : vector<128x256xf32> to vector<128x256xbf16>
    %c0_10 = arith.constant 0 : index
    %c0_11 = arith.constant 0 : index
    %27 = vector.load %arg4[%c0_10, %c0_11] : memref<256x768xbf16, #tpu.memory_space<vmem>>, vector<256x768xbf16>
    %cst_12 = arith.constant dense<0.000000e+00> : vector<128x768xf32>
    %28 = tpu.matmul %26, %27, %cst_12 {dimension_numbers = #tpu.dot_dimension_numbers<[1], [0], [0], [1], [0, 0, 1, 1], [], []>} : vector<128x256xbf16>, vector<256x768xbf16>, vector<128x768xf32> -> vector<128x768xf32>
    %29 = vector.extract_strided_slice %28 {offsets = [0, 0], sizes = [128, 256], strides = [1, 1]} : vector<128x768xf32> to vector<128x256xf32>
    %30 = vector.extract_strided_slice %28 {offsets = [0, 256], sizes = [128, 256], strides = [1, 1]} : vector<128x768xf32> to vector<128x256xf32>
    %31 = vector.extract_strided_slice %28 {offsets = [0, 512], sizes = [128, 256], strides = [1, 1]} : vector<128x768xf32> to vector<128x256xf32>
    %c0_13 = arith.constant 0 : index
    %c0_14 = arith.constant 0 : index
    %32 = vector.load %arg6[%c0_13, %c0_14] : memref<128x256xf32, #tpu.memory_space<vmem>>, vector<128x256xf32>
    %c0_15 = arith.constant 0 : index
    %c0_16 = arith.constant 0 : index
    %33 = vector.load %arg7[%c0_15, %c0_16] : memref<128x256xf32, #tpu.memory_space<vmem>>, vector<128x256xf32>
    %c0_17 = arith.constant 0 : index
    %c0_18 = arith.constant 0 : index
    %34 = vector.load %arg8[%c0_17, %c0_18] : memref<128x256xf32, #tpu.memory_space<vmem>>, vector<128x256xf32>
    %35 = arith.mulf %29, %32 : vector<128x256xf32>
    %c224_i32 = arith.constant 224 : i32
    %36 = tpu.dynamic_rotate %29 by %c224_i32 dim 1 : vector<128x256xf32>, i32 -> vector<128x256xf32>
    %37 = arith.mulf %36, %33 : vector<128x256xf32>
    %38 = arith.addf %35, %37 : vector<128x256xf32>
    %c32_i32 = arith.constant 32 : i32
    %39 = tpu.dynamic_rotate %29 by %c32_i32 dim 1 : vector<128x256xf32>, i32 -> vector<128x256xf32>
    %40 = arith.mulf %39, %34 : vector<128x256xf32>
    %41 = arith.addf %38, %40 : vector<128x256xf32>
    %42 = arith.mulf %30, %32 : vector<128x256xf32>
    %c224_i32_19 = arith.constant 224 : i32
    %43 = tpu.dynamic_rotate %30 by %c224_i32_19 dim 1 : vector<128x256xf32>, i32 -> vector<128x256xf32>
    %44 = arith.mulf %43, %33 : vector<128x256xf32>
    %45 = arith.addf %42, %44 : vector<128x256xf32>
    %c32_i32_20 = arith.constant 32 : i32
    %46 = tpu.dynamic_rotate %30 by %c32_i32_20 dim 1 : vector<128x256xf32>, i32 -> vector<128x256xf32>
    %47 = arith.mulf %46, %34 : vector<128x256xf32>
    %48 = arith.addf %45, %47 : vector<128x256xf32>
    %49 = vector.extract_strided_slice %41 {offsets = [0, 0], sizes = [128, 128], strides = [1, 1]} : vector<128x256xf32> to vector<128x128xf32>
    %50 = vector.extract_strided_slice %41 {offsets = [0, 128], sizes = [128, 128], strides = [1, 1]} : vector<128x256xf32> to vector<128x128xf32>
    %51 = vector.shape_cast %49 : vector<128x128xf32> to vector<1x128x128xf32>
    %52 = vector.shape_cast %50 : vector<128x128xf32> to vector<1x128x128xf32>
    %53 = tpu.concatenate %51, %52 in 0 : vector<1x128x128xf32>, vector<1x128x128xf32> -> vector<2x128x128xf32>
    %54 = arith.truncf %53 : vector<2x128x128xf32> to vector<2x128x128xbf16>
    %55 = vector.extract_strided_slice %48 {offsets = [0, 0], sizes = [128, 128], strides = [1, 1]} : vector<128x256xf32> to vector<128x128xf32>
    %56 = vector.extract_strided_slice %48 {offsets = [0, 128], sizes = [128, 128], strides = [1, 1]} : vector<128x256xf32> to vector<128x128xf32>
    %57 = vector.shape_cast %55 : vector<128x128xf32> to vector<1x128x128xf32>
    %58 = vector.shape_cast %56 : vector<128x128xf32> to vector<1x128x128xf32>
    %59 = tpu.concatenate %57, %58 in 0 : vector<1x128x128xf32>, vector<1x128x128xf32> -> vector<2x128x128xf32>
    %60 = arith.truncf %59 : vector<2x128x128xf32> to vector<2x128x128xbf16>
    %61 = vector.extract_strided_slice %31 {offsets = [0, 0], sizes = [128, 128], strides = [1, 1]} : vector<128x256xf32> to vector<128x128xf32>
    %62 = vector.extract_strided_slice %31 {offsets = [0, 128], sizes = [128, 128], strides = [1, 1]} : vector<128x256xf32> to vector<128x128xf32>
    %63 = vector.shape_cast %61 : vector<128x128xf32> to vector<1x128x128xf32>
    %64 = vector.shape_cast %62 : vector<128x128xf32> to vector<1x128x128xf32>
    %65 = tpu.concatenate %63, %64 in 0 : vector<1x128x128xf32>, vector<1x128x128xf32> -> vector<2x128x128xf32>
    %66 = arith.truncf %65 : vector<2x128x128xf32> to vector<2x128x128xbf16>
    "tpu.trace_start"() <{level = 10 : i32, message = "hqd,hkd->hqk"}> : () -> ()
    %cst_21 = arith.constant dense<0.000000e+00> : vector<2x128x128xf32>
    %67 = tpu.matmul %54, %60, %cst_21 {dimension_numbers = #tpu.dot_dimension_numbers<[2], [2], [1], [1], [0, 0, 0, 1, 1, 1], [0], [0]>} : vector<2x128x128xbf16>, vector<2x128x128xbf16>, vector<2x128x128xf32> -> vector<2x128x128xf32>
    "tpu.trace_stop"() : () -> ()
    %cst_22 = arith.constant 0.0883883461 : f32
    %68 = vector.broadcast %cst_22 : f32 to vector<2x128x128xf32>
    %69 = arith.mulf %67, %68 : vector<2x128x128xf32>
    %70 = tpu.iota {dimensions = array<i32: 1>} : vector<2x128x128xi32>
    %71 = tpu.iota {dimensions = array<i32: 2>} : vector<2x128x128xi32>
    %72 = arith.cmpi sge, %70, %71 : vector<2x128x128xi32>
    %cst_23 = arith.constant -1.000000e+30 : f32
    %73 = vector.broadcast %cst_23 : f32 to vector<2x128x128xf32>
    %74 = arith.select %72, %69, %73 : vector<2x128x128xi1>, vector<2x128x128xf32>
    %cst_24 = arith.constant dense<0xFF800000> : vector<2x128xf32>
    %75 = vector.multi_reduction <maximumf>, %74, %cst_24 [2] : vector<2x128x128xf32> to vector<2x128xf32>
    %76 = vector.shape_cast %75 : vector<2x128xf32> to vector<2x128x1xf32>
    %77 = vector.broadcast %76 : vector<2x128x1xf32> to vector<2x128x128xf32>
    %78 = arith.subf %74, %77 : vector<2x128x128xf32>
    %79 = math.exp %78 : vector<2x128x128xf32>
    %cst_25 = arith.constant dense<0.000000e+00> : vector<2x128xf32>
    %80 = vector.multi_reduction <add>, %79, %cst_25 [2] : vector<2x128x128xf32> to vector<2x128xf32>
    %81 = vector.shape_cast %80 : vector<2x128xf32> to vector<2x128x1xf32>
    %82 = tpu.reciprocal %81 {approx = true} : vector<2x128x1xf32> -> vector<2x128x1xf32>
    %83 = vector.broadcast %82 : vector<2x128x1xf32> to vector<2x128x128xf32>
    %84 = arith.mulf %79, %83 : vector<2x128x128xf32>
    %85 = arith.truncf %84 : vector<2x128x128xf32> to vector<2x128x128xbf16>
    "tpu.trace_start"() <{level = 10 : i32, message = "hqk,hkd->hqd"}> : () -> ()
    %cst_26 = arith.constant dense<0.000000e+00> : vector<2x128x128xf32>
    %86 = tpu.matmul %85, %66, %cst_26 {dimension_numbers = #tpu.dot_dimension_numbers<[2], [1], [1], [2], [0, 0, 0, 1, 1, 2], [0], [0]>} : vector<2x128x128xbf16>, vector<2x128x128xbf16>, vector<2x128x128xf32> -> vector<2x128x128xf32>
    "tpu.trace_stop"() : () -> ()
    %87 = vector.extract_strided_slice %86 {offsets = [0, 0, 0], sizes = [1, 128, 128], strides = [1, 1, 1]} : vector<2x128x128xf32> to vector<1x128x128xf32>
    %88 = vector.shape_cast %87 : vector<1x128x128xf32> to vector<128x128xf32>
    %89 = vector.extract_strided_slice %86 {offsets = [1, 0, 0], sizes = [1, 128, 128], strides = [1, 1, 1]} : vector<2x128x128xf32> to vector<1x128x128xf32>
    %90 = vector.shape_cast %89 : vector<1x128x128xf32> to vector<128x128xf32>
    %91 = tpu.concatenate %88, %90 in 1 : vector<128x128xf32>, vector<128x128xf32> -> vector<128x256xf32>
    %92 = arith.truncf %91 : vector<128x256xf32> to vector<128x256xbf16>
    %c0_27 = arith.constant 0 : index
    %c0_28 = arith.constant 0 : index
    %93 = vector.load %arg5[%c0_27, %c0_28] : memref<256x256xbf16, #tpu.memory_space<vmem>>, vector<256x256xbf16>
    %cst_29 = arith.constant dense<0.000000e+00> : vector<128x256xf32>
    %94 = tpu.matmul %92, %93, %cst_29 {dimension_numbers = #tpu.dot_dimension_numbers<[1], [0], [0], [1], [0, 0, 1, 1], [], []>} : vector<128x256xbf16>, vector<256x256xbf16>, vector<128x256xf32> -> vector<128x256xf32>
    %95 = arith.addf %94, %1 : vector<128x256xf32>
    %c0_30 = arith.constant 0 : index
    %c0_31 = arith.constant 0 : index
    %c0_32 = arith.constant 0 : index
    %96 = vector.load %arg9[%c0_30, %c0_31, %c0_32] : memref<1x128x256xf32, #tpu.memory_space<vmem>>, vector<1x128x256xf32>
    %97 = vector.shape_cast %96 : vector<1x128x256xf32> to vector<128x256xf32>
    %98 = vector.shape_cast %95 : vector<128x256xf32> to vector<1x128x256xf32>
    tpu.vector_store %arg9[%c0_30, %c0_31, %c0_32], %98 {strides = array<i32>} : memref<1x128x256xf32, #tpu.memory_space<vmem>>, vector<1x128x256xf32>,
    return
  }
  func.func @transform_0(%arg0: i32) -> (i32, i32, i32) {
    %c0_i32 = arith.constant 0 : i32
    %c0_i32_0 = arith.constant 0 : i32
    %c0_i32_1 = arith.constant 0 : i32
    return %arg0, %c0_i32, %c0_i32_0 : i32, i32, i32
  }
  func.func @transform_1(%arg0: i32) -> (i32, i32) {
    %c0_i32 = arith.constant 0 : i32
    %c0_i32_0 = arith.constant 0 : i32
    %c0_i32_1 = arith.constant 0 : i32
    return %c0_i32, %c0_i32_0 : i32, i32
  }
  func.func @transform_2(%arg0: i32) -> (i32, i32) {
    %c0_i32 = arith.constant 0 : i32
    %c0_i32_0 = arith.constant 0 : i32
    %c0_i32_1 = arith.constant 0 : i32
    return %c0_i32, %c0_i32_0 : i32, i32
  }
  func.func @transform_3(%arg0: i32) -> (i32, i32) {
    %c0_i32 = arith.constant 0 : i32
    %c0_i32_0 = arith.constant 0 : i32
    %c0_i32_1 = arith.constant 0 : i32
    return %c0_i32, %c0_i32_0 : i32, i32
  }
  func.func @transform_4(%arg0: i32) -> (i32, i32) {
    %c0_i32 = arith.constant 0 : i32
    %c0_i32_0 = arith.constant 0 : i32
    %c0_i32_1 = arith.constant 0 : i32
    return %c0_i32, %c0_i32_0 : i32, i32
  }
  func.func @transform_5(%arg0: i32) -> (i32, i32) {
    %c0_i32 = arith.constant 0 : i32
    %c0_i32_0 = arith.constant 0 : i32
    %c0_i32_1 = arith.constant 0 : i32
    return %c0_i32, %c0_i32_0 : i32, i32
  }
  func.func @transform_6(%arg0: i32) -> (i32, i32) {
    %c0_i32 = arith.constant 0 : i32
    %c0_i32_0 = arith.constant 0 : i32
    %c0_i32_1 = arith.constant 0 : i32
    return %c0_i32, %c0_i32_0 : i32, i32
  }
  func.func @transform_7(%arg0: i32) -> (i32, i32) {
    %c0_i32 = arith.constant 0 : i32
    %c0_i32_0 = arith.constant 0 : i32
    %c0_i32_1 = arith.constant 0 : i32
    return %c0_i32, %c0_i32_0 : i32, i32
  }
  func.func @transform_8(%arg0: i32) -> (i32, i32, i32) {
    %c0_i32 = arith.constant 0 : i32
    %c0_i32_0 = arith.constant 0 : i32
    %c0_i32_1 = arith.constant 0 : i32
    return %arg0, %c0_i32, %c0_i32_0 : i32, i32, i32
  }
}

</mosaic_0001>

<bundles_post_ra>
// kernel: tpu_custom_call.1
= control target key start
LH: loop header
LB: loop body
LE: loop exit
PB: predicated region body
PF: predicated region fallthrough
CT: control target
= control target key end

     0   :  { %s7689_s0 = inlined_call_operand.hbm [shape: f32[2,128,256], index: 0, kind: input, shape index: {}]   ;;  %s7690_s1 = inlined_call_operand.hbm [shape: f32[1,256], index: 1, kind: input, shape index: {}]   ;;  %s7691_s2 = inlined_call_operand.vmem [shape: f32[1,256], index: 2, kind: input, shape index: {}]   ;;  %s7692_s3 = inlined_call_operand.hbm [shape: bf16[256,768], index: 3, kind: input, shape index: {}]   ;;  %s7693_s4 = inlined_call_operand.hbm [shape: bf16[256,256], index: 4, kind: input, shape index: {}]   ;;  %s7694_s5 = inlined_call_operand.hbm [shape: f32[128,256], index: 5, kind: input, shape index: {}]   ;;  %s7695_s6 = inlined_call_operand.hbm [shape: f32[128,256], index: 6, kind: input, shape index: {}]   ;;  %s7696_s7 = inlined_call_operand.hbm [shape: f32[128,256], index: 7, kind: input, shape index: {}]   ;;  %s7697_s8 = inlined_call_operand.hbm [shape: f32[2,128,256], index: 8, kind: output, shape index: {}]  }
   0x1   :  { %7833 = sst [smem:[#allocation126_spill]] %s7690_s1 }
   0x2   :  { %7834 = sst [smem:[#allocation127_spill]] %s7692_s3 }
   0x3   :  { %13 = vsyncpa [#allocation3], 0 }
   0x4   :  { %15 = vsyncpa [#allocation3 + $0x1], 0 }
   0x5   :  { %16 = vsyncpa [#allocation6], 0 }
   0x6   :  { %17 = vsyncpa [#allocation9], 0 }
   0x7   :  { %18 = vsyncpa [#allocation12], 0 }
   0x8   :  { %19 = vsyncpa [#allocation4], 0 }
   0x9   :  { %21 = vsyncpa [#allocation4 + $0x1], 0  ;;  %s5030_s27 = smov 0   ;;  %s5032_s28 = smov 0  }
   0xa   :  { %s5034_s29 = smov 0   ;;  %s5036_s30 = smov 0  }
   0xb LB: > { %s4967_s9 = smov [#allocation5]   ;;  %s5051_s11 = sadd.s32 4294967295, %s4965_s30   ;;  %s4965_s30 = sphi %s5036_s30, %s8135_s30   ;;  %s4961_s29 = sphi %s5034_s29, %s8134_s29   ;;  %s4957_s28 = sphi %s5032_s28, %s8133_s28   ;;  %s4953_s27 = sphi %s5030_s27, %s8132_s27  }
   0xc   : > { %s244_s10 = sshll.u32 %s4967_s9, 4  ;;  %p3857_p0 = scmp.ge.s32.totalorder %s4965_s30, 1  ;;  %s245_s10 = int_to_ptr.vmem [resolvable:$true] %s244_s10 }
   0xd   : > { %p7700_p1 = scmp.eq.s32.totalorder %s5051_s11, 0  ;;  %p231_p2 = scmp.lt.s32.totalorder %s4965_s30, 3 }
   0xe   : > { %s4968_s13 = smov [#allocation8]   ;;  %s4969_s16 = smov [#allocation11]  }
   0xf   : > { %p5056_p3 = pnand %p3857_p0, %p231_p2  ;;  %s270_s14 = sshll.u32 %s4968_s13, 4  ;;  %s5063_s14 = int_to_ptr.vmem [resolvable:$true] %s270_s14 }
  0x10   : > { %s296_s17 = sshll.u32 %s4969_s16, 4  ;;  %s4716_s19 = scalar_lea.vmem %s245_s10, 32  ;;  %s297_s17 = int_to_ptr.vmem [resolvable:$true] %s296_s17 }
  0x11   : > { %s7835_s12 = scalar_select %p5056_p3, 1, 0 }
  0x12   : > { %p4232_p5 = pneg %p5056_p3  ;;  %p4717_p8 = scmp.ne.s32.totalorder %s245_s10, %s4716_s19 }
  0x13   : > { %p4724_p11 = scmp.lt.s32.totalorder %s245_s10, %s245_s10  ;;  %p4725_p12 = scmp.lt.s32.totalorder %s4716_s19, %s4716_s19 }
  0x14   : > { %p5067_p6 = pnand %p4232_p5, %p7700_p1 }
  0x15   : > { %p4726_p13 = por %p4725_p12, %p4724_p11 }
  0x16   : > { %p5073_p7 = pneg %p5067_p6 }
  0x18   : > { %p4719_p9 = pnand %p4717_p8, %p5073_p7 }
  0x1a   : > { %p4720_p10 = pneg %p4719_p9 }
  0x1c   : > { %p4727_p0 = pnand %p4726_p13, %p4720_p10 }
  0x1e   : > { %4730 = shalt.err (!%p4727_p0)
}
  0x1f   : > { %s7838_s1 = sld [smem:[#allocation126_spill]]  ;;  %s4742_s22 = scalar_lea.vmem %s5063_s14, 4096 }
  0x20   : > { %p4743_p2 = scmp.ne.s32.totalorder %s5063_s14, %s4742_s22  ;;  %p4750_p9 = scmp.lt.s32.totalorder %s5063_s14, %s5063_s14 }
  0x21   : > { %p4751_p11 = scmp.lt.s32.totalorder %s4742_s22, %s4742_s22 }
  0x22   : > { %p4745_p5 = pnand %p4743_p2, %p5073_p7 }
  0x23   : > { %p4752_p10 = por %p4751_p11, %p4750_p9 }
  0x24   : > { %p4746_p8 = pneg %p4745_p5 }
  0x25   : > { %4235 = dma.hbm_to_vmem [thread:$0]  (!%p5067_p6), %s7838_s1, 32, %s245_s10, [#allocation6]  }
  0x26   : > { %p4753_p12 = pnand %p4752_p10, %p4746_p8 }
  0x28   : > { %4756 = shalt.err (!%p4753_p12)
}
  0x29   : > { %s4970_s23 = smov 128   ;;  %s4971_s24 = smov 8  }
  0x2a   : > { %4241 = dma.hbm_to_vmem [thread:$0]  (!%p5067_p6), %s7693_s4, 4096, %s5063_s14, [#allocation9], %s4970_s23, %s4970_s23, %s4971_s24  }
  0x2b   : > { %s4768_s9 = scalar_lea.vmem %s297_s17, 4096  ;;  %p4776_p5 = scmp.lt.s32.totalorder %s297_s17, %s297_s17 }
  0x2c   : > { %p4769_p13 = scmp.ne.s32.totalorder %s297_s17, %s4768_s9  ;;  %p4777_p9 = scmp.lt.s32.totalorder %s4768_s9, %s4768_s9 }
  0x2e   : > { %p4771_p0 = pnand %p4769_p13, %p5073_p7  ;;  %p4778_p8 = por %p4777_p9, %p4776_p5 }
  0x30   : > { %p4772_p2 = pneg %p4771_p0 }
  0x32   : > { %p4779_p11 = pnand %p4778_p8, %p4772_p2 }
  0x34   : > { %4782 = shalt.err (!%p4779_p11)
}
  0x35   : > { %s7698_s10 = smov 256   ;;  %s7699_s13 = smov 16  }
  0x36   : > { %4247 = dma.hbm_to_vmem [thread:$0]  (!%p5067_p6), %s7695_s6, 4096, %s297_s17, [#allocation12], %s7698_s10, %s7698_s10, %s7699_s13  }
  0x37   : > { %s4974_s19 = smov [#allocation7]  }
  0x38   : > { %s257_s20 = sshll.u32 %s4974_s19, 4  ;;  %s258_s20 = int_to_ptr.vmem [resolvable:$true] %s257_s20 }
  0x39   : > { %s4794_s21 = scalar_lea.vmem %s258_s20, 12288  ;;  %p4802_p0 = scmp.lt.s32.totalorder %s258_s20, %s258_s20 }
  0x3a   : > { %p4795_p10 = scmp.ne.s32.totalorder %s258_s20, %s4794_s21  ;;  %p4803_p2 = scmp.lt.s32.totalorder %s4794_s21, %s4794_s21 }
  0x3c   : > { %p4797_p12 = pnand %p4795_p10, %p5073_p7  ;;  %p4804_p5 = por %p4803_p2, %p4802_p0 }
  0x3e   : > { %p4798_p13 = pneg %p4797_p12 }
  0x40   : > { %p4805_p9 = pnand %p4804_p5, %p4798_p13 }
  0x42   : > { %4808 = shalt.err (!%p4805_p9)
}
  0x43   : > { %s4975_s22 = smov 384   ;;  %s4976_s23 = smov 24  }
  0x44   : > { %s7839_s3 = sld [smem:[#allocation127_spill]]  ;;  %s4977_s25 = smov [#allocation10]  }
  0x45   : > { %s283_s26 = sshll.u32 %s4977_s25, 4  ;;  %s4978_s9 = smov [#allocation13]   ;;  %s284_s26 = int_to_ptr.vmem [resolvable:$true] %s283_s26 }
  0x46   : > { %s309_s14 = sshll.u32 %s4978_s9, 4  ;;  %s4820_s16 = scalar_lea.vmem %s284_s26, 4096  ;;  %s310_s14 = int_to_ptr.vmem [resolvable:$true] %s309_s14 }
  0x47   : > { %p4821_p8 = scmp.ne.s32.totalorder %s284_s26, %s4820_s16  ;;  %p4828_p12 = scmp.lt.s32.totalorder %s284_s26, %s284_s26 }
  0x48   : > { %p4829_p13 = scmp.lt.s32.totalorder %s4820_s16, %s4820_s16 }
  0x49   : > { %p4823_p11 = pnand %p4821_p8, %p5073_p7 }
  0x4a   : > { %4238 = dma.hbm_to_vmem [thread:$0]  (!%p5067_p6), %s7839_s3, 12288, %s258_s20, [#allocation6], %s4975_s22, %s4975_s22, %s4976_s23  }
  0x4b   : > { %p4824_p10 = pneg %p4823_p11  ;;  %p4830_p0 = por %p4829_p13, %p4828_p12 }
  0x4d   : > { %p4831_p2 = pnand %p4830_p0, %p4824_p10 }
  0x4f   : > { %4834 = shalt.err (!%p4831_p2)
}
  0x50   : > { %4244 = dma.hbm_to_vmem [thread:$0]  (!%p5067_p6), %s7694_s5, 4096, %s284_s26, [#allocation9], %s7698_s10, %s7698_s10, %s7699_s13  }
  0x51   : > { %s4846_s21 = scalar_lea.vmem %s310_s14, 4096  ;;  %p4854_p11 = scmp.lt.s32.totalorder %s310_s14, %s310_s14 }
  0x52   : > { %p4847_p5 = scmp.ne.s32.totalorder %s310_s14, %s4846_s21  ;;  %p4855_p4 = scmp.lt.s32.totalorder %s4846_s21, %s4846_s21 }
  0x54   : > { %p4849_p9 = pnand %p4847_p5, %p5073_p7  ;;  %p4856_p12 = por %p4855_p4, %p4854_p11 }
  0x56   : > { %p4850_p8 = pneg %p4849_p9 }
  0x58   : > { %p4857_p10 = pnand %p4856_p12, %p4850_p8 }
  0x5a   : > { %4860 = shalt.err (!%p4857_p10)
}
  0x5b   : > { %4250 = dma.hbm_to_vmem [thread:$0]  (!%p5067_p6), %s7696_s7, 4096, %s310_s14, [#allocation12], %s7698_s10, %s7698_s10, %s7699_s13  }
  0x5c   : > { %s3856_s15 = sadd.s32 4294967294, %s4965_s30   ;;  %s5135_s18 = sadd.s32 1, %s4965_s30  }
  0x5d   : > { %s31_s24 = ssub.s32 %s4965_s30, %s5135_s18  ;;  %s34_s17 = sadd.s32 1, %s4961_s29 }
  0x5e   : > { %p32_p4 = scmp.eq.s32.totalorder %s31_s24, 0  ;;  %p41_p7 = scmp.ne.s32.totalorder %s4961_s29, %s4957_s28 }
  0x5f   : > { %p42_p13 = scmp.eq.s32.totalorder %s4965_s30, 0  ;;  %p47_p0 = scmp.ne.s32.totalorder %s4957_s28, %s4953_s27 }
  0x60   : > { %s5146_s25 = scalar_select %p32_p4, %s4961_s29, %s34_s17  }
  0x61   : > { %p5148_p2 = por %p42_p13, %p41_p7  ;;  %p5154_p6 = por %p7700_p1, %p47_p0 }
  0x62   : > { %p218_p5 = scmp.eq.s32.totalorder %s5051_s11, 1  ;;  %p224_p9 = scmp.eq.s32.totalorder %s3856_s15, 1 }
  0x63   : > { %s7841_s9 = scalar_select %p5154_p6, 1, 0 }
  0x64   : > { %p4265_p8 = scmp.lt.s32.totalorder %s4965_s30, 2  ;;  %s323_s14 = sand.u32 1, %s4961_s29  }
  0x65   : > { %p5161_p11 = por %p218_p5, %p41_p7  ;;  %p5165_p12 = por %p224_p9, %p47_p0 }
  0x66   : > { %s3865_s20 = sshll.u32 %s323_s14, 8  ;;  %s4010_s21 = sshll.u32 %s4965_s30, 12 }
  0x67   : > { %s7842_s16 = scalar_select %p5161_p11, 1, 0 }
  0x68   : > { %s7843_s19 = scalar_select %p5165_p12, 1, 0 }
  0x69   : > { %s5173_s24 = scalar_lea.hbm %s7689_s0, %s4010_s21  ;;  %s327_s15 = scalar_lea.vmem [#allocation2], %s3865_s20 }
  0x6a   : > { %s334_s17 = sshll.u32 %s327_s15, 4  ;;  %p5179_p10 = pnand %p4265_p8, %p5148_p2  ;;  %s5175_s17 = int_to_ptr.vmem [resolvable:$true] %s334_s17 }
  0x6b   : > { %s5183_s13 = scalar_lea.sflag [#allocation3], %s323_s14  ;;  %s4861_s1 = scalar_lea.hbm %s5173_s24, 4096 }
  0x6c   : > { %p4862_p4 = scmp.ne.s32.totalorder %s5173_s24, %s4861_s1  ;;  %p4863_p7 = pneg %p5179_p10 }
  0x6d   : > { %s4866_s20 = scalar_lea.hbm %s7689_s0, 8192  ;;  %p4867_p2 = scmp.lt.s32.totalorder %s5173_s24, %s7689_s0 }
  0x6e   : > { %p4864_p13 = pnand %p4863_p7, %p4862_p4  ;;  %p4868_p5 = scmp.lt.s32.totalorder %s4866_s20, %s4861_s1 }
  0x70   : > { %p4865_p0 = pneg %p4864_p13  ;;  %p4869_p9 = por %p4868_p5, %p4867_p2 }
  0x72   : > { %p4870_p8 = pnand %p4869_p9, %p4865_p0 }
  0x74   : > { %4873 = shalt.err (!%p4870_p8)
}
  0x75   : > { %s4874_s26 = scalar_lea.vmem %s5175_s17, 4096  ;;  %s4979_s14 = smov [#allocation2]  }
  0x76   : > { %p4875_p1 = scmp.ne.s32.totalorder %s5175_s17, %s4874_s26  ;;  %s4879_s3 = sshll.u32 %s4979_s14, 4  ;;  %s4880_s3 = int_to_ptr.vmem [resolvable:$false] %s4879_s3 }
  0x77   : > { %s4881_s21 = scalar_lea.vmem %s4880_s3, 8192  ;;  %p4882_p13 = scmp.lt.s32.totalorder %s5175_s17, %s4880_s3 }
  0x78   : > { %p4877_p12 = pnand %p4875_p1, %p4863_p7  ;;  %p4883_p11 = scmp.lt.s32.totalorder %s4881_s21, %s4874_s26 }
  0x7a   : > { %p4878_p4 = pneg %p4877_p12  ;;  %p4884_p6 = por %p4883_p11, %p4882_p13 }
  0x7c   : > { %p4885_p3 = pnand %p4884_p6, %p4878_p4 }
  0x7e   : > { %4888 = shalt.err (!%p4885_p3)
}
  0x7f   : > { %s7845_s1 = smov 16   ;;  %s7846_s22 = smov 256  }
  0x80   : > { %4254 = dma.hbm_to_vmem [thread:$0]  (!%p5179_p10), %s5173_s24, 4096, %s5175_s17, %s5183_s13, %s7846_s22, %s7846_s22, %s7845_s1  }
  0x81   : > { %p7847_p1 = scmp.ne.s32.totalorder %s7835_s12, 0 }
  0x83   : > { %346 = sbr.rel (%p7847_p1) target bundleno = 2066 (0x812), region = 52 }
  0x88   : > { %s5210_s20 = sand.u32 1, %s4957_s28   ;;  %p7848_p3 = scmp.ne.s32.totalorder %s7841_s9, 0 }
  0x89   : > { %s3869_s3 = sshll.u32 %s5210_s20, 8  ;;  %s349_s23 = scalar_lea.sflag [#allocation3], %s5210_s20 }
  0x8a   : > { %s5216_s10 = scalar_lea.vmem [#allocation2], %s3869_s3 }
  0x8b   : > { %4932 = dma.done.wait (%p7848_p3), %s349_s23, 4096  }
  0x8c   : > { %4934 = vsyncadd (%p7848_p3), %s349_s23, 4294963200  ;;  %p7849_p6 = scmp.eq.s32.totalorder %s5051_s11, 0 }
  0x8e   : > { %4936 = dma.done.wait (%p7849_p6), [#allocation6], 12320   ;;  %p7850_p11 = pmov %p7849_p6 }
  0x8f   : > { %p7851_p12 = pmov %p7849_p6 }
  0x90   : > { %4938 = vsyncadd (%p7850_p11), [#allocation6], 4294954976 }
  0x91   : > { %4940 = dma.done.wait (%p7851_p12), [#allocation9], 8192   ;;  %p7852_p10 = pmov %p7849_p6 }
  0x92   : > { %p7853_p7 = pmov %p7849_p6 }
  0x93   : > { %4942 = vsyncadd (%p7852_p10), [#allocation9], 4294959104 }
  0x94   : > { %4944 = dma.done.wait (%p7853_p7), [#allocation12], 8192   ;;  %p7854_p0 = pmov %p7849_p6 }
  0x95   : > { %v5235_v0 = vld [vmem:[%s5216_s10] sm:$0xff]  ;;  %v5238_v1 = vld [vmem:[%s5216_s10 + $0x8] sm:$0xff]  ;;  %v5249_v5 = vld [vmem:[%s5216_s10 + $0x10] sm:$0xff]  ;;  %s4980_s9 = smov 96   ;;  %s4981_s24 = smov 32  }
  0x96   : > { %4946 = vsyncadd (%p7854_p0), [#allocation12], 4294959104  ;;  %v5241_v2 = vld [vmem:[%s5216_s10 + $0x20] sm:$0xff]  ;;  %v442_v3 = vadd.f32 %v5238_v1, %v5235_v0  ;;  %v5246_v4 = vld [vmem:[%s5216_s10 + $0x28] sm:$0xff]  ;;  %s7574_s17 = scalar_lea.vmem [#allocation14], %s3869_s3  ;;  %s4011_s15 = sshll.u32 %s5051_s11, 12 }
  0x97   : > { %v5252_v6 = vld [vmem:[%s5216_s10 + $0x18] sm:$0xff]  ;;  %v448_v7 = vadd.f32 %v5246_v4, %v5241_v2  ;;  %v5257_v8 = vld [vmem:[%s5216_s10 + $0x30] sm:$0xff]  ;;  %v5267_v12 = vld [vmem:[%s5216_s10 + $0x40] sm:$0xff]  ;;  %s3726_s26 = sshll.u32 %s7574_s17, 4  ;;  %s7641_s1 = scalar_lea.hbm %s7697_s8, %s4011_s15  ;;  %s7643_s26 = int_to_ptr.vmem [resolvable:$true] %s3726_s26 }
  0x98   : > { %v5260_v9 = vld [vmem:[%s5216_s10 + $0x38] sm:$0xff]  ;;  %443 = vadd.xlane.f32.xlu0 %v442_v3  ;;  %v445_v10 = vadd.f32 %v5252_v6, %v5249_v5  ;;  %v5270_v13 = vld [vmem:[%s5216_s10 + $0x48] sm:$0xff]  ;;  %v5273_v14 = vld [vmem:[%s5216_s10 + $0x50] sm:$0xff]  ;;  %s3713_s11 = scalar_lea.sflag [#allocation4], %s5210_s20  ;;  %s4889_s22 = scalar_lea.vmem %s7643_s26, 4096 }
  0x99   : > { %449 = vadd.xlane.f32.xlu1 %v448_v7  ;;  %v451_v11 = vadd.f32 %v5260_v9, %v5257_v8  ;;  %v5276_v15 = vld [vmem:[%s5216_s10 + $0x58] sm:$0xff]  ;;  %v454_v16 = vadd.f32 %v5270_v13, %v5267_v12  ;;  %v5283_v18 = vld [vmem:[%s5216_s10 + $0x60] sm:$0xff]  ;;  %v5286_v19 = vld [vmem:[%s5216_s10 + $0x68] sm:$0xff]  ;;  %p4890_p2 = scmp.ne.s32.totalorder %s7643_s26, %s4889_s22  ;;  %p8129_p5 = scmp.ne.s32.totalorder %s7842_s16, 0 }
  0x9a   : > { %v457_v17 = vadd.f32 %v5276_v15, %v5273_v14  ;;  %v5289_v20 = vld [vmem:[%s5216_s10 + $0x70] sm:$0xff]  ;;  %v5292_v21 = vld [vmem:[%s5216_s10 + $0x78] sm:$0xff]  ;;  %v5295_v22 = vld [vmem:[%s5216_s10 + $0x80] sm:$0xff]  ;;  %v460_v24 = vadd.f32 %v5286_v19, %v5283_v18  ;;  %s4982_s3 = smov [#allocation14]  }
  0x9b   : > { %v5298_v23 = vld [vmem:[%s5216_s10 + $0x88] sm:$0xff]  ;;  %v5303_v25 = vld [vmem:[%s5216_s10 + $0x90] sm:$0xff]  ;;  %v5306_v26 = vld [vmem:[%s5216_s10 + $0x98] sm:$0xff]  ;;  %v463_v27 = vadd.f32 %v5292_v21, %v5289_v20  ;;  %p4891_p9 = pnand %p4890_p2, %p8129_p5  ;;  %s4893_s23 = sshll.u32 %s4982_s3, 4  ;;  %s4894_s23 = int_to_ptr.vmem [resolvable:$false] %s4893_s23 }
  0x9c   : > { %446 = vadd.xlane.f32.xlu0 %v445_v10  ;;  %v5311_v28 = vld [vmem:[%s5216_s10 + $0xa0] sm:$0xff]  ;;  %v5314_v29 = vld [vmem:[%s5216_s10 + $0xa8] sm:$0xff]  ;;  %v466_v30 = vadd.f32 %v5298_v23, %v5295_v22  ;;  %v5319_v31 = vld [vmem:[%s5216_s10 + $0xb0] sm:$0xff]  ;;  %v469_v33 = vadd.f32 %v5306_v26, %v5303_v25  ;;  %s4895_s12 = scalar_lea.vmem %s4894_s23, 8192  ;;  %p4896_p4 = scmp.lt.s32.totalorder %s7643_s26, %s4894_s23 }
  0x9d   : > { %452 = vadd.xlane.f32.xlu1 %v451_v11  ;;  %v5322_v32 = vld [vmem:[%s5216_s10 + $0xb8] sm:$0xff]  ;;  %v5327_v34 = vld [vmem:[%s5216_s10 + $0xc0] sm:$0xff]  ;;  %v5330_v35 = vld [vmem:[%s5216_s10 + $0xc8] sm:$0xff]  ;;  %v472_v36 = vadd.f32 %v5314_v29, %v5311_v28  ;;  %p4892_p8 = pneg %p4891_p9  ;;  %p4897_p13 = scmp.lt.s32.totalorder %s4895_s12, %s4889_s22 }
  0x9e   : > { %v5335_v37 = vld [vmem:[%s5216_s10 + $0xd0] sm:$0xff]  ;;  %v5338_v38 = vld [vmem:[%s5216_s10 + $0xd8] sm:$0xff]  ;;  %v475_v39 = vadd.f32 %v5322_v32, %v5319_v31  ;;  %v5343_v40 = vld [vmem:[%s5216_s10 + $0xe0] sm:$0xff]  ;;  %v478_v42 = vadd.f32 %v5330_v35, %v5327_v34 }
  0x9f   : > { %v5346_v41 = vld [vmem:[%s5216_s10 + $0xe8] sm:$0xff]  ;;  %v5351_v43 = vld [vmem:[%s5216_s10 + $0xf0] sm:$0xff]  ;;  %v5354_v44 = vld [vmem:[%s5216_s10 + $0xf8] sm:$0xff]  ;;  %v481_v45 = vadd.f32 %v5338_v38, %v5335_v37  ;;  %p4898_p1 = por %p4897_p13, %p4896_p4 }
  0xa0   : > { %455 = vadd.xlane.f32.xlu0 %v454_v16  ;;  %v484_v46 = vadd.f32 %v5346_v41, %v5343_v40  ;;  %v487_v47 = vadd.f32 %v5354_v44, %v5351_v43  ;;  %v4321_v48 = vld [vmem:[#allocation7 + $0x154] ss:$24 sps:$4 sm:$0xff]   ;;  %v4323_v49 = vld [vmem:[#allocation7 + $0x164] ss:$24 sps:$4 sm:$0xff]   ;;  %v4325_v50 = vld [vmem:[#allocation7 + $0x150] ss:$24 sps:$4 sm:$0xff]  }
  0xa1   : > { %458 = vadd.xlane.f32.xlu1 %v457_v17  ;;  %v4326_v51 = vld [vmem:[#allocation7 + $0x160] ss:$24 sps:$4 sm:$0xff]   ;;  %v4327_v52 = vld [vmem:[#allocation7 + $0x124] ss:$24 sps:$4 sm:$0xff]   ;;  %v4329_v53 = vld [vmem:[#allocation7 + $0x134] ss:$24 sps:$4 sm:$0xff]   ;;  %1379 = vmatprep.subr.bf16.mxu1 %v4321_v48  ;;  %p4899_p3 = pnand %p4898_p1, %p4892_p8 }
  0xa2   : > { %1605 = vmatprep.subr.bf16.mxu0 %v4323_v49  ;;  %1380 = vmatpush1.bf16.msra.mxu1 %v4325_v50  ;;  %v4331_v54 = vld [vmem:[#allocation7 + $0x120] ss:$24 sps:$4 sm:$0xff]   ;;  %v4332_v55 = vld [vmem:[#allocation7 + $0x130] ss:$24 sps:$4 sm:$0xff]   ;;  %v4333_v56 = vld [vmem:[#allocation7 + $0xf4] ss:$24 sps:$4 sm:$0xff]  }
  0xa3   : > { %1606 = vmatpush1.bf16.msra.mxu0 %v4326_v51  ;;  %1381 = vmatprep.subr.bf16.mxu1 %v4327_v52  ;;  %v4335_v57 = vld [vmem:[#allocation7 + $0x104] ss:$24 sps:$4 sm:$0xff]   ;;  %v4337_v58 = vld [vmem:[#allocation7 + $0xf0] ss:$24 sps:$4 sm:$0xff]   ;;  %v4338_v59 = vld [vmem:[#allocation7 + $0x100] ss:$24 sps:$4 sm:$0xff]  }
  0xa4   : > { %461 = vadd.xlane.f32.xlu0 %v460_v24  ;;  %1607 = vmatprep.subr.bf16.mxu0 %v4329_v53  ;;  %v4339_v60 = vld [vmem:[#allocation7 + $0xc4] ss:$24 sps:$4 sm:$0xff]   ;;  %v4341_v61 = vld [vmem:[#allocation7 + $0xd4] ss:$24 sps:$4 sm:$0xff]   ;;  %v4343_v62 = vld [vmem:[#allocation7 + $0xc0] ss:$24 sps:$4 sm:$0xff]  }
  0xa5   : > { %464 = vadd.xlane.f32.xlu1 %v463_v27  ;;  %v4344_v63 = vld [vmem:[#allocation7 + $0xd0] ss:$24 sps:$4 sm:$0xff]   ;;  %v4345_v3 = vld [vmem:[#allocation7 + $0x94] ss:$24 sps:$4 sm:$0xff]   ;;  %v4347_v7 = vld [vmem:[#allocation7 + $0xa4] ss:$24 sps:$4 sm:$0xff]  }
  0xa6   : > { %1382 = vmatpush1.bf16.msra.mxu1 %v4331_v54  ;;  %v4349_v10 = vld [vmem:[#allocation7 + $0x90] ss:$24 sps:$4 sm:$0xff]   ;;  %v4350_v11 = vld [vmem:[#allocation7 + $0xa0] ss:$24 sps:$4 sm:$0xff]   ;;  %v4351_v16 = vld [vmem:[#allocation7 + $0x64] ss:$24 sps:$4 sm:$0xff]  }
  0xa7   : > { %1608 = vmatpush1.bf16.msra.mxu0 %v4332_v55  ;;  %1383 = vmatprep.subr.bf16.mxu1 %v4333_v56  ;;  %v4353_v17 = vld [vmem:[#allocation7 + $0x74] ss:$24 sps:$4 sm:$0xff]   ;;  %v4355_v24 = vld [vmem:[#allocation7 + $0x60] ss:$24 sps:$4 sm:$0xff]   ;;  %v4356_v27 = vld [vmem:[#allocation7 + $0x70] ss:$24 sps:$4 sm:$0xff]  }
  0xa8   : > { %467 = vadd.xlane.f32.xlu0 %v466_v30  ;;  %1609 = vmatprep.subr.bf16.mxu0 %v4335_v57  ;;  %v4357_v30 = vld [vmem:[#allocation7 + $0x34] ss:$24 sps:$4 sm:$0xff]   ;;  %v4371_v49 = vld [vmem:[#allocation7 + $0x2e4] ss:$24 sps:$4 sm:$0xff]  }
  0xa9   : > { %470 = vadd.xlane.f32.xlu1 %v469_v33  ;;  %v4359_v33 = vld [vmem:[#allocation7 + $0x44] ss:$24 sps:$4 sm:$0xff]   ;;  %v4369_v48 = vld [vmem:[#allocation7 + $0x2d4] ss:$24 sps:$4 sm:$0xff]  }
  0xaa   : > { %1384 = vmatpush1.bf16.msra.mxu1 %v4337_v58 }
  0xab   : > { %1610 = vmatpush1.bf16.msra.mxu0 %v4338_v59  ;;  %1385 = vmatprep.subr.bf16.mxu1 %v4339_v60 }
  0xac   : > { %473 = vadd.xlane.f32.xlu0 %v472_v36  ;;  %1611 = vmatprep.subr.bf16.mxu0 %v4341_v61  ;;  %v4361_v36 = vld [vmem:[#allocation7 + $0x30] ss:$24 sps:$4 sm:$0xff]  }
  0xad   : > { %476 = vadd.xlane.f32.xlu1 %v475_v39  ;;  %v4362_v39 = vld [vmem:[#allocation7 + $0x40] ss:$24 sps:$4 sm:$0xff]  }
  0xae   : > { %1386 = vmatpush1.bf16.msra.mxu1 %v4343_v62 }
  0xaf   : > { %1612 = vmatpush1.bf16.msra.mxu0 %v4344_v63  ;;  %1387 = vmatprep.subr.bf16.mxu1 %v4345_v3 }
  0xb0   : > { %479 = vadd.xlane.f32.xlu0 %v478_v42  ;;  %1613 = vmatprep.subr.bf16.mxu0 %v4347_v7  ;;  %v4363_v42 = vld [vmem:[#allocation7 + $0x4] ss:$24 sps:$4 sm:$0xff]  }
  0xb1   : > { %482 = vadd.xlane.f32.xlu1 %v481_v45  ;;  %v4365_v45 = vld [vmem:[#allocation7 + $0x14] ss:$24 sps:$4 sm:$0xff]  }
  0xb2   : > { %1388 = vmatpush1.bf16.msra.mxu1 %v4349_v10 }
  0xb3   : > { %1614 = vmatpush1.bf16.msra.mxu0 %v4350_v11  ;;  %1389 = vmatprep.subr.bf16.mxu1 %v4351_v16 }
  0xb4   : > { %485 = vadd.xlane.f32.xlu0 %v484_v46  ;;  %1615 = vmatprep.subr.bf16.mxu0 %v4353_v17  ;;  %v4367_v46 = vld [vmem:[#allocation7] ss:$24 sps:$4 sm:$0xff]  }
  0xb5   : > { %488 = vadd.xlane.f32.xlu1 %v487_v47  ;;  %v4368_v47 = vld [vmem:[#allocation7 + $0x10] ss:$24 sps:$4 sm:$0xff]  }
  0xb6   : > { %1390 = vmatpush1.bf16.msra.mxu1 %v4355_v24 }
  0xb7   : > { %1616 = vmatpush1.bf16.msra.mxu0 %v4356_v27  ;;  %1391 = vmatprep.subr.bf16.mxu1 %v4357_v30 }
  0xb8   : > { %1617 = vmatprep.subr.bf16.mxu0 %v4359_v33 }
  0xba   : > { %1392 = vmatpush1.bf16.msra.mxu1 %v4361_v36 }
  0xbb   : > { %1618 = vmatpush1.bf16.msra.mxu0 %v4362_v39  ;;  %1393 = vmatprep.subr.bf16.mxu1 %v4363_v42 }
  0xbc   : > { %1619 = vmatprep.subr.bf16.mxu0 %v4365_v45 }
  0xbe   : > { %1394 = vmatpush1.bf16.msra.mxu1 %v4367_v46 }
  0xbf   : > { %1620 = vmatpush1.bf16.msra.mxu0 %v4368_v47  ;;  %1395 = vmatprep.subr.bf16.mxu1 %v4369_v48 }
  0xc0   : > { %1621 = vmatprep.subr.bf16.mxu0 %v4371_v49 }
 0x121   : > { %v444_v50 = vpop.xlane.xlu0 %443 }
 0x122   : > { %v491_v51 = vmul.f32 0.00390625, %v444_v50  ;;  %v450_v52 = vpop.xlane.xlu1 %449 }
 0x123   : > { %v493_v53 = vmul.f32 0.00390625, %v450_v52 }
 0x124   : > { %v5363_v54 = vsub.f32 %v5235_v0, %v491_v51  ;;  %v5366_v55 = vsub.f32 %v5238_v1, %v491_v51 }
 0x125   : > { %v5369_v56 = vsub.f32 %v5241_v2, %v493_v53  ;;  %v5372_v57 = vsub.f32 %v5246_v4, %v493_v53  ;;  %v447_v58 = vpop.xlane.xlu0 %446 }
 0x126   : > { %v492_v59 = vmul.f32 0.00390625, %v447_v58  ;;  %v453_v60 = vpop.xlane.xlu1 %452  ;;  %v539_v61 = vmul.f32 %v5363_v54, %v5363_v54  ;;  %v540_v62 = vmul.f32 %v5366_v55, %v5366_v55 }
 0x127   : > { %v494_v0 = vmul.f32 0.00390625, %v453_v60  ;;  %v543_v1 = vmul.f32 %v5369_v56, %v5369_v56  ;;  %v544_v2 = vmul.f32 %v5372_v57, %v5372_v57 }
 0x128   : > { %v5383_v63 = vsub.f32 %v5249_v5, %v492_v59  ;;  %v5386_v4 = vsub.f32 %v5252_v6, %v492_v59  ;;  %v571_v3 = vadd.f32 %v540_v62, %v539_v61 }
 0x129   : > { %v5389_v7 = vsub.f32 %v5257_v8, %v494_v0  ;;  %v5392_v10 = vsub.f32 %v5260_v9, %v494_v0  ;;  %v456_v11 = vpop.xlane.xlu0 %455  ;;  %v577_v24 = vadd.f32 %v544_v2, %v543_v1  ;;  %v4373_v0 = vld [vmem:[#allocation7 + $0x2d0] ss:$24 sps:$4 sm:$0xff]   ;;  %v4374_v1 = vld [vmem:[#allocation7 + $0x2e0] ss:$24 sps:$4 sm:$0xff]  }
 0x12a   : > { %v495_v16 = vmul.f32 0.00390625, %v456_v11  ;;  %572 = vadd.xlane.f32.xlu0 %v571_v3  ;;  %v459_v17 = vpop.xlane.xlu1 %458  ;;  %v541_v27 = vmul.f32 %v5383_v63, %v5383_v63  ;;  %v542_v5 = vmul.f32 %v5386_v4, %v5386_v4  ;;  %1396 = vmatpush2.bf16.msra.mxu1 %v4373_v0  ;;  %v4386_v0 = vld [vmem:[#allocation7 + $0x280] ss:$24 sps:$4 sm:$0xff]  }
 0x12b   : > { %v496_v6 = vmul.f32 0.00390625, %v459_v17  ;;  %v545_v30 = vmul.f32 %v5389_v7, %v5389_v7  ;;  %v546_v8 = vmul.f32 %v5392_v10, %v5392_v10  ;;  %1622 = vmatpush2.bf16.msra.mxu0 %v4374_v1 }
 0x12c   : > { %v5403_v9 = vsub.f32 %v5267_v12, %v495_v16  ;;  %v5406_v33 = vsub.f32 %v5270_v13, %v495_v16  ;;  %v574_v36 = vadd.f32 %v542_v5, %v541_v27  ;;  %v4375_v5 = vld [vmem:[#allocation7 + $0x2a4] ss:$24 sps:$4 sm:$0xff]  }
 0x12d   : > { %v5409_v39 = vsub.f32 %v5273_v14, %v496_v6  ;;  %v5412_v42 = vsub.f32 %v5276_v15, %v496_v6  ;;  %v462_v45 = vpop.xlane.xlu0 %461  ;;  %v580_v48 = vadd.f32 %v546_v8, %v545_v30  ;;  %v4377_v6 = vld [vmem:[#allocation7 + $0x2b4] ss:$24 sps:$4 sm:$0xff]   ;;  %1397 = vmatprep.subr.bf16.mxu1 %v4375_v5 }
 0x12e   : > { %v497_v46 = vmul.f32 0.00390625, %v462_v45  ;;  %578 = vadd.xlane.f32.xlu0 %v577_v24  ;;  %575 = vadd.xlane.f32.xlu1 %v574_v36  ;;  %v465_v47 = vpop.xlane.xlu1 %464  ;;  %v547_v12 = vmul.f32 %v5403_v9, %v5403_v9  ;;  %v548_v13 = vmul.f32 %v5406_v33, %v5406_v33 }
 0x12f   : > { %v498_v49 = vmul.f32 0.00390625, %v465_v47  ;;  %v549_v14 = vmul.f32 %v5409_v39, %v5409_v39  ;;  %v550_v15 = vmul.f32 %v5412_v42, %v5412_v42  ;;  %1623 = vmatprep.subr.bf16.mxu0 %v4377_v6  ;;  %v4380_v47 = vld [vmem:[#allocation7 + $0x2b0] ss:$24 sps:$4 sm:$0xff]  }
 0x130   : > { %v5423_v50 = vsub.f32 %v5283_v18, %v497_v46  ;;  %v5426_v51 = vsub.f32 %v5286_v19, %v497_v46  ;;  %v583_v52 = vadd.f32 %v548_v13, %v547_v12  ;;  %v4379_v46 = vld [vmem:[#allocation7 + $0x2a0] ss:$24 sps:$4 sm:$0xff]   ;;  %1624 = vmatpush2.bf16.msra.mxu0 %v4380_v47 }
 0x131   : > { %v5429_v53 = vsub.f32 %v5289_v20, %v498_v49  ;;  %v5432_v58 = vsub.f32 %v5292_v21, %v498_v49  ;;  %v468_v59 = vpop.xlane.xlu0 %467  ;;  %v586_v62 = vadd.f32 %v550_v15, %v549_v14  ;;  %1398 = vmatpush2.bf16.msra.mxu1 %v4379_v46 }
 0x132   : > { %v499_v60 = vmul.f32 0.00390625, %v468_v59  ;;  %581 = vadd.xlane.f32.xlu1 %v580_v48  ;;  %584 = vadd.xlane.f32.xlu0 %v583_v52  ;;  %v471_v61 = vpop.xlane.xlu1 %470  ;;  %v551_v18 = vmul.f32 %v5423_v50, %v5423_v50  ;;  %v552_v19 = vmul.f32 %v5426_v51, %v5426_v51 }
 0x133   : > { %v500_v2 = vmul.f32 0.00390625, %v471_v61  ;;  %v553_v20 = vmul.f32 %v5429_v53, %v5429_v53  ;;  %v554_v21 = vmul.f32 %v5432_v58, %v5432_v58  ;;  %v4381_v61 = vld [vmem:[#allocation7 + $0x274] ss:$24 sps:$4 sm:$0xff]  }
 0x134   : > { %v5443_v3 = vsub.f32 %v5295_v22, %v499_v60  ;;  %v5446_v11 = vsub.f32 %v5298_v23, %v499_v60  ;;  %v589_v16 = vadd.f32 %v552_v19, %v551_v18  ;;  %v4385_v19 = vld [vmem:[#allocation7 + $0x270] ss:$24 sps:$4 sm:$0xff]   ;;  %1399 = vmatprep.subr.bf16.mxu1 %v4381_v61 }
 0x135   : > { %v5449_v17 = vsub.f32 %v5303_v25, %v500_v2  ;;  %v5452_v24 = vsub.f32 %v5306_v26, %v500_v2  ;;  %v474_v27 = vpop.xlane.xlu0 %473  ;;  %v592_v8 = vadd.f32 %v554_v21, %v553_v20  ;;  %1400 = vmatpush2.bf16.msra.mxu1 %v4385_v19  ;;  %v4405_v19 = vld [vmem:[#allocation7 + $0x1b4] ss:$24 sps:$4 sm:$0xff]  }
 0x136   : > { %v501_v30 = vmul.f32 0.00390625, %v474_v27  ;;  %587 = vadd.xlane.f32.xlu1 %v586_v62  ;;  %590 = vadd.xlane.f32.xlu0 %v589_v16  ;;  %v477_v22 = vpop.xlane.xlu1 %476  ;;  %v555_v23 = vmul.f32 %v5443_v3, %v5443_v3  ;;  %v556_v36 = vmul.f32 %v5446_v11, %v5446_v11 }
 0x137   : > { %v502_v45 = vmul.f32 0.00390625, %v477_v22  ;;  %v557_v25 = vmul.f32 %v5449_v17, %v5449_v17  ;;  %v558_v26 = vmul.f32 %v5452_v24, %v5452_v24  ;;  %v4387_v22 = vld [vmem:[#allocation7 + $0x244] ss:$24 sps:$4 sm:$0xff]  }
 0x138   : > { %v5463_v48 = vsub.f32 %v5311_v28, %v501_v30  ;;  %v5466_v12 = vsub.f32 %v5314_v29, %v501_v30  ;;  %v595_v13 = vadd.f32 %v556_v36, %v555_v23  ;;  %v4391_v36 = vld [vmem:[#allocation7 + $0x240] ss:$24 sps:$4 sm:$0xff]   ;;  %1401 = vmatprep.subr.bf16.mxu1 %v4387_v22 }
 0x139   : > { %v5469_v49 = vsub.f32 %v5319_v31, %v502_v45  ;;  %v5472_v14 = vsub.f32 %v5322_v32, %v502_v45  ;;  %v480_v15 = vpop.xlane.xlu0 %479  ;;  %v598_v60 = vadd.f32 %v558_v26, %v557_v25  ;;  %v4383_v31 = vld [vmem:[#allocation7 + $0x284] ss:$24 sps:$4 sm:$0xff]   ;;  %v4392_v45 = vld [vmem:[#allocation7 + $0x250] ss:$24 sps:$4 sm:$0xff]   ;;  %1402 = vmatpush2.bf16.msra.mxu1 %v4391_v36 }
 0x13a   : > { %v503_v52 = vmul.f32 0.00390625, %v480_v15  ;;  %593 = vadd.xlane.f32.xlu1 %v592_v8  ;;  %596 = vadd.xlane.f32.xlu0 %v595_v13  ;;  %v483_v59 = vpop.xlane.xlu1 %482  ;;  %v559_v28 = vmul.f32 %v5463_v48, %v5463_v48  ;;  %v560_v29 = vmul.f32 %v5466_v12, %v5466_v12 }
 0x13b   : > { %v504_v62 = vmul.f32 0.00390625, %v483_v59  ;;  %v561_v32 = vmul.f32 %v5469_v49, %v5469_v49  ;;  %v562_v18 = vmul.f32 %v5472_v14, %v5472_v14  ;;  %1625 = vmatprep.subr.bf16.mxu0 %v4383_v31  ;;  %v4395_v59 = vld [vmem:[#allocation7 + $0x224] ss:$24 sps:$4 sm:$0xff]  }
 0x13c   : > { %v5483_v1 = vsub.f32 %v5327_v34, %v503_v52  ;;  %v5486_v2 = vsub.f32 %v5330_v35, %v503_v52  ;;  %v601_v20 = vadd.f32 %v560_v29, %v559_v28  ;;  %1626 = vmatpush2.bf16.msra.mxu0 %v4386_v0  ;;  %v4393_v52 = vld [vmem:[#allocation7 + $0x214] ss:$24 sps:$4 sm:$0xff]   ;;  %v4398_v28 = vld [vmem:[#allocation7 + $0x220] ss:$24 sps:$4 sm:$0xff]   ;;  %v4399_v31 = vld [vmem:[#allocation7 + $0x1e4] ss:$24 sps:$4 sm:$0xff]  }
 0x13d   : > { %v5489_v21 = vsub.f32 %v5335_v37, %v504_v62  ;;  %v5492_v16 = vsub.f32 %v5338_v38, %v504_v62  ;;  %v486_v27 = vpop.xlane.xlu0 %485  ;;  %v604_v6 = vadd.f32 %v562_v18, %v561_v32  ;;  %v4389_v37 = vld [vmem:[#allocation7 + $0x254] ss:$24 sps:$4 sm:$0xff]   ;;  %1403 = vmatprep.subr.bf16.mxu1 %v4393_v52  ;;  %v4403_v32 = vld [vmem:[#allocation7 + $0x1e0] ss:$24 sps:$4 sm:$0xff]   ;;  %v4404_v18 = vld [vmem:[#allocation7 + $0x1f0] ss:$24 sps:$4 sm:$0xff]  }
 0x13e   : > { %v505_v5 = vmul.f32 0.00390625, %v486_v27  ;;  %599 = vadd.xlane.f32.xlu1 %v598_v60  ;;  %602 = vadd.xlane.f32.xlu0 %v601_v20  ;;  %v489_v34 = vpop.xlane.xlu1 %488  ;;  %v563_v35 = vmul.f32 %v5483_v1, %v5483_v1  ;;  %v564_v30 = vmul.f32 %v5486_v2, %v5486_v2  ;;  %v4397_v60 = vld [vmem:[#allocation7 + $0x210] ss:$24 sps:$4 sm:$0xff]   ;;  %v4401_v62 = vld [vmem:[#allocation7 + $0x1f4] ss:$24 sps:$4 sm:$0xff]  }
 0x13f   : > { %v506_v8 = vmul.f32 0.00390625, %v489_v34  ;;  %v565_v38 = vmul.f32 %v5489_v21, %v5489_v21  ;;  %v566_v23 = vmul.f32 %v5492_v16, %v5492_v16  ;;  %1627 = vmatprep.subr.bf16.mxu0 %v4389_v37  ;;  %1404 = vmatpush2.bf16.msra.mxu1 %v4397_v60  ;;  %v4407_v0 = vld [vmem:[#allocation7 + $0x1c4] ss:$24 sps:$4 sm:$0xff]   ;;  %v4409_v20 = vld [vmem:[#allocation7 + $0x1b0] ss:$24 sps:$4 sm:$0xff]  }
 0x140   : > { %v5503_v25 = vsub.f32 %v5343_v40, %v505_v5  ;;  %v5506_v26 = vsub.f32 %v5346_v41, %v505_v5  ;;  %v607_v46 = vadd.f32 %v564_v30, %v563_v35  ;;  %1628 = vmatpush2.bf16.msra.mxu0 %v4392_v45  ;;  %1405 = vmatprep.subr.bf16.mxu1 %v4399_v31  ;;  %v4410_v27 = vld [vmem:[#allocation7 + $0x1c0] ss:$24 sps:$4 sm:$0xff]   ;;  %v4411_v5 = vld [vmem:[#allocation7 + $0x184] ss:$24 sps:$4 sm:$0xff]   ;;  %v4413_v34 = vld [vmem:[#allocation7 + $0x194] ss:$24 sps:$4 sm:$0xff]  }
 0x141   : > { %v5509_v47 = vsub.f32 %v5351_v43, %v506_v8  ;;  %v5512_v13 = vsub.f32 %v5354_v44, %v506_v8  ;;  %v610_v15 = vadd.f32 %v566_v23, %v565_v38  ;;  %1629 = vmatprep.subr.bf16.mxu0 %v4395_v59  ;;  %v4416_v35 = vld [vmem:[#allocation7 + $0x190] ss:$24 sps:$4 sm:$0xff]   ;;  %v4419_v30 = vld [vmem:[#allocation7 + $0x15c] ss:$24 sps:$4 sm:$0xff]  }
 0x142   : > { %605 = vadd.xlane.f32.xlu1 %v604_v6  ;;  %608 = vadd.xlane.f32.xlu0 %v607_v46  ;;  %v567_v40 = vmul.f32 %v5503_v25, %v5503_v25  ;;  %v568_v41 = vmul.f32 %v5506_v26, %v5506_v26  ;;  %v4415_v6 = vld [vmem:[#allocation7 + $0x180] ss:$24 sps:$4 sm:$0xff]   ;;  %v7704_v46 = vlaneseq }
 0x143   : > { %v569_v43 = vmul.f32 %v5509_v47, %v5509_v47  ;;  %v570_v44 = vmul.f32 %v5512_v13, %v5512_v13  ;;  %1406 = vmatpush2.bf16.msra.mxu1 %v4403_v32 }
 0x144   : > { %v613_v29 = vadd.f32 %v568_v41, %v567_v40  ;;  %1630 = vmatpush2.bf16.msra.mxu0 %v4398_v28  ;;  %1407 = vmatprep.subr.bf16.mxu1 %v4405_v19 }
 0x145   : > { %v616_v61 = vadd.f32 %v570_v44, %v569_v43  ;;  %1631 = vmatprep.subr.bf16.mxu0 %v4401_v62  ;;  %v5523_v44 = vshrl.u32 %v7704_v46, 7 }
 0x146   : > { %611 = vadd.xlane.f32.xlu1 %v610_v15  ;;  %614 = vadd.xlane.f32.xlu0 %v613_v29 }
 0x147   : > { %1408 = vmatpush2.bf16.msra.mxu1 %v4409_v20  ;;  %7855 = vst [vmem:[#allocation20_spill] sm:$0xff] %v5523_v44  ;;  %v707_v32 = vsub.s32 1, %v5523_v44 }
 0x148   : > { %1632 = vmatpush2.bf16.msra.mxu0 %v4404_v18  ;;  %1409 = vmatprep.subr.bf16.mxu1 %v4411_v5  ;;  %v703_v18 = vsub.s32 0, %v5523_v44  ;;  %v7898_v44 = vlaneseq }
 0x149   : > { %1633 = vmatprep.subr.bf16.mxu0 %v4407_v0  ;;  %v699_v0 = vld [vmem:[#allocation5] sm:$0x3] }
 0x14a   : > { %617 = vadd.xlane.f32.xlu1 %v616_v61 }
 0x14b   : > { %1410 = vmatpush2.bf16.msra.mxu1 %v4415_v6 }
 0x14c   : > { %1634 = vmatpush2.bf16.msra.mxu0 %v4410_v27  ;;  %1492 = vmatprep.subr.bf16.mxu1 %v4419_v30  ;;  %v5529_v30 = vrot.slane %v699_v0, %v703_v18 }
 0x14d   : > { %1635 = vmatprep.subr.bf16.mxu0 %v4413_v34 }
 0x150   : > { %1636 = vmatpush2.bf16.msra.mxu0 %v4416_v35  ;;  %v5527_v35 = vrot.slane %v699_v0, %v707_v32 }
 0x1b3   : > { %v573_v22 = vpop.xlane.xlu0 %572 }
 0x1b4   : > { %v619_v37 = vmul.f32 0.00390625, %v573_v22 }
 0x1b6   : > { %v635_v8 = vadd.f32 1e-05, %v619_v37 }
 0x1b7   : > { %v576_v38 = vpop.xlane.xlu1 %575  ;;  %v579_v23 = vpop.xlane.xlu0 %578 }
 0x1b8   : > { %4513 = vrsqrt.f32 %v635_v8  ;;  %v620_v36 = vmul.f32 0.00390625, %v576_v38  ;;  %v621_v45 = vmul.f32 0.00390625, %v579_v23  ;;  %v743_v8 = vld [vmem:[%s7691_s2] sm:$0x3] }
 0x1ba   : > { %v636_v15 = vadd.f32 1e-05, %v620_v36  ;;  %v637_v40 = vadd.f32 1e-05, %v621_v45 }
 0x1bb   : > { %v582_v41 = vpop.xlane.xlu1 %581  ;;  %v585_v52 = vpop.xlane.xlu0 %584 }
 0x1bc   : > { %4515 = vrsqrt.f32 %v636_v15  ;;  %v622_v59 = vmul.f32 0.00390625, %v582_v41  ;;  %v623_v43 = vmul.f32 0.00390625, %v585_v52  ;;  %v5537_v41 = vrot.slane %v743_v8, %v707_v32 }
 0x1bd   : > { %4517 = vrsqrt.f32 %v637_v40 }
 0x1be   : > { %v638_v60 = vadd.f32 1e-05, %v622_v59  ;;  %v639_v28 = vadd.f32 1e-05, %v623_v43  ;;  %v5540_v59 = vrot.slane %v743_v8, %v703_v18  ;;  %v4417_v8 = vld [vmem:[#allocation7 + $0x158] ss:$24 sps:$4 sm:$0xff]  }
 0x1bf   : > { %v588_v29 = vpop.xlane.xlu1 %587  ;;  %v591_v61 = vpop.xlane.xlu0 %590 }
 0x1c0   : > { %4519 = vrsqrt.f32 %v638_v60  ;;  %v624_v31 = vmul.f32 0.00390625, %v588_v29  ;;  %v625_v62 = vmul.f32 0.00390625, %v591_v61 }
 0x1c1   : > { %4521 = vrsqrt.f32 %v639_v28 }
 0x1c2   : > { %v640_v19 = vadd.f32 1e-05, %v624_v31  ;;  %v641_v20 = vadd.f32 1e-05, %v625_v62 }
 0x1c3   : > { %v594_v27 = vpop.xlane.xlu1 %593  ;;  %v597_v6 = vpop.xlane.xlu0 %596 }
 0x1c4   : > { %4523 = vrsqrt.f32 %v640_v19  ;;  %v626_v5 = vmul.f32 0.00390625, %v594_v27  ;;  %v627_v36 = vmul.f32 0.00390625, %v597_v6 }
 0x1c5   : > { %v4514_v34 = vpop.eup %4513  ;;  %4525 = vrsqrt.f32 %v641_v20 }
 0x1c6   : > { %v642_v22 = vadd.f32 1e-05, %v626_v5  ;;  %v668_v37 = vmul.f32 %v4514_v34, %v5366_v55  ;;  %v667_v38 = vmul.f32 %v4514_v34, %v5363_v54  ;;  %v643_v61 = vadd.f32 1e-05, %v627_v36 }
 0x1c7   : > { %v600_v23 = vpop.xlane.xlu1 %599  ;;  %v603_v19 = vpop.xlane.xlu0 %602 }
 0x1c8   : > { %4527 = vrsqrt.f32 %v642_v22  ;;  %v628_v45 = vmul.f32 0.00390625, %v600_v23  ;;  %v712_v40 = vmul.f32 %v5527_v35, %v668_v37  ;;  %v711_v52 = vmul.f32 %v5529_v30, %v667_v38 }
 0x1c9   : > { %v4516_v15 = vpop.eup %4515  ;;  %v629_v22 = vmul.f32 0.00390625, %v603_v19  ;;  %v4425_v19 = vld [vmem:[#allocation7 + $0xfc] ss:$24 sps:$4 sm:$0xff]  }
 0x1ca   : > { %v4518_v55 = vpop.eup %4517  ;;  %v644_v43 = vadd.f32 1e-05, %v628_v45  ;;  %v670_v60 = vmul.f32 %v4516_v15, %v5386_v4  ;;  %v669_v54 = vmul.f32 %v4516_v15, %v5383_v63  ;;  %v756_v32 = vadd.f32 %v5537_v41, %v712_v40 }
 0x1cb   : > { %v606_v28 = vpop.xlane.xlu1 %605  ;;  %v672_v29 = vmul.f32 %v4518_v55, %v5372_v57  ;;  %v755_v18 = vadd.f32 %v5540_v59, %v711_v52  ;;  %v671_v34 = vmul.f32 %v4518_v55, %v5369_v56 }
 0x1cc   : > { %v714_v31 = vmul.f32 %v5527_v35, %v670_v60  ;;  %v713_v0 = vmul.f32 %v5529_v30, %v669_v54  ;;  %4529 = vrsqrt.f32 %v644_v43  ;;  %v630_v20 = vmul.f32 0.00390625, %v606_v28  ;;  %v4420_v54 = vld [vmem:[#allocation7 + $0x128] ss:$24 sps:$4 sm:$0xff]  }
 0x1cd   : > { %v4520_v62 = vpop.eup %4519  ;;  %v716_v5 = vmul.f32 %v5527_v35, %v672_v29  ;;  %4531 = vrsqrt.f32 %v643_v61  ;;  %v715_v43 = vmul.f32 %v5529_v30, %v671_v34  ;;  %v645_v28 = vadd.f32 1e-05, %v629_v22  ;;  %v609_v61 = vpop.xlane.xlu0 %608  ;;  %v4428_v22 = vld [vmem:[#allocation7 + $0xcc] ss:$24 sps:$4 sm:$0xff]  }
 0x1ce   : > { %v758_v4 = vadd.f32 %v5537_v41, %v714_v31  ;;  %v674_v27 = vmul.f32 %v4520_v62, %v5392_v10  ;;  %v4522_v63 = vpop.eup %4521  ;;  %v757_v57 = vadd.f32 %v5540_v59, %v713_v0  ;;  %v673_v6 = vmul.f32 %v4520_v62, %v5389_v7  ;;  %v4422_v10 = vld [vmem:[#allocation7 + $0x12c] ss:$24 sps:$4 sm:$0xff]  }
 0x1cf   : > { %v646_v15 = vadd.f32 1e-05, %v630_v20  ;;  %v676_v56 = vmul.f32 %v4522_v63, %v5406_v33  ;;  %v612_v40 = vpop.xlane.xlu1 %611  ;;  %v760_v52 = vadd.f32 %v5537_v41, %v716_v5  ;;  %v759_v20 = vadd.f32 %v5540_v59, %v715_v43  ;;  %v4423_v5 = vld [vmem:[#allocation7 + $0xf8] ss:$24 sps:$4 sm:$0xff]  }
 0x1d0   : > { %v5555_v37 = vpack.c.bf16 %v758_v4, %v756_v32  ;;  %v5557_v23 = vpack.c.bf16 %v757_v57, %v755_v18  ;;  %v718_v36 = vmul.f32 %v5527_v35, %v674_v27  ;;  %v717_v45 = vmul.f32 %v5529_v30, %v673_v6 }
 0x1d1   : > { %v4524_v38 = vpop.eup %4523  ;;  %v720_v29 = vmul.f32 %v5527_v35, %v676_v56  ;;  %4533 = vrsqrt.f32 %v646_v15  ;;  %v632_v0 = vmul.f32 0.00390625, %v612_v40  ;;  %v675_v4 = vmul.f32 %v4522_v63, %v5403_v9 }
 0x1d2   : > { %1411 = vmatprep.mubr.bf16.mxu1 %v5555_v37  ;;  %1637 = vmatprep.mubr.bf16.mxu0 %v5555_v37  ;;  %v678_v7 = vmul.f32 %v4524_v38, %v5412_v42  ;;  %v762_v55 = vadd.f32 %v5537_v41, %v718_v36  ;;  %v4526_v60 = vpop.eup %4525  ;;  %v761_v62 = vadd.f32 %v5540_v59, %v717_v45  ;;  %4535 = vrsqrt.f32 %v645_v28  ;;  %v4426_v45 = vld [vmem:[#allocation7 + $0xc8] ss:$24 sps:$4 sm:$0xff]  }
 0x1d3   : > { %1412 = vmatmul.mubr.bf16.vlgmr.msra.gmra.mxu1 %v5557_v23  ;;  %1638 = vmatmul.mubr.bf16.vlgmr.msra.gmra.mxu0 %v5557_v23  ;;  %v677_v32 = vmul.f32 %v4524_v38, %v5409_v39  ;;  %v631_v57 = vmul.f32 0.00390625, %v609_v61  ;;  %v764_v39 = vadd.f32 %v5537_v41, %v720_v29  ;;  %v680_v34 = vmul.f32 %v4526_v60, %v5426_v51  ;;  %v618_v63 = vpop.xlane.xlu1 %617 }
 0x1d4   : > { %1493 = vmatpush1.bf16.msra.mxu1 %v4417_v8  ;;  %v722_v33 = vmul.f32 %v5527_v35, %v678_v7  ;;  %v5572_v31 = vpack.c.bf16 %v762_v55, %v760_v52  ;;  %v5584_v6 = vpack.c.bf16 %v761_v62, %v759_v20  ;;  %v648_v38 = vadd.f32 1e-05, %v632_v0  ;;  %v615_v7 = vpop.xlane.xlu0 %614  ;;  %v4431_v52 = vld [vmem:[#allocation7 + $0x9c] ss:$24 sps:$4 sm:$0xff]   ;;  %v4429_v62 = vld [vmem:[#allocation7 + $0x98] ss:$24 sps:$4 sm:$0xff]  }
 0x1d5   : > { %v4528_v42 = vpop.eup %4527  ;;  %1494 = vmatprep.subr.bf16.mxu1 %v4422_v10  ;;  %v721_v8 = vmul.f32 %v5529_v30, %v677_v32  ;;  %v719_v10 = vmul.f32 %v5529_v30, %v675_v4  ;;  %v647_v51 = vadd.f32 1e-05, %v631_v57  ;;  %v724_v15 = vmul.f32 %v5527_v35, %v680_v34 }
 0x1d6   : > { %v766_v18 = vadd.f32 %v5537_v41, %v722_v33  ;;  %1421 = vmatprep.mubr.bf16.mxu1 %v5572_v31  ;;  %1647 = vmatprep.mubr.bf16.mxu0 %v5572_v31  ;;  %v682_v27 = vmul.f32 %v4528_v42, %v5432_v58  ;;  %v681_v55 = vmul.f32 %v4528_v42, %v5429_v53  ;;  %4537 = vrsqrt.f32 %v648_v38  ;;  %v4434_v53 = vld [vmem:[#allocation7 + $0x6c] ss:$24 sps:$4 sm:$0xff]  }
 0x1d7   : > { %v765_v40 = vadd.f32 %v5540_v59, %v721_v8  ;;  %v634_v43 = vmul.f32 0.00390625, %v618_v63  ;;  %v763_v29 = vadd.f32 %v5540_v59, %v719_v10  ;;  %v679_v33 = vmul.f32 %v4526_v60, %v5423_v50  ;;  %v4435_v63 = vld [vmem:[#allocation7 + $0x38] ss:$24 sps:$4 sm:$0xff]  }
 0x1d8   : > { %1495 = vmatpush1.bf16.msra.mxu1 %v4420_v54  ;;  %v5587_v36 = vpack.c.bf16 %v766_v18, %v764_v39  ;;  %v726_v9 = vmul.f32 %v5527_v35, %v682_v27  ;;  %4539 = vrsqrt.f32 %v647_v51  ;;  %v633_v61 = vmul.f32 0.00390625, %v615_v7  ;;  %v4437_v39 = vld [vmem:[#allocation7 + $0x3c] ss:$24 sps:$4 sm:$0xff]  }
 0x1d9   : > { %1496 = vmatprep.subr.bf16.mxu1 %v4425_v19  ;;  %v4530_v58 = vpop.eup %4529  ;;  %v768_v19 = vadd.f32 %v5537_v41, %v724_v15  ;;  %v5604_v0 = vpack.c.bf16 %v765_v40, %v763_v29  ;;  %v725_v42 = vmul.f32 %v5529_v30, %v681_v55  ;;  %v650_v18 = vadd.f32 1e-05, %v634_v43  ;;  %v4443_v55 = vld [vmem:[#allocation7 + $0x2dc] ss:$24 sps:$4 sm:$0xff]  }
 0x1da   : > { %v4532_v56 = vpop.eup %4531  ;;  %v770_v28 = vadd.f32 %v5537_v41, %v726_v9  ;;  %v686_v54 = vmul.f32 %v4530_v58, %v5452_v24  ;;  %v723_v60 = vmul.f32 %v5529_v30, %v679_v33  ;;  %v649_v4 = vadd.f32 1e-05, %v633_v61  ;;  %v4441_v61 = vld [vmem:[#allocation7 + $0x2d8] ss:$24 sps:$4 sm:$0xff]  }
 0x1db   : > { %1422 = vmatmul.mubr.bf16.gmra.mxu1 %v5584_v6  ;;  %1648 = vmatmul.mubr.bf16.gmra.mxu0 %v5584_v6  ;;  %v684_v32 = vmul.f32 %v4532_v56, %v5446_v11  ;;  %v4432_v11 = vld [vmem:[#allocation7 + $0x68] ss:$24 sps:$4 sm:$0xff]   ;;  %v685_v34 = vmul.f32 %v4530_v58, %v5449_v17  ;;  %4541 = vrsqrt.f32 %v650_v18  ;;  %v683_v9 = vmul.f32 %v4532_v56, %v5443_v3  ;;  %v4440_v17 = vld [vmem:[#allocation7 + $0xc] ss:$24 sps:$4 sm:$0xff]  }
 0x1dc   : > { %1431 = vmatprep.mubr.bf16.mxu1 %v5587_v36  ;;  %1497 = vmatpush1.bf16.msra.mxu1 %v4423_v5  ;;  %v5607_v24 = vpack.c.bf16 %v770_v28, %v768_v19  ;;  %v730_v20 = vmul.f32 %v5527_v35, %v686_v54  ;;  %v769_v5 = vadd.f32 %v5540_v59, %v725_v42  ;;  %4543 = vrsqrt.f32 %v649_v4  ;;  %v4449_v4 = vld [vmem:[#allocation7 + $0x27c] ss:$24 sps:$4 sm:$0xff]  }
 0x1dd   : > { %1657 = vmatprep.mubr.bf16.mxu0 %v5587_v36  ;;  %1498 = vmatprep.subr.bf16.mxu1 %v4428_v22  ;;  %v728_v27 = vmul.f32 %v5527_v35, %v684_v32  ;;  %v767_v38 = vadd.f32 %v5540_v59, %v723_v60  ;;  %v729_v58 = vmul.f32 %v5529_v30, %v685_v34  ;;  %v4447_v34 = vld [vmem:[#allocation7 + $0x278] ss:$24 sps:$4 sm:$0xff]  }
 0x1de   : > { %v4534_v50 = vpop.eup %4533  ;;  %v774_v22 = vadd.f32 %v5537_v41, %v730_v20  ;;  %v727_v3 = vmul.f32 %v5529_v30, %v683_v9  ;;  %v4452_v9 = vld [vmem:[#allocation7 + $0x24c] ss:$24 sps:$4 sm:$0xff]  }
 0x1df   : > { %v4536_v57 = vpop.eup %4535  ;;  %v690_v8 = vmul.f32 %v4534_v50, %v5472_v14  ;;  %v772_v10 = vadd.f32 %v5537_v41, %v728_v27  ;;  %v689_v43 = vmul.f32 %v4534_v50, %v5469_v49 }
 0x1e0   : > { %1499 = vmatpush1.bf16.msra.mxu1 %v4426_v45  ;;  %v688_v51 = vmul.f32 %v4536_v57, %v5466_v12  ;;  %v5624_v45 = vpack.c.bf16 %v769_v5, %v767_v38  ;;  %v4438_v12 = vld [vmem:[#allocation7 + $0x8] ss:$24 sps:$4 sm:$0xff]   ;;  %v771_v29 = vadd.f32 %v5540_v59, %v727_v3  ;;  %v687_v33 = vmul.f32 %v4536_v57, %v5463_v48 }
 0x1e1   : > { %1500 = vmatprep.subr.bf16.mxu1 %v4431_v52  ;;  %v5627_v15 = vpack.c.bf16 %v774_v22, %v772_v10  ;;  %v734_v14 = vmul.f32 %v5527_v35, %v690_v8  ;;  %v773_v52 = vadd.f32 %v5540_v59, %v729_v58  ;;  %v733_v49 = vmul.f32 %v5529_v30, %v689_v43  ;;  %v4456_v43 = vld [vmem:[#allocation7 + $0x1e8] ss:$24 sps:$4 sm:$0xff]  }
 0x1e2   : > { %v732_v56 = vmul.f32 %v5527_v35, %v688_v51  ;;  %v731_v48 = vmul.f32 %v5529_v30, %v687_v33  ;;  %v4464_v33 = vld [vmem:[#allocation7 + $0x18c] ss:$24 sps:$4 sm:$0xff]  }
 0x1e3   : > { %1432 = vmatmul.mubr.bf16.gmra.mxu1 %v5604_v0  ;;  %1658 = vmatmul.mubr.bf16.gmra.mxu0 %v5604_v0  ;;  %v4538_v7 = vpop.eup %4537  ;;  %v778_v28 = vadd.f32 %v5537_v41, %v734_v14  ;;  %v5644_v32 = vpack.c.bf16 %v773_v52, %v771_v29  ;;  %v777_v60 = vadd.f32 %v5540_v59, %v733_v49 }
 0x1e4   : > { %1441 = vmatprep.mubr.bf16.mxu1 %v5607_v24  ;;  %1501 = vmatpush1.bf16.msra.mxu1 %v4429_v62  ;;  %v694_v54 = vmul.f32 %v4538_v7, %v5492_v16  ;;  %v776_v62 = vadd.f32 %v5537_v41, %v732_v56  ;;  %v775_v5 = vadd.f32 %v5540_v59, %v731_v48 }
 0x1e5   : > { %1667 = vmatprep.mubr.bf16.mxu0 %v5607_v24  ;;  %1502 = vmatprep.subr.bf16.mxu1 %v4434_v53  ;;  %v4540_v40 = vpop.eup %4539  ;;  %v4446_v53 = vld [vmem:[#allocation7 + $0x2ac] ss:$24 sps:$4 sm:$0xff]  }
 0x1e6   : > { %v692_v19 = vmul.f32 %v4540_v40, %v5486_v2  ;;  %v5647_v42 = vpack.c.bf16 %v778_v28, %v776_v62  ;;  %v738_v16 = vmul.f32 %v5527_v35, %v694_v54  ;;  %v4444_v2 = vld [vmem:[#allocation7 + $0x2a8] ss:$24 sps:$4 sm:$0xff]   ;;  %v797_v38 = vpack.c.bf16 %v777_v60, %v775_v5  ;;  %v4461_v28 = vld [vmem:[#allocation7 + $0x1bc] ss:$24 sps:$4 sm:$0xff]   ;;  %v4459_v54 = vld [vmem:[#allocation7 + $0x1b8] ss:$24 sps:$4 sm:$0xff]  }
 0x1e8   : > { %1503 = vmatpush1.bf16.msra.mxu1 %v4432_v11  ;;  %v4542_v18 = vpop.eup %4541  ;;  %v736_v20 = vmul.f32 %v5527_v35, %v692_v19  ;;  %v693_v11 = vmul.f32 %v4538_v7, %v5489_v21  ;;  %v782_v27 = vadd.f32 %v5537_v41, %v738_v16 }
 0x1e9   : > { %1504 = vmatprep.subr.bf16.mxu1 %v4437_v39  ;;  %v4544_v50 = vpop.eup %4543  ;;  %v698_v57 = vmul.f32 %v4542_v18, %v5512_v13  ;;  %v691_v39 = vmul.f32 %v4540_v40, %v5483_v1  ;;  %v4450_v1 = vld [vmem:[#allocation7 + $0x248] ss:$24 sps:$4 sm:$0xff]   ;;  %v697_v58 = vmul.f32 %v4542_v18, %v5509_v47 }
 0x1ea   : > { %v780_v22 = vadd.f32 %v5537_v41, %v736_v20  ;;  %v696_v8 = vmul.f32 %v4544_v50, %v5506_v26  ;;  %v695_v3 = vmul.f32 %v4544_v50, %v5503_v25 }
 0x1eb   : > { %1442 = vmatmul.mubr.bf16.gmra.mxu1 %v5624_v45  ;;  %1668 = vmatmul.mubr.bf16.gmra.mxu0 %v5624_v45  ;;  %v742_v10 = vmul.f32 %v5527_v35, %v698_v57  ;;  %v735_v13 = vmul.f32 %v5529_v30, %v691_v39  ;;  %v741_v52 = vmul.f32 %v5529_v30, %v697_v58 }
 0x1ec   : > { %1451 = vmatprep.mubr.bf16.mxu1 %v5627_v15  ;;  %1505 = vmatpush1.bf16.msra.mxu1 %v4435_v63  ;;  %v737_v63 = vmul.f32 %v5529_v30, %v693_v11  ;;  %v800_v21 = vpack.c.bf16 %v782_v27, %v780_v22  ;;  %v740_v51 = vmul.f32 %v5527_v35, %v696_v8  ;;  %v4458_v35 = vld [vmem:[#allocation7 + $0x1ec] ss:$24 sps:$4 sm:$0xff]  }
 0x1ed   : > { %1677 = vmatprep.mubr.bf16.mxu0 %v5627_v15  ;;  %1506 = vmatprep.subr.bf16.mxu1 %v4440_v17  ;;  %v4455_v17 = vld [vmem:[#allocation7 + $0x21c] ss:$24 sps:$4 sm:$0xff]   ;;  %v786_v14 = vadd.f32 %v5537_v41, %v742_v10  ;;  %v779_v7 = vadd.f32 %v5540_v59, %v735_v13  ;;  %v739_v47 = vmul.f32 %v5529_v30, %v695_v3  ;;  %v4462_v30 = vld [vmem:[#allocation7 + $0x188] ss:$24 sps:$4 sm:$0xff]  }
 0x1ee   : > { %v781_v26 = vadd.f32 %v5540_v59, %v737_v63  ;;  %v784_v56 = vadd.f32 %v5537_v41, %v740_v51  ;;  %v785_v25 = vadd.f32 %v5540_v59, %v741_v52 }
 0x1ef   : > { %v783_v41 = vadd.f32 %v5540_v59, %v739_v47 }
 0x1f0   : > { %1507 = vmatpush1.bf16.msra.mxu1 %v4438_v12  ;;  %v4453_v12 = vld [vmem:[#allocation7 + $0x218] ss:$24 sps:$4 sm:$0xff]   ;;  %v799_v40 = vpack.c.bf16 %v781_v26, %v779_v7 }
 0x1f1   : > { %1508 = vmatprep.subr.bf16.mxu1 %v4443_v55  ;;  %v802_v55 = vpack.c.bf16 %v786_v14, %v784_v56  ;;  %v801_v29 = vpack.c.bf16 %v785_v25, %v783_v41 }
 0x1f3   : > { %1452 = vmatmul.mubr.bf16.gmra.mxu1 %v5644_v32  ;;  %1678 = vmatmul.mubr.bf16.gmra.mxu0 %v5644_v32 }
 0x1f4   : > { %1461 = vmatprep.mubr.bf16.mxu1 %v5647_v42  ;;  %1509 = vmatpush2.bf16.msra.mxu1 %v4441_v61 }
 0x1f5   : > { %1687 = vmatprep.mubr.bf16.mxu0 %v5647_v42  ;;  %1510 = vmatprep.subr.bf16.mxu1 %v4446_v53 }
 0x1f8   : > { %1511 = vmatpush2.bf16.msra.mxu1 %v4444_v2 }
 0x1f9   : > { %1512 = vmatprep.subr.bf16.mxu1 %v4449_v4 }
 0x1fb   : > { %1462 = vmatmul.mubr.bf16.gmra.mxu1 %v797_v38  ;;  %1688 = vmatmul.mubr.bf16.gmra.mxu0 %v797_v38 }
 0x1fc   : > { %1471 = vmatprep.mubr.bf16.mxu1 %v800_v21  ;;  %1513 = vmatpush2.bf16.msra.mxu1 %v4447_v34 }
 0x1fd   : > { %1697 = vmatprep.mubr.bf16.mxu0 %v800_v21  ;;  %1514 = vmatprep.subr.bf16.mxu1 %v4452_v9 }
 0x200   : > { %1515 = vmatpush2.bf16.msra.mxu1 %v4450_v1 }
 0x201   : > { %1516 = vmatprep.subr.bf16.mxu1 %v4455_v17 }
 0x203   : > { %1472 = vmatmul.mubr.bf16.gmra.mxu1 %v799_v40  ;;  %1698 = vmatmul.mubr.bf16.gmra.mxu0 %v799_v40 }
 0x204   : > { %1481 = vmatprep.mubr.bf16.mxu1 %v802_v55  ;;  %1517 = vmatpush2.bf16.msra.mxu1 %v4453_v12 }
 0x205   : > { %1707 = vmatprep.mubr.bf16.mxu0 %v802_v55  ;;  %1518 = vmatprep.subr.bf16.mxu1 %v4458_v35 }
 0x208   : > { %1519 = vmatpush2.bf16.msra.mxu1 %v4456_v43 }
 0x209   : > { %1520 = vmatprep.subr.bf16.mxu1 %v4461_v28 }
 0x20b   : > { %1482 = vmatmul.mubr.bf16.gmra.mxu1 %v801_v29  ;;  %1708 = vmatmul.mubr.bf16.gmra.mxu0 %v801_v29 }
 0x20c   : > { %1521 = vmatpush2.bf16.msra.mxu1 %v4459_v54  ;;  %1524 = vmatprep.mubr.bf16.mxu1 %v5555_v37 }
 0x20d   : > { %1522 = vmatprep.subr.bf16.mxu1 %v4464_v33 }
 0x210   : > { %1523 = vmatpush2.bf16.msra.mxu1 %v4462_v30 }
 0x213   : > { %1525 = vmatmul.mubr.bf16.vlgmr.msra.gmra.mxu1 %v5557_v23 }
 0x214   : > { %1534 = vmatprep.mubr.bf16.mxu1 %v5572_v31 }
 0x21b   : > { %1535 = vmatmul.mubr.bf16.gmra.mxu1 %v5584_v6 }
 0x21c   : > { %1544 = vmatprep.mubr.bf16.mxu1 %v5587_v36 }
 0x223   : > { %1545 = vmatmul.mubr.bf16.gmra.mxu1 %v5604_v0 }
 0x224   : > { %1554 = vmatprep.mubr.bf16.mxu1 %v5607_v24 }
 0x22b   : > { %1555 = vmatmul.mubr.bf16.gmra.mxu1 %v5624_v45 }
 0x22c   : > { %1564 = vmatprep.mubr.bf16.mxu1 %v5627_v15 }
 0x233   : > { %1565 = vmatmul.mubr.bf16.gmra.mxu1 %v5644_v32 }
 0x234   : > { %1574 = vmatprep.mubr.bf16.mxu1 %v5647_v42 }
 0x23b   : > { %1575 = vmatmul.mubr.bf16.gmra.mxu1 %v797_v38 }
 0x23c   : > { %1584 = vmatprep.mubr.bf16.mxu1 %v800_v21 }
 0x243   : > { %1585 = vmatmul.mubr.bf16.gmra.mxu1 %v799_v40 }
 0x244   : > { %1594 = vmatprep.mubr.bf16.mxu1 %v802_v55 }
 0x24b   : > { %1595 = vmatmul.mubr.bf16.gmra.mxu1 %v801_v29 }
 0x293   : > { %v5689_v59 = vpop.f32.mrf.mxu1  ;;  %v1639_v37 = vpop.f32.mrf.mxu0 }
 0x294   : > { %1846 = vrot.lane.b32.xlu0 %v5689_v59, %s4980_s9 }
 0x295   : > { %v5693_v23 = vpop.f32.mrf.mxu1  ;;  %v1641_v31 = vpop.f32.mrf.mxu0 }
 0x297   : > { %v5695_v6 = vpop.f32.mrf.mxu1  ;;  %v1643_v36 = vpop.f32.mrf.mxu0 }
 0x298   : > { %v5697_v0 = vpack.c.bf16 %v1643_v36, %v1639_v37  ;;  %2009 = vrot.lane.b32.xlu0 %v5689_v59, %s4981_s24  ;;  %1848 = vrot.lane.b32.xlu1 %v5695_v6, %s4980_s9 }
 0x299   : > { %v5703_v24 = vpop.f32.mrf.mxu1  ;;  %v1645_v45 = vpop.f32.mrf.mxu0 }
 0x29a   : > { %7856 = vst [vmem:[#allocation21_spill] sm:$0xff] %v5697_v0  ;;  %v5705_v15 = vpack.c.bf16 %v1645_v45, %v1641_v31  ;;  %v5914_v0 = vand.u32 127, %v7898_v44 }
 0x29b   : > { %v5707_v61 = vpop.f32.mrf.mxu1  ;;  %v1649_v62 = vpop.f32.mrf.mxu0 }
 0x29c   : > { %7857 = vst [vmem:[#allocation22_spill] sm:$0xff] %v5705_v15  ;;  %1878 = vrot.lane.b32.xlu0 %v5693_v23, %s4980_s9  ;;  %2011 = vrot.lane.b32.xlu1 %v5695_v6, %s4981_s24  ;;  %vm1912_vm0 = vcmp.lt.s32.totalorder %v5914_v0, 96  ;;  %vm2073_vm1 = vcmp.lt.s32.totalorder %v5914_v0, 32 }
 0x29d   : > { %v5713_v19 = vpop.f32.mrf.mxu1  ;;  %v1651_v32 = vpop.f32.mrf.mxu0 }
 0x29f   : > { %v5715_v53 = vpop.f32.mrf.mxu1  ;;  %v1653_v49 = vpop.f32.mrf.mxu0 }
 0x2a0   : > { %v5717_v42 = vpack.c.bf16 %v1653_v49, %v1649_v62  ;;  %2041 = vrot.lane.b32.xlu0 %v5693_v23, %s4981_s24  ;;  %1880 = vrot.lane.b32.xlu1 %v5703_v24, %s4980_s9 }
 0x2a1   : > { %v5723_v16 = vpop.f32.mrf.mxu1  ;;  %v1655_v18 = vpop.f32.mrf.mxu0 }
 0x2a2   : > { %7858 = vst [vmem:[#allocation23_spill] sm:$0xff] %v5717_v42  ;;  %v5725_v48 = vpack.c.bf16 %v1655_v18, %v1651_v32 }
 0x2a3   : > { %v5727_v2 = vpop.f32.mrf.mxu1  ;;  %v1659_v20 = vpop.f32.mrf.mxu0 }
 0x2a4   : > { %7859 = vst [vmem:[#allocation24_spill] sm:$0xff] %v5725_v48  ;;  %2043 = vrot.lane.b32.xlu1 %v5703_v24, %s4981_s24  ;;  %1850 = vrot.lane.b32.xlu0 %v5707_v61, %s4980_s9 }
 0x2a5   : > { %v5733_v50 = vpop.f32.mrf.mxu1  ;;  %v1661_v60 = vpop.f32.mrf.mxu0 }
 0x2a7   : > { %v5735_v4 = vpop.f32.mrf.mxu1  ;;  %v1663_v11 = vpop.f32.mrf.mxu0 }
 0x2a8   : > { %v5737_v27 = vpack.c.bf16 %v1663_v11, %v1659_v20  ;;  %2013 = vrot.lane.b32.xlu0 %v5707_v61, %s4981_s24  ;;  %1852 = vrot.lane.b32.xlu1 %v5715_v53, %s4980_s9  ;;  %v5829_v20 = vld [vmem:[#allocation10] sm:$0xff] }
 0x2a9   : > { %v5743_v57 = vpop.f32.mrf.mxu1  ;;  %v1665_v5 = vpop.f32.mrf.mxu0 }
 0x2aa   : > { %7860 = vst [vmem:[#allocation25_spill] sm:$0xff] %v5737_v27  ;;  %v5745_v39 = vpack.c.bf16 %v1665_v5, %v1661_v60  ;;  %v5835_v5 = vld [vmem:[#allocation10 + $0x8] sm:$0xff] }
 0x2ab   : > { %v5747_v34 = vpop.f32.mrf.mxu1  ;;  %v5749_v22 = vpop.f32.mrf.mxu0 }
 0x2ac   : > { %7861 = vst [vmem:[#allocation26_spill] sm:$0xff] %v5745_v39  ;;  %7862 = vst [vmem:[#allocation27_spill] sm:$0xff] %v5749_v22  ;;  %1882 = vrot.lane.b32.xlu0 %v5713_v19, %s4980_s9  ;;  %2015 = vrot.lane.b32.xlu1 %v5715_v53, %s4981_s24 }
 0x2ad   : > { %v5755_v8 = vpop.f32.mrf.mxu1  ;;  %v1671_v38 = vpop.f32.mrf.mxu0 }
 0x2af   : > { %v5757_v9 = vpop.f32.mrf.mxu1  ;;  %v5759_v63 = vpop.f32.mrf.mxu0 }
 0x2b0   : > { %7863 = vst [vmem:[#allocation28_spill] sm:$0xff] %v5759_v63  ;;  %2045 = vrot.lane.b32.xlu0 %v5713_v19, %s4981_s24  ;;  %1884 = vrot.lane.b32.xlu1 %v5723_v16, %s4980_s9 }
 0x2b1   : > { %v5765_v21 = vpop.f32.mrf.mxu1  ;;  %v1675_v10 = vpop.f32.mrf.mxu0 }
 0x2b2   : > { %7864 = vst [vmem:[#allocation29_spill] sm:$0xff] %v5765_v21  ;;  %v5767_v13 = vpack.c.bf16 %v1675_v10, %v1671_v38 }
 0x2b3   : > { %v5769_v1 = vpop.f32.mrf.mxu1  ;;  %v5771_v51 = vpop.f32.mrf.mxu0 }
 0x2b4   : > { %7865 = vst [vmem:[#allocation30_spill] sm:$0xff] %v5767_v13  ;;  %7866 = vst [vmem:[#allocation31_spill] sm:$0xff] %v5769_v1  ;;  %2047 = vrot.lane.b32.xlu1 %v5723_v16, %s4981_s24  ;;  %1854 = vrot.lane.b32.xlu0 %v5727_v2, %s4980_s9 }
 0x2b5   : > { %7867 = vst [vmem:[#allocation32_spill] sm:$0xff] %v5771_v51  ;;  %v5777_v26 = vpop.f32.mrf.mxu1  ;;  %v1681_v17 = vpop.f32.mrf.mxu0  ;;  %v5942_v51 = vld [vmem:[#allocation11 + $0x10] sm:$0xff] }
 0x2b6   : > { %7868 = vst [vmem:[#allocation33_spill] sm:$0xff] %v5777_v26 }
 0x2b7   : > { %v5779_v58 = vpop.f32.mrf.mxu1  ;;  %v5781_v14 = vpop.f32.mrf.mxu0 }
 0x2b8   : > { %7869 = vst [vmem:[#allocation34_spill] sm:$0xff] %v5779_v58  ;;  %7870 = vst [vmem:[#allocation35_spill] sm:$0xff] %v5781_v14  ;;  %1886 = vrot.lane.b32.xlu0 %v5733_v50, %s4980_s9  ;;  %1856 = vrot.lane.b32.xlu1 %v5735_v4, %s4980_s9 }
 0x2b9   : > { %v5787_v7 = vpop.f32.mrf.mxu1  ;;  %v1685_v3 = vpop.f32.mrf.mxu0 }
 0x2ba   : > { %7871 = vst [vmem:[#allocation36_spill] sm:$0xff] %v5787_v7  ;;  %v5789_v12 = vpack.c.bf16 %v1685_v3, %v1681_v17  ;;  %v5840_v17 = vld [vmem:[#allocation10 + $0x10] sm:$0xff] }
 0x2bb   : > { %v5791_v56 = vpop.f32.mrf.mxu1  ;;  %v5793_v40 = vpop.f32.mrf.mxu0 }
 0x2bc   : > { %7872 = vst [vmem:[#allocation37_spill] sm:$0xff] %v5789_v12  ;;  %7873 = vst [vmem:[#allocation38_spill] sm:$0xff] %v5791_v56  ;;  %1888 = vrot.lane.b32.xlu1 %v5743_v57, %s4980_s9 }
 0x2bd   : > { %7874 = vst [vmem:[#allocation39_spill] sm:$0xff] %v5793_v40  ;;  %v5797_v35 = vpop.f32.mrf.mxu1  ;;  %v1691_v52 = vpop.f32.mrf.mxu0 }
 0x2be   : > { %7875 = vst [vmem:[#allocation40_spill] sm:$0xff] %v5797_v35 }
 0x2bf   : > { %v5799_v55 = vpop.f32.mrf.mxu1  ;;  %v5801_v47 = vpop.f32.mrf.mxu0 }
 0x2c0   : > { %7876 = vst [vmem:[#allocation41_spill] sm:$0xff] %v5799_v55  ;;  %7877 = vst [vmem:[#allocation42_spill] sm:$0xff] %v5801_v47  ;;  %v5931_v47 = vld [vmem:[#allocation11 + $0x8] sm:$0xff] }
 0x2c1   : > { %v5803_v43 = vpop.f32.mrf.mxu1  ;;  %v1695_v25 = vpop.f32.mrf.mxu0 }
 0x2c2   : > { %7878 = vst [vmem:[#allocation43_spill] sm:$0xff] %v5803_v43  ;;  %v5805_v28 = vpack.c.bf16 %v1695_v25, %v1691_v52  ;;  %v5847_v25 = vld [vmem:[#allocation10 + $0x18] sm:$0xff] }
 0x2c3   : > { %v5807_v41 = vpop.f32.mrf.mxu1  ;;  %v5809_v54 = vpop.f32.mrf.mxu0  ;;  %v5974_v43 = vld [vmem:[#allocation13 + $0x18] sm:$0xff] }
 0x2c4   : > { %7879 = vst [vmem:[#allocation44_spill] sm:$0xff] %v5805_v28  ;;  %7880 = vst [vmem:[#allocation45_spill] sm:$0xff] %v5807_v41  ;;  %v5956_v41 = vld [vmem:[#allocation13 + $0x8] sm:$0xff] }
 0x2c5   : > { %7881 = vst [vmem:[#allocation46_spill] sm:$0xff] %v5809_v54  ;;  %v5811_v29 = vpop.f32.mrf.mxu1  ;;  %v1701_v33 = vpop.f32.mrf.mxu0  ;;  %v5929_v54 = vld [vmem:[#allocation11] sm:$0xff] }
 0x2c6   : > { %7882 = vst [vmem:[#allocation47_spill] sm:$0xff] %v5811_v29  ;;  %v5954_v29 = vld [vmem:[#allocation13] sm:$0xff] }
 0x2c7   : > { %v5813_v30 = vpop.f32.mrf.mxu1  ;;  %v5815_v37 = vpop.f32.mrf.mxu0 }
 0x2c8   : > { %7883 = vst [vmem:[#allocation48_spill] sm:$0xff] %v5813_v30  ;;  %7884 = vst [vmem:[#allocation49_spill] sm:$0xff] %v5815_v37 }
 0x2c9   : > { %v5817_v31 = vpop.f32.mrf.mxu1  ;;  %v1705_v36 = vpop.f32.mrf.mxu0 }
 0x2ca   : > { %7885 = vst [vmem:[#allocation50_spill] sm:$0xff] %v5817_v31  ;;  %v5819_v45 = vpack.c.bf16 %v1705_v36, %v1701_v33 }
 0x2cb   : > { %v5821_v62 = vpop.f32.mrf.mxu1 }
 0x2cc   : > { %7886 = vst [vmem:[#allocation51_spill] sm:$0xff] %v5819_v45  ;;  %7887 = vst [vmem:[#allocation52_spill] sm:$0xff] %v5821_v62 }
 0x2cd   : > { %v5823_v32 = vpop.f32.mrf.mxu1 }
 0x2ce   : > { %7888 = vst [vmem:[#allocation53_spill] sm:$0xff] %v5823_v32 }
 0x2cf   : > { %v5825_v49 = vpop.f32.mrf.mxu1 }
 0x2d0   : > { %7889 = vst [vmem:[#allocation54_spill] sm:$0xff] %v5825_v49 }
 0x2d1   : > { %v5827_v18 = vpop.f32.mrf.mxu1 }
 0x2d2   : > { %7890 = vst [vmem:[#allocation55_spill] sm:$0xff] %v5827_v18  ;;  %v5944_v18 = vld [vmem:[#allocation11 + $0x18] sm:$0xff] }
 0x2d3   : > { %v1526_v60 = vpop.f32.mrf.mxu1 }
 0x2d4   : > { %v5832_v11 = vmul.f32 %v5829_v20, %v1526_v60  ;;  %2202 = vrot.lane.b32.xlu0 %v1526_v60, %s4980_s9 }
 0x2d5   : > { %v1528_v38 = vpop.f32.mrf.mxu1 }
 0x2d6   : > { %v5838_v10 = vmul.f32 %v5835_v5, %v1528_v38 }
 0x2d7   : > { %v1530_v3 = vpop.f32.mrf.mxu1 }
 0x2d8   : > { %v5843_v52 = vmul.f32 %v5840_v17, %v1530_v3  ;;  %2362 = vrot.lane.b32.xlu0 %v1526_v60, %s4981_s24  ;;  %2204 = vrot.lane.b32.xlu1 %v1530_v3, %s4980_s9 }
 0x2d9   : > { %v1532_v33 = vpop.f32.mrf.mxu1 }
 0x2da   : > { %v5850_v36 = vmul.f32 %v5847_v25, %v1532_v33 }
 0x2db   : > { %v5854_v46 = vpop.f32.mrf.mxu1 }
 0x2dc   : > { %2234 = vrot.lane.b32.xlu0 %v1528_v38, %s4980_s9  ;;  %2364 = vrot.lane.b32.xlu1 %v1530_v3, %s4981_s24 }
 0x2dd   : > { %v5858_v15 = vpop.f32.mrf.mxu1 }
 0x2df   : > { %v5863_v60 = vpop.f32.mrf.mxu1 }
 0x2e0   : > { %2394 = vrot.lane.b32.xlu0 %v1528_v38, %s4981_s24  ;;  %2236 = vrot.lane.b32.xlu1 %v1532_v33, %s4980_s9 }
 0x2e1   : > { %v5869_v3 = vpop.f32.mrf.mxu1 }
 0x2e3   : > { %v5875_v38 = vpop.f32.mrf.mxu1 }
 0x2e4   : > { %2396 = vrot.lane.b32.xlu1 %v1532_v33, %s4981_s24  ;;  %2206 = vrot.lane.b32.xlu0 %v5854_v46, %s4980_s9  ;;  %7891 = vst [vmem:[#allocation56_spill] sm:$0xff] %v5875_v38 }
 0x2e5   : > { %v5881_v33 = vpop.f32.mrf.mxu1 }
 0x2e6   : > { %7892 = vst [vmem:[#allocation57_spill] sm:$0xff] %v5881_v33 }
 0x2e7   : > { %v5887_v48 = vpop.f32.mrf.mxu1 }
 0x2e8   : > { %2366 = vrot.lane.b32.xlu0 %v5854_v46, %s4981_s24  ;;  %2208 = vrot.lane.b32.xlu1 %v5863_v60, %s4980_s9  ;;  %7893 = vst [vmem:[#allocation58_spill] sm:$0xff] %v5887_v48 }
 0x2e9   : > { %v5893_v39 = vpop.f32.mrf.mxu1 }
 0x2ea   : > { %7894 = vst [vmem:[#allocation59_spill] sm:$0xff] %v5893_v39 }
 0x2eb   : > { %v5899_v13 = vpop.f32.mrf.mxu1 }
 0x2ec   : > { %2238 = vrot.lane.b32.xlu0 %v5858_v15, %s4980_s9  ;;  %2368 = vrot.lane.b32.xlu1 %v5863_v60, %s4981_s24  ;;  %7895 = vst [vmem:[#allocation60_spill] sm:$0xff] %v5899_v13 }
 0x2ed   : > { %v5905_v12 = vpop.f32.mrf.mxu1 }
 0x2ee   : > { %7896 = vst [vmem:[#allocation61_spill] sm:$0xff] %v5905_v12 }
 0x2ef   : > { %v5911_v45 = vpop.f32.mrf.mxu1 }
 0x2f0   : > { %2398 = vrot.lane.b32.xlu0 %v5858_v15, %s4981_s24  ;;  %2240 = vrot.lane.b32.xlu1 %v5869_v3, %s4980_s9  ;;  %7897 = vst [vmem:[#allocation62_spill] sm:$0xff] %v5911_v45 }
 0x2f1   : > { %v5920_v63 = vpop.f32.mrf.mxu1 }
 0x2f2   : > { %7899 = vst [vmem:[#allocation63_spill] sm:$0xff] %v5920_v63 }
 0x2f3   : > { %v5927_v37 = vpop.f32.mrf.mxu1 }
 0x2f4   : > { %2400 = vrot.lane.b32.xlu1 %v5869_v3, %s4981_s24  ;;  %2210 = vrot.lane.b32.xlu0 %v5875_v38, %s4980_s9  ;;  %7900 = vst [vmem:[#allocation64_spill] sm:$0xff] %v5927_v37 }
 0x2f5   : > { %v5948_v62 = vpop.f32.mrf.mxu1 }
 0x2f6   : > { %7901 = vst [vmem:[#allocation65_spill] sm:$0xff] %v5948_v62 }
 0x2f8   : > { %2370 = vrot.lane.b32.xlu0 %v5875_v38, %s4981_s24  ;;  %2212 = vrot.lane.b32.xlu1 %v5887_v48, %s4980_s9 }
 0x2fc   : > { %2242 = vrot.lane.b32.xlu0 %v5881_v33, %s4980_s9  ;;  %2372 = vrot.lane.b32.xlu1 %v5887_v48, %s4981_s24  ;;  %v6054_v48 = vld [vmem:[#allocation13 + $0x38] sm:$0xff] }
 0x300   : > { %2402 = vrot.lane.b32.xlu0 %v5881_v33, %s4981_s24  ;;  %2244 = vrot.lane.b32.xlu1 %v5893_v39, %s4980_s9 }
 0x304   : > { %2404 = vrot.lane.b32.xlu1 %v5893_v39, %s4981_s24  ;;  %2214 = vrot.lane.b32.xlu0 %v5899_v13, %s4980_s9 }
 0x306   : > { %v1847_v28 = vpop.permute.xlu0 %1846 }
 0x308   : > { %2374 = vrot.lane.b32.xlu0 %v5899_v13, %s4981_s24  ;;  %2216 = vrot.lane.b32.xlu1 %v5911_v45, %s4980_s9  ;;  %v5972_v13 = vld [vmem:[#allocation13 + $0x10] sm:$0xff] }
 0x30a   : > { %v1849_v42 = vpop.permute.xlu1 %1848  ;;  %v2010_v27 = vpop.permute.xlu0 %2009 }
 0x30c   : > { %2246 = vrot.lane.b32.xlu0 %v5905_v12, %s4980_s9  ;;  %2376 = vrot.lane.b32.xlu1 %v5911_v45, %s4981_s24 }
 0x30e   : > { %v2012_v44 = vpop.permute.xlu1 %2011  ;;  %v1879_v22 = vpop.permute.xlu0 %1878 }
 0x30f   : > { %v1913_v40 = vsel %vm1912_vm0, %v1847_v28, %v1879_v22  ;;  %v1929_v14 = vsel %vm1912_vm0, %v1879_v22, %v1847_v28 }
 0x310   : > { %2406 = vrot.lane.b32.xlu0 %v5905_v12, %s4981_s24  ;;  %2248 = vrot.lane.b32.xlu1 %v5920_v63, %s4980_s9  ;;  %v1945_v49 = vmul.f32 %v1913_v40, %v5929_v54  ;;  %v1946_v31 = vmul.f32 %v1929_v14, %v5931_v47 }
 0x312   : > { %v1881_v32 = vpop.permute.xlu1 %1880  ;;  %v2042_v30 = vpop.permute.xlu0 %2041 }
 0x313   : > { %v1914_v22 = vsel %vm1912_vm0, %v1849_v42, %v1881_v32  ;;  %v1930_v28 = vsel %vm1912_vm0, %v1881_v32, %v1849_v42  ;;  %v2074_v45 = vsel %vm2073_vm1, %v2010_v27, %v2042_v30  ;;  %v2090_v14 = vsel %vm2073_vm1, %v2042_v30, %v2010_v27 }
 0x314   : > { %v1947_v40 = vmul.f32 %v1914_v22, %v5942_v51  ;;  %v1948_v12 = vmul.f32 %v1930_v28, %v5944_v18  ;;  %2408 = vrot.lane.b32.xlu1 %v5920_v63, %s4981_s24  ;;  %v1814_v42 = vmul.f32 %v5829_v20, %v5689_v59  ;;  %v1815_v32 = vmul.f32 %v5835_v5, %v5693_v23  ;;  %v5982_v23 = vpop.f32.mrf.mxu1 }
 0x315   : > { %2218 = vrot.lane.b32.xlu0 %v5927_v37, %s4980_s9  ;;  %v1816_v27 = vmul.f32 %v5840_v17, %v5695_v6  ;;  %v1817_v30 = vmul.f32 %v5847_v25, %v5703_v24  ;;  %v2106_v22 = vmul.f32 %v2090_v14, %v5954_v29  ;;  %v2107_v59 = vmul.f32 %v2074_v45, %v5956_v41 }
 0x316   : > { %v2044_v20 = vpop.permute.xlu1 %2043  ;;  %v1851_v28 = vpop.permute.xlu0 %1850  ;;  %7902 = vst [vmem:[#allocation66_spill] sm:$0xff] %v5982_v23  ;;  %v1977_v5 = vadd.f32 %v1945_v49, %v1814_v42  ;;  %v1978_v63 = vadd.f32 %v1946_v31, %v1815_v32 }
 0x317   : > { %v2075_v55 = vsel %vm2073_vm1, %v2012_v44, %v2044_v20  ;;  %v2091_v7 = vsel %vm2073_vm1, %v2044_v20, %v2012_v44  ;;  %v1979_v6 = vadd.f32 %v1947_v40, %v1816_v27  ;;  %v1980_v17 = vadd.f32 %v1948_v12, %v1817_v30  ;;  %v5994_v39 = vpop.f32.mrf.mxu1  ;;  %v6002_v27 = vld [vmem:[#allocation11 + $0x20] sm:$0xff]  ;;  %v6016_v20 = vld [vmem:[#allocation11 + $0x38] sm:$0xff] }
 0x318   : > { %v2108_v24 = vmul.f32 %v2091_v7, %v5972_v13  ;;  %v2109_v25 = vmul.f32 %v2075_v55, %v5974_v43  ;;  %2220 = vrot.lane.b32.xlu1 %v5982_v23, %s4980_s9  ;;  %v2138_v49 = vadd.f32 %v2106_v22, %v1977_v5  ;;  %v2139_v42 = vadd.f32 %v2107_v59, %v1978_v63  ;;  %v6004_v63 = vld [vmem:[#allocation11 + $0x28] sm:$0xff]  ;;  %v6014_v59 = vld [vmem:[#allocation11 + $0x30] sm:$0xff]  ;;  %v6018_v5 = vld [vmem:[#allocation10 + $0x20] sm:$0xff] }
 0x319   : > { %2378 = vrot.lane.b32.xlu0 %v5927_v37, %s4981_s24  ;;  %7903 = vst [vmem:[#allocation67_spill] sm:$0xff] %v5994_v39  ;;  %v6000_v40 = vpop.f32.mrf.mxu1  ;;  %v6052_v37 = vld [vmem:[#allocation13 + $0x30] sm:$0xff] }
 0x31a   : > { %v1853_v45 = vpop.permute.xlu1 %1852  ;;  %v2014_v31 = vpop.permute.xlu0 %2013  ;;  %v2140_v14 = vadd.f32 %v2108_v24, %v1979_v6  ;;  %v2141_v32 = vadd.f32 %v2109_v25, %v1980_v17  ;;  %v6020_v6 = vld [vmem:[#allocation10 + $0x28] sm:$0xff]  ;;  %v6022_v17 = vld [vmem:[#allocation10 + $0x30] sm:$0xff] }
 0x31c   : > { %2380 = vrot.lane.b32.xlu1 %v5982_v23, %s4981_s24  ;;  %v2522_v7 = vpack.c.bf16 %v2140_v14, %v2138_v49  ;;  %v2530_v12 = vpack.c.bf16 %v2141_v32, %v2139_v42  ;;  %v6026_v14 = vld [vmem:[#allocation10 + $0x38] sm:$0xff]  ;;  %v6028_v42 = vpop.f32.mrf.mxu1 }
 0x31d   : > { %2250 = vrot.lane.b32.xlu0 %v5948_v62, %s4980_s9 }
 0x31e   : > { %v2016_v55 = vpop.permute.xlu1 %2015  ;;  %4092 = vmatprep.mubr.bf16.mxu1 %v2522_v7  ;;  %4124 = vmatprep.mubr.bf16.mxu0 %v2530_v12  ;;  %v1883_v44 = vpop.permute.xlu0 %1882  ;;  %v6034_v12 = vld [vmem:[#allocation13 + $0x20] sm:$0xff] }
 0x31f   : > { %v1915_v30 = vsel %vm1912_vm0, %v1851_v28, %v1883_v44  ;;  %v1931_v22 = vsel %vm1912_vm0, %v1883_v44, %v1851_v28  ;;  %v6036_v44 = vld [vmem:[#allocation13 + $0x28] sm:$0xff] }
 0x320   : > { %2252 = vrot.lane.b32.xlu1 %v5994_v39, %s4980_s9  ;;  %v1949_v24 = vmul.f32 %v1915_v30, %v6002_v27  ;;  %v1950_v28 = vmul.f32 %v1931_v22, %v6004_v63 }
 0x321   : > { %2410 = vrot.lane.b32.xlu0 %v5948_v62, %s4981_s24 }
 0x322   : > { %v1885_v25 = vpop.permute.xlu1 %1884  ;;  %v2046_v49 = vpop.permute.xlu0 %2045 }
 0x323   : > { %v1916_v32 = vsel %vm1912_vm0, %v1853_v45, %v1885_v25  ;;  %v1932_v7 = vsel %vm1912_vm0, %v1885_v25, %v1853_v45  ;;  %v2076_v30 = vsel %vm2073_vm1, %v2014_v31, %v2046_v49  ;;  %v2092_v22 = vsel %vm2073_vm1, %v2046_v49, %v2014_v31 }
 0x324   : > { %v1951_v23 = vmul.f32 %v1916_v32, %v6014_v59  ;;  %v1952_v62 = vmul.f32 %v1932_v7, %v6016_v20  ;;  %2412 = vrot.lane.b32.xlu1 %v5994_v39, %s4981_s24  ;;  %v1818_v45 = vmul.f32 %v6018_v5, %v5707_v61  ;;  %v1819_v25 = vmul.f32 %v6020_v6, %v5713_v19  ;;  %v6062_v39 = vpop.f32.mrf.mxu1 }
 0x325   : > { %2222 = vrot.lane.b32.xlu0 %v6000_v40, %s4980_s9  ;;  %v1820_v31 = vmul.f32 %v6022_v17, %v5715_v53  ;;  %v1821_v49 = vmul.f32 %v6026_v14, %v5723_v16  ;;  %v2110_v32 = vmul.f32 %v2092_v22, %v6034_v12  ;;  %v2111_v61 = vmul.f32 %v2076_v30, %v6036_v44 }
 0x326   : > { %v2048_v7 = vpop.permute.xlu1 %2047  ;;  %v1981_v19 = vadd.f32 %v1949_v24, %v1818_v45  ;;  %v1982_v35 = vadd.f32 %v1950_v28, %v1819_v25 }
 0x327   : > { %v2077_v33 = vsel %vm2073_vm1, %v2016_v55, %v2048_v7  ;;  %v2093_v38 = vsel %vm2073_vm1, %v2048_v7, %v2016_v55  ;;  %v1983_v58 = vadd.f32 %v1951_v23, %v1820_v31  ;;  %v1984_v53 = vadd.f32 %v1952_v62, %v1821_v49  ;;  %v6082_v23 = vpop.f32.mrf.mxu1 }
 0x328   : > { %v2112_v56 = vmul.f32 %v2093_v38, %v6052_v37  ;;  %v2113_v16 = vmul.f32 %v2077_v33, %v6054_v48  ;;  %2224 = vrot.lane.b32.xlu1 %v6062_v39, %s4980_s9  ;;  %v6074_v24 = vadd.f32 %v2110_v32, %v1981_v19  ;;  %v6076_v28 = vadd.f32 %v2111_v61, %v1982_v35  ;;  %v6110_v33 = vpop.permute.xlu0 %1854 }
 0x329   : > { %2382 = vrot.lane.b32.xlu0 %v6000_v40, %s4981_s24  ;;  %v6092_v35 = vpop.f32.mrf.mxu1  ;;  %7908 = vst [vmem:[#allocation72_spill] sm:$0xff] %v6110_v33 }
 0x32a   : > { %7904 = vst [vmem:[#allocation68_spill] sm:$0xff] %v6074_v24  ;;  %7905 = vst [vmem:[#allocation69_spill] sm:$0xff] %v6076_v28  ;;  %v6078_v30 = vadd.f32 %v2112_v56, %v1983_v58  ;;  %v6080_v22 = vadd.f32 %v2113_v16, %v1984_v53  ;;  %v6118_v45 = vpop.permute.xlu1 %1856 }
 0x32b   : > { %v6098_v58 = vpop.f32.mrf.mxu1  ;;  %7909 = vst [vmem:[#allocation73_spill] sm:$0xff] %v6118_v45 }
 0x32c   : > { %7906 = vst [vmem:[#allocation70_spill] sm:$0xff] %v6078_v30  ;;  %7907 = vst [vmem:[#allocation71_spill] sm:$0xff] %v6080_v22  ;;  %2384 = vrot.lane.b32.xlu1 %v6062_v39, %s4981_s24  ;;  %v6124_v25 = vpop.permute.xlu0 %1886 }
 0x32d   : > { %2254 = vrot.lane.b32.xlu0 %v6028_v42, %s4980_s9  ;;  %v6104_v56 = vpop.f32.mrf.mxu1  ;;  %7910 = vst [vmem:[#allocation74_spill] sm:$0xff] %v6124_v25 }
 0x32e   : > { %v6132_v49 = vpop.permute.xlu1 %1888 }
 0x32f   : > { %v6116_v55 = vpop.f32.mrf.mxu1  ;;  %7911 = vst [vmem:[#allocation75_spill] sm:$0xff] %v6132_v49 }
 0x330   : > { %2256 = vrot.lane.b32.xlu1 %v6082_v23, %s4980_s9 }
 0x331   : > { %2414 = vrot.lane.b32.xlu0 %v6028_v42, %s4981_s24  ;;  %v6126_v31 = vpop.f32.mrf.mxu1 }
 0x333   : > { %v6134_v61 = vpop.f32.mrf.mxu1 }
 0x334   : > { %2416 = vrot.lane.b32.xlu1 %v6082_v23, %s4981_s24 }
 0x335   : > { %2226 = vrot.lane.b32.xlu0 %v6092_v35, %s4980_s9  ;;  %v6140_v53 = vpop.f32.mrf.mxu1 }
 0x337   : > { %v6158_v25 = vpop.f32.mrf.mxu1 }
 0x338   : > { %2228 = vrot.lane.b32.xlu1 %v6104_v56, %s4980_s9 }
 0x339   : > { %2386 = vrot.lane.b32.xlu0 %v6092_v35, %s4981_s24 }
 0x33c   : > { %2388 = vrot.lane.b32.xlu1 %v6104_v56, %s4981_s24 }
 0x33d   : > { %2258 = vrot.lane.b32.xlu0 %v6098_v58, %s4980_s9 }
 0x340   : > { %2260 = vrot.lane.b32.xlu1 %v6116_v55, %s4980_s9 }
 0x341   : > { %2418 = vrot.lane.b32.xlu0 %v6098_v58, %s4981_s24 }
 0x344   : > { %2420 = vrot.lane.b32.xlu1 %v6116_v55, %s4981_s24 }
 0x345   : > { %2230 = vrot.lane.b32.xlu0 %v6126_v31, %s4980_s9 }
 0x346   : > { %v2203_v32 = vpop.permute.xlu0 %2202 }
 0x348   : > { %2262 = vrot.lane.b32.xlu1 %v6134_v61, %s4980_s9 }
 0x349   : > { %2390 = vrot.lane.b32.xlu0 %v6126_v31, %s4981_s24 }
 0x34a   : > { %v2205_v7 = vpop.permute.xlu1 %2204  ;;  %v2363_v19 = vpop.permute.xlu0 %2362 }
 0x34c   : > { %2232 = vrot.lane.b32.xlu1 %v6140_v53, %s4980_s9 }
 0x34d   : > { %2422 = vrot.lane.b32.xlu0 %v6134_v61, %s4981_s24 }
 0x34e   : > { %v2365_v16 = vpop.permute.xlu1 %2364  ;;  %v2235_v38 = vpop.permute.xlu0 %2234 }
 0x34f   : > { %v2266_v62 = vsel %vm1912_vm0, %v2203_v32, %v2235_v38  ;;  %v2282_v28 = vsel %vm1912_vm0, %v2235_v38, %v2203_v32 }
 0x350   : > { %v2298_v22 = vmul.f32 %v2266_v62, %v5929_v54  ;;  %v2299_v24 = vmul.f32 %v2282_v28, %v5931_v47  ;;  %2392 = vrot.lane.b32.xlu1 %v6140_v53, %s4981_s24 }
 0x351   : > { %1858 = vrot.lane.b32.xlu0 %v5747_v34, %s4980_s9 }
 0x352   : > { %v2330_v30 = vadd.f32 %v2298_v22, %v5832_v11  ;;  %v2331_v45 = vadd.f32 %v2299_v24, %v5838_v10  ;;  %v2237_v49 = vpop.permute.xlu1 %2236  ;;  %v2395_v33 = vpop.permute.xlu0 %2394 }
 0x353   : > { %v2267_v38 = vsel %vm1912_vm0, %v2205_v7, %v2237_v49  ;;  %v2283_v47 = vsel %vm1912_vm0, %v2237_v49, %v2205_v7  ;;  %v2426_v54 = vsel %vm2073_vm1, %v2363_v19, %v2395_v33  ;;  %v2442_v28 = vsel %vm2073_vm1, %v2395_v33, %v2363_v19 }
 0x354   : > { %v2300_v11 = vmul.f32 %v2267_v38, %v5942_v51  ;;  %v2301_v10 = vmul.f32 %v2283_v47, %v5944_v18  ;;  %v2458_v24 = vmul.f32 %v2442_v28, %v5954_v29  ;;  %v2459_v22 = vmul.f32 %v2426_v54, %v5956_v41  ;;  %2264 = vrot.lane.b32.xlu1 %v6158_v25, %s4980_s9 }
 0x355   : > { %1890 = vrot.lane.b32.xlu0 %v5755_v8, %s4980_s9 }
 0x356   : > { %v2332_v62 = vadd.f32 %v2300_v11, %v5843_v52  ;;  %v2333_v49 = vadd.f32 %v2301_v10, %v5850_v36  ;;  %v2397_v32 = vpop.permute.xlu1 %2396  ;;  %v2207_v33 = vpop.permute.xlu0 %2206  ;;  %v2490_v7 = vadd.f32 %v2458_v24, %v2330_v30  ;;  %v2491_v51 = vadd.f32 %v2459_v22, %v2331_v45 }
 0x357   : > { %v2427_v18 = vsel %vm2073_vm1, %v2365_v16, %v2397_v32  ;;  %v2443_v41 = vsel %vm2073_vm1, %v2397_v32, %v2365_v16 }
 0x358   : > { %v2460_v29 = vmul.f32 %v2443_v41, %v5972_v13  ;;  %v2461_v19 = vmul.f32 %v2427_v18, %v5974_v43  ;;  %2424 = vrot.lane.b32.xlu1 %v6158_v25, %s4981_s24 }
 0x359   : > { %2017 = vrot.lane.b32.xlu0 %v5727_v2, %s4981_s24 }
 0x35a   : > { %v2209_v52 = vpop.permute.xlu1 %2208  ;;  %v2367_v36 = vpop.permute.xlu0 %2366  ;;  %v2492_v30 = vadd.f32 %v2460_v29, %v2332_v62  ;;  %v2493_v45 = vadd.f32 %v2461_v19, %v2333_v49 }
 0x35c   : > { %1860 = vrot.lane.b32.xlu1 %v5757_v9, %s4980_s9  ;;  %v6190_v38 = vpack.c.bf16 %v2492_v30, %v2490_v7  ;;  %v6192_v16 = vpack.c.bf16 %v2493_v45, %v2491_v51  ;;  %v2175_v7 = vmul.f32 %v6020_v6, %v5858_v15  ;;  %v2176_v51 = vmul.f32 %v6022_v17, %v5863_v60 }
 0x35d   : > { %2049 = vrot.lane.b32.xlu0 %v5733_v50, %s4981_s24 }
 0x35e   : > { %7912 = vst [vmem:[#allocation76_spill] sm:$0xff] %v6190_v38  ;;  %7913 = vst [vmem:[#allocation77_spill] sm:$0xff] %v6192_v16  ;;  %v2369_v13 = vpop.permute.xlu1 %2368  ;;  %v2239_v43 = vpop.permute.xlu0 %2238 }
 0x35f   : > { %v2268_v47 = vsel %vm1912_vm0, %v2207_v33, %v2239_v43  ;;  %v2284_v54 = vsel %vm1912_vm0, %v2239_v43, %v2207_v33 }
 0x360   : > { %1892 = vrot.lane.b32.xlu1 %v5765_v21, %s4980_s9  ;;  %v2302_v28 = vmul.f32 %v2268_v47, %v6002_v27  ;;  %v2303_v11 = vmul.f32 %v2284_v54, %v6004_v63  ;;  %v2174_v63 = vmul.f32 %v6018_v5, %v5854_v46  ;;  %v6254_v54 = vld [vmem:[#allocation11 + $0x40] sm:$0xff] }
 0x361   : > { %2021 = vrot.lane.b32.xlu0 %v5747_v34, %s4981_s24  ;;  %7916 = vst [vmem:[#allocation80_spill] sm:$0xff] %v6254_v54 }
 0x362   : > { %v2241_v10 = vpop.permute.xlu1 %2240  ;;  %v2399_v24 = vpop.permute.xlu0 %2398  ;;  %v2334_v19 = vadd.f32 %v2302_v28, %v2174_v63  ;;  %v2335_v46 = vadd.f32 %v2303_v11, %v2175_v7  ;;  %v6256_v28 = vld [vmem:[#allocation11 + $0x48] sm:$0xff]  ;;  %v7918_v11 = vld [vmem:[#allocation38_spill] sm:$0xff]  ;;  %v6270_v63 = vld [vmem:[#allocation13 + $0x40] sm:$0xff] }
 0x363   : > { %v2269_v22 = vsel %vm1912_vm0, %v2209_v52, %v2241_v10  ;;  %v2285_v62 = vsel %vm1912_vm0, %v2241_v10, %v2209_v52  ;;  %v2428_v49 = vsel %vm2073_vm1, %v2367_v36, %v2399_v24  ;;  %v2444_v32 = vsel %vm2073_vm1, %v2399_v24, %v2367_v36  ;;  %7917 = vst [vmem:[#allocation81_spill] sm:$0xff] %v6256_v28  ;;  %v6260_v10 = vld [vmem:[#allocation11 + $0x50] sm:$0xff]  ;;  %v6272_v7 = vld [vmem:[#allocation13 + $0x48] sm:$0xff] }
 0x364   : > { %v2304_v33 = vmul.f32 %v2269_v22, %v6014_v59  ;;  %v2305_v27 = vmul.f32 %v2285_v62, %v6016_v20  ;;  %2019 = vrot.lane.b32.xlu1 %v5735_v4, %s4981_s24  ;;  %v2177_v59 = vmul.f32 %v6026_v14, %v5869_v3  ;;  %v2462_v20 = vmul.f32 %v2444_v32, %v6034_v12  ;;  %v6264_v32 = vld [vmem:[#allocation11 + $0x58] sm:$0xff] }
 0x365   : > { %2053 = vrot.lane.b32.xlu0 %v5755_v8, %s4981_s24  ;;  %v2463_v18 = vmul.f32 %v2428_v49, %v6036_v44  ;;  %7919 = vst [vmem:[#allocation82_spill] sm:$0xff] %v6260_v10  ;;  %7920 = vst [vmem:[#allocation83_spill] sm:$0xff] %v6264_v32 }
 0x366   : > { %v2401_v41 = vpop.permute.xlu1 %2400  ;;  %v2211_v29 = vpop.permute.xlu0 %2210  ;;  %v2336_v6 = vadd.f32 %v2304_v33, %v2176_v51  ;;  %v2337_v52 = vadd.f32 %v2305_v27, %v2177_v59  ;;  %v2494_v12 = vadd.f32 %v2462_v20, %v2334_v19  ;;  %7921 = vst [vmem:[#allocation84_spill] sm:$0xff] %v6270_v63  ;;  %7922 = vst [vmem:[#allocation85_spill] sm:$0xff] %v6272_v7  ;;  %v6278_v20 = vld [vmem:[#allocation10 + $0x40] sm:$0xff] }
 0x367   : > { %v2429_v15 = vsel %vm2073_vm1, %v2369_v13, %v2401_v41  ;;  %v2445_v5 = vsel %vm2073_vm1, %v2401_v41, %v2369_v13  ;;  %v2495_v36 = vadd.f32 %v2463_v18, %v2335_v46  ;;  %v6280_v18 = vld [vmem:[#allocation10 + $0x48] sm:$0xff]  ;;  %v6282_v41 = vld [vmem:[#allocation10 + $0x50] sm:$0xff] }
 0x368   : > { %v2464_v60 = vmul.f32 %v2445_v5, %v6052_v37  ;;  %v2465_v3 = vmul.f32 %v2429_v15, %v6054_v48  ;;  %2051 = vrot.lane.b32.xlu1 %v5743_v57, %s4981_s24  ;;  %v7923_v46 = vld [vmem:[#allocation34_spill] sm:$0xff]  ;;  %v6288_v15 = vld [vmem:[#allocation10 + $0x58] sm:$0xff]  ;;  %v7924_v5 = vld [vmem:[#allocation56_spill] sm:$0xff] }
 0x369   : > { %1862 = vrot.lane.b32.xlu0 %v5769_v1, %s4980_s9 }
 0x36a   : > { %v2213_v17 = vpop.permute.xlu1 %2212  ;;  %v2371_v14 = vpop.permute.xlu0 %2370  ;;  %v2496_v44 = vadd.f32 %v2464_v60, %v2336_v6  ;;  %v2497_v30 = vadd.f32 %v2465_v3, %v2337_v52  ;;  %v2178_v6 = vmul.f32 %v6278_v20, %v7924_v5  ;;  %v7925_v52 = vld [vmem:[#allocation57_spill] sm:$0xff]  ;;  %v7926_v3 = vld [vmem:[#allocation40_spill] sm:$0xff] }
 0x36b   : > { %v2179_v60 = vmul.f32 %v6280_v18, %v7925_v52 }
 0x36c   : > { %2023 = vrot.lane.b32.xlu1 %v5757_v9, %s4981_s24  ;;  %v6242_v45 = vpack.c.bf16 %v2496_v44, %v2494_v12  ;;  %v6244_v37 = vpack.c.bf16 %v2497_v30, %v2495_v36  ;;  %v7929_v12 = vld [vmem:[#allocation58_spill] sm:$0xff]  ;;  %v7930_v36 = vld [vmem:[#allocation59_spill] sm:$0xff] }
 0x36d   : > { %1894 = vrot.lane.b32.xlu0 %v5777_v26, %s4980_s9  ;;  %v2180_v44 = vmul.f32 %v6282_v41, %v7929_v12  ;;  %v2181_v30 = vmul.f32 %v6288_v15, %v7930_v36 }
 0x36e   : > { %7914 = vst [vmem:[#allocation78_spill] sm:$0xff] %v6242_v45  ;;  %7915 = vst [vmem:[#allocation79_spill] sm:$0xff] %v6244_v37  ;;  %v2373_v48 = vpop.permute.xlu1 %2372  ;;  %v2243_v13 = vpop.permute.xlu0 %2242 }
 0x36f   : > { %v2270_v43 = vsel %vm1912_vm0, %v2211_v29, %v2243_v13  ;;  %v2286_v47 = vsel %vm1912_vm0, %v2243_v13, %v2211_v29 }
 0x370   : > { %2055 = vrot.lane.b32.xlu1 %v5765_v21, %s4981_s24  ;;  %v2306_v24 = vmul.f32 %v2270_v43, %v6254_v54  ;;  %v2307_v22 = vmul.f32 %v2286_v47, %v6256_v28 }
 0x371   : > { %1866 = vrot.lane.b32.xlu0 %v7918_v11, %s4980_s9 }
 0x372   : > { %v2245_v62 = vpop.permute.xlu1 %2244  ;;  %v2403_v49 = vpop.permute.xlu0 %2402 }
 0x373   : > { %v2271_v33 = vsel %vm1912_vm0, %v2213_v17, %v2245_v62  ;;  %v2287_v27 = vsel %vm1912_vm0, %v2245_v62, %v2213_v17  ;;  %v2430_v51 = vsel %vm2073_vm1, %v2371_v14, %v2403_v49  ;;  %v2446_v59 = vsel %vm2073_vm1, %v2403_v49, %v2371_v14  ;;  %v6296_v17 = vld [vmem:[#allocation13 + $0x50] sm:$0xff]  ;;  %v6298_v14 = vld [vmem:[#allocation13 + $0x58] sm:$0xff] }
 0x374   : > { %v2308_v29 = vmul.f32 %v2271_v33, %v6260_v10  ;;  %v2309_v19 = vmul.f32 %v2287_v27, %v6264_v32  ;;  %1864 = vrot.lane.b32.xlu1 %v7923_v46, %s4980_s9  ;;  %7927 = vst [vmem:[#allocation56_spill] sm:$0xff] %v6296_v17  ;;  %7928 = vst [vmem:[#allocation57_spill] sm:$0xff] %v6298_v14  ;;  %v2466_v13 = vmul.f32 %v2446_v59, %v6270_v63  ;;  %v7931_v59 = vld [vmem:[#allocation36_spill] sm:$0xff] }
 0x375   : > { %1898 = vrot.lane.b32.xlu0 %v7926_v3, %s4980_s9  ;;  %v2467_v43 = vmul.f32 %v2430_v51, %v6272_v7  ;;  %v2338_v49 = vadd.f32 %v2306_v24, %v2178_v6  ;;  %v2339_v33 = vadd.f32 %v2307_v22, %v2179_v60  ;;  %v7942_v63 = vld [vmem:[#allocation60_spill] sm:$0xff] }
 0x376   : > { %v2405_v47 = vpop.permute.xlu1 %2404  ;;  %v2215_v62 = vpop.permute.xlu0 %2214  ;;  %v2340_v52 = vadd.f32 %v2308_v29, %v2180_v44  ;;  %v2341_v16 = vadd.f32 %v2309_v19, %v2181_v30 }
 0x377   : > { %v2431_v27 = vsel %vm2073_vm1, %v2373_v48, %v2405_v47  ;;  %v2447_v5 = vsel %vm2073_vm1, %v2405_v47, %v2373_v48  ;;  %v2498_v51 = vadd.f32 %v2466_v13, %v2338_v49  ;;  %v2499_v60 = vadd.f32 %v2467_v43, %v2339_v33  ;;  %v7932_v48 = vld [vmem:[#allocation41_spill] sm:$0xff]  ;;  %v6324_v47 = vld [vmem:[#allocation11 + $0x60] sm:$0xff]  ;;  %v7935_v43 = vld [vmem:[#allocation43_spill] sm:$0xff] }
 0x378   : > { %v2468_v12 = vmul.f32 %v2447_v5, %v6296_v17  ;;  %v2469_v36 = vmul.f32 %v2431_v27, %v6298_v14  ;;  %1896 = vrot.lane.b32.xlu1 %v7931_v59, %s4980_s9  ;;  %7933 = vst [vmem:[#allocation58_spill] sm:$0xff] %v6324_v47  ;;  %v6326_v27 = vld [vmem:[#allocation11 + $0x68] sm:$0xff]  ;;  %v6338_v49 = vld [vmem:[#allocation11 + $0x78] sm:$0xff]  ;;  %v6358_v14 = vld [vmem:[#allocation10 + $0x70] sm:$0xff] }
 0x379   : > { %2025 = vrot.lane.b32.xlu0 %v5769_v1, %s4981_s24  ;;  %7934 = vst [vmem:[#allocation59_spill] sm:$0xff] %v6326_v27  ;;  %7937 = vst [vmem:[#allocation87_spill] sm:$0xff] %v6338_v49 }
 0x37a   : > { %v2217_v24 = vpop.permute.xlu1 %2216  ;;  %v2375_v22 = vpop.permute.xlu0 %2374  ;;  %v2500_v6 = vadd.f32 %v2468_v12, %v2340_v52  ;;  %v2501_v7 = vadd.f32 %v2469_v36, %v2341_v16  ;;  %7940 = vst [vmem:[#allocation90_spill] sm:$0xff] %v6358_v14 }
 0x37c   : > { %1868 = vrot.lane.b32.xlu1 %v7932_v48, %s4980_s9  ;;  %v6318_v29 = vpack.c.bf16 %v2500_v6, %v2498_v51  ;;  %v6320_v19 = vpack.c.bf16 %v2501_v7, %v2499_v60  ;;  %v6336_v7 = vld [vmem:[#allocation11 + $0x70] sm:$0xff]  ;;  %v6346_v51 = vld [vmem:[#allocation13 + $0x60] sm:$0xff]  ;;  %v6348_v6 = vld [vmem:[#allocation13 + $0x68] sm:$0xff] }
 0x37d   : > { %2057 = vrot.lane.b32.xlu0 %v5777_v26, %s4981_s24  ;;  %7936 = vst [vmem:[#allocation86_spill] sm:$0xff] %v6336_v7  ;;  %7938 = vst [vmem:[#allocation88_spill] sm:$0xff] %v6346_v51 }
 0x37e   : > { %v2377_v44 = vpop.permute.xlu1 %2376  ;;  %v2247_v30 = vpop.permute.xlu0 %2246  ;;  %7939 = vst [vmem:[#allocation89_spill] sm:$0xff] %v6348_v6 }
 0x37f   : > { %v2272_v13 = vsel %vm1912_vm0, %v2215_v62, %v2247_v30  ;;  %v2288_v16 = vsel %vm1912_vm0, %v2247_v30, %v2215_v62 }
 0x380   : > { %1900 = vrot.lane.b32.xlu1 %v7935_v43, %s4980_s9  ;;  %v2310_v33 = vmul.f32 %v2272_v13, %v6324_v47  ;;  %v2311_v5 = vmul.f32 %v2288_v16, %v6326_v27  ;;  %v6354_v13 = vld [vmem:[#allocation10 + $0x60] sm:$0xff]  ;;  %v6356_v16 = vld [vmem:[#allocation10 + $0x68] sm:$0xff]  ;;  %v6374_v47 = vld [vmem:[#allocation13 + $0x78] sm:$0xff] }
 0x381   : > { %2029 = vrot.lane.b32.xlu0 %v7918_v11, %s4981_s24  ;;  %v2182_v38 = vmul.f32 %v6354_v13, %v7942_v63  ;;  %v7943_v27 = vld [vmem:[#allocation61_spill] sm:$0xff] }
 0x382   : > { %v2249_v52 = vpop.permute.xlu1 %2248  ;;  %v2407_v12 = vpop.permute.xlu0 %2406  ;;  %7945 = vst [vmem:[#allocation61_spill] sm:$0xff] %v6374_v47 }
 0x383   : > { %v2273_v36 = vsel %vm1912_vm0, %v2217_v24, %v2249_v52  ;;  %v2289_v62 = vsel %vm1912_vm0, %v2249_v52, %v2217_v24  ;;  %v2432_v60 = vsel %vm2073_vm1, %v2375_v22, %v2407_v12  ;;  %v2448_v30 = vsel %vm2073_vm1, %v2407_v12, %v2375_v22  ;;  %v6364_v52 = vld [vmem:[#allocation10 + $0x78] sm:$0xff]  ;;  %v6372_v12 = vld [vmem:[#allocation13 + $0x70] sm:$0xff] }
 0x384   : > { %v2312_v17 = vmul.f32 %v2273_v36, %v6336_v7  ;;  %v2313_v24 = vmul.f32 %v2289_v62, %v6338_v49  ;;  %2027 = vrot.lane.b32.xlu1 %v7923_v46, %s4981_s24  ;;  %7941 = vst [vmem:[#allocation91_spill] sm:$0xff] %v6364_v52  ;;  %v2183_v22 = vmul.f32 %v6356_v16, %v7943_v27  ;;  %7944 = vst [vmem:[#allocation60_spill] sm:$0xff] %v6372_v12  ;;  %v7946_v36 = vld [vmem:[#allocation62_spill] sm:$0xff]  ;;  %v7947_v49 = vld [vmem:[#allocation63_spill] sm:$0xff] }
 0x385   : > { %2061 = vrot.lane.b32.xlu0 %v7926_v3, %s4981_s24  ;;  %v2184_v62 = vmul.f32 %v6358_v14, %v7946_v36  ;;  %v2185_v7 = vmul.f32 %v6364_v52, %v7947_v49  ;;  %v2470_v32 = vmul.f32 %v2448_v30, %v6346_v51  ;;  %v2471_v63 = vmul.f32 %v2432_v60, %v6348_v6  ;;  %v7948_v60 = vld [vmem:[#allocation45_spill] sm:$0xff] }
 0x386   : > { %v2409_v10 = vpop.permute.xlu1 %2408  ;;  %v2342_v28 = vadd.f32 %v2310_v33, %v2182_v38  ;;  %v2343_v27 = vadd.f32 %v2311_v5, %v2183_v22 }
 0x387   : > { %v2433_v54 = vsel %vm2073_vm1, %v2377_v44, %v2409_v10  ;;  %v2449_v37 = vsel %vm2073_vm1, %v2409_v10, %v2377_v44  ;;  %v2219_v45 = vpop.permute.xlu0 %2218  ;;  %v2344_v3 = vadd.f32 %v2312_v17, %v2184_v62  ;;  %v2345_v11 = vadd.f32 %v2313_v24, %v2185_v7  ;;  %v6412_v24 = vld [vmem:[#allocation11 + $0x90] sm:$0xff]  ;;  %v6414_v62 = vld [vmem:[#allocation11 + $0x98] sm:$0xff] }
 0x388   : > { %2059 = vrot.lane.b32.xlu1 %v7931_v59, %s4981_s24  ;;  %v2472_v49 = vmul.f32 %v2449_v37, %v6372_v12  ;;  %v2473_v30 = vmul.f32 %v2433_v54, %v6374_v47  ;;  %v2502_v33 = vadd.f32 %v2470_v32, %v2342_v28  ;;  %v2503_v22 = vadd.f32 %v2471_v63, %v2343_v27  ;;  %v7949_v37 = vld [vmem:[#allocation47_spill] sm:$0xff]  ;;  %v6408_v32 = vld [vmem:[#allocation11 + $0x88] sm:$0xff]  ;;  %v6430_v47 = vld [vmem:[#allocation10 + $0x90] sm:$0xff] }
 0x389   : > { %1870 = vrot.lane.b32.xlu0 %v7948_v60, %s4980_s9  ;;  %7951 = vst [vmem:[#allocation63_spill] sm:$0xff] %v6408_v32  ;;  %7953 = vst [vmem:[#allocation45_spill] sm:$0xff] %v6412_v24 }
 0x38a   : > { %v2221_v38 = vpop.permute.xlu1 %2220  ;;  %v2504_v5 = vadd.f32 %v2472_v49, %v2344_v3  ;;  %v2505_v36 = vadd.f32 %v2473_v30, %v2345_v11  ;;  %v6406_v11 = vld [vmem:[#allocation11 + $0x80] sm:$0xff]  ;;  %7954 = vst [vmem:[#allocation92_spill] sm:$0xff] %v6414_v62  ;;  %v6422_v30 = vld [vmem:[#allocation13 + $0x88] sm:$0xff] }
 0x38b   : > { %v2379_v6 = vpop.permute.xlu0 %2378  ;;  %7950 = vst [vmem:[#allocation62_spill] sm:$0xff] %v6406_v11  ;;  %v7952_v3 = vld [vmem:[#allocation52_spill] sm:$0xff]  ;;  %7956 = vst [vmem:[#allocation94_spill] sm:$0xff] %v6422_v30 }
 0x38c   : > { %2031 = vrot.lane.b32.xlu1 %v7932_v48, %s4981_s24  ;;  %v6394_v10 = vpack.c.bf16 %v2504_v5, %v2502_v33  ;;  %v6396_v17 = vpack.c.bf16 %v2505_v36, %v2503_v22  ;;  %v6420_v49 = vld [vmem:[#allocation13 + $0x80] sm:$0xff] }
 0x38d   : > { %1902 = vrot.lane.b32.xlu0 %v7949_v37, %s4980_s9  ;;  %7955 = vst [vmem:[#allocation93_spill] sm:$0xff] %v6420_v49  ;;  %v6426_v36 = vld [vmem:[#allocation10 + $0x80] sm:$0xff] }
 0x38e   : > { %v2381_v54 = vpop.permute.xlu1 %2380  ;;  %7957 = vst [vmem:[#allocation95_spill] sm:$0xff] %v6426_v36 }
 0x38f   : > { %v2251_v44 = vpop.permute.xlu0 %2250 }
 0x390   : > { %v2274_v7 = vsel %vm1912_vm0, %v2219_v45, %v2251_v44  ;;  %v2290_v28 = vsel %vm1912_vm0, %v2251_v44, %v2219_v45  ;;  %2063 = vrot.lane.b32.xlu1 %v7935_v43, %s4981_s24  ;;  %v6428_v44 = vld [vmem:[#allocation10 + $0x88] sm:$0xff] }
 0x391   : > { %1874 = vrot.lane.b32.xlu0 %v7952_v3, %s4980_s9  ;;  %v2314_v5 = vmul.f32 %v2274_v7, %v6406_v11  ;;  %v2315_v22 = vmul.f32 %v2290_v28, %v6408_v32  ;;  %7958 = vst [vmem:[#allocation96_spill] sm:$0xff] %v6428_v44  ;;  %v7959_v7 = vld [vmem:[#allocation48_spill] sm:$0xff]  ;;  %v6440_v28 = vld [vmem:[#allocation10 + $0x98] sm:$0xff]  ;;  %v7962_v43 = vld [vmem:[#allocation65_spill] sm:$0xff] }
 0x392   : > { %v2253_v63 = vpop.permute.xlu1 %2252  ;;  %7960 = vst [vmem:[#allocation97_spill] sm:$0xff] %v6440_v28  ;;  %v7961_v32 = vld [vmem:[#allocation64_spill] sm:$0xff]  ;;  %v2187_v48 = vmul.f32 %v6428_v44, %v7962_v43 }
 0x393   : > { %v2275_v27 = vsel %vm1912_vm0, %v2221_v38, %v2253_v63  ;;  %v2291_v45 = vsel %vm1912_vm0, %v2253_v63, %v2221_v38  ;;  %v2411_v33 = vpop.permute.xlu0 %2410  ;;  %v2186_v11 = vmul.f32 %v6426_v36, %v7961_v32 }
 0x394   : > { %v2316_v12 = vmul.f32 %v2275_v27, %v6412_v24  ;;  %v2317_v51 = vmul.f32 %v2291_v45, %v6414_v62  ;;  %v2434_v38 = vsel %vm2073_vm1, %v2379_v6, %v2411_v33  ;;  %v2450_v63 = vsel %vm2073_vm1, %v2411_v33, %v2379_v6  ;;  %1872 = vrot.lane.b32.xlu1 %v7959_v7, %s4980_s9  ;;  %v7963_v27 = vld [vmem:[#allocation53_spill] sm:$0xff]  ;;  %v6448_v45 = vld [vmem:[#allocation13 + $0x90] sm:$0xff]  ;;  %v6450_v62 = vld [vmem:[#allocation13 + $0x98] sm:$0xff] }
 0x395   : > { %1906 = vrot.lane.b32.xlu0 %v7963_v27, %s4980_s9  ;;  %7964 = vst [vmem:[#allocation64_spill] sm:$0xff] %v6448_v45  ;;  %7965 = vst [vmem:[#allocation65_spill] sm:$0xff] %v6450_v62  ;;  %v7966_v24 = vld [vmem:[#allocation66_spill] sm:$0xff]  ;;  %v7967_v33 = vld [vmem:[#allocation67_spill] sm:$0xff]  ;;  %v2474_v46 = vmul.f32 %v2450_v63, %v6420_v49  ;;  %v2475_v32 = vmul.f32 %v2434_v38, %v6422_v30  ;;  %v2346_v1 = vadd.f32 %v2314_v5, %v2186_v11 }
 0x396   : > { %v2188_v6 = vmul.f32 %v6430_v47, %v7966_v24  ;;  %v2189_v59 = vmul.f32 %v6440_v28, %v7967_v33  ;;  %v2413_v26 = vpop.permute.xlu1 %2412  ;;  %v2347_v52 = vadd.f32 %v2315_v22, %v2187_v48  ;;  %v7968_v63 = vld [vmem:[#allocation50_spill] sm:$0xff]  ;;  %v6476_v5 = vld [vmem:[#allocation11 + $0xa0] sm:$0xff]  ;;  %v6478_v22 = vld [vmem:[#allocation11 + $0xa8] sm:$0xff] }
 0x397   : > { %v2435_v43 = vsel %vm2073_vm1, %v2381_v54, %v2413_v26  ;;  %v2451_v44 = vsel %vm2073_vm1, %v2413_v26, %v2381_v54  ;;  %v2223_v36 = vpop.permute.xlu0 %2222  ;;  %v2506_v30 = vadd.f32 %v2474_v46, %v2346_v1  ;;  %v7969_v48 = vld [vmem:[#allocation54_spill] sm:$0xff]  ;;  %7970 = vst [vmem:[#allocation66_spill] sm:$0xff] %v6476_v5  ;;  %7971 = vst [vmem:[#allocation67_spill] sm:$0xff] %v6478_v22  ;;  %v7972_v46 = vld [vmem:[#allocation55_spill] sm:$0xff] }
 0x398   : > { %v2348_v21 = vadd.f32 %v2316_v12, %v2188_v6  ;;  %v2349_v14 = vadd.f32 %v2317_v51, %v2189_v59  ;;  %v2476_v24 = vmul.f32 %v2451_v44, %v6448_v45  ;;  %v2477_v33 = vmul.f32 %v2435_v43, %v6450_v62  ;;  %1904 = vrot.lane.b32.xlu1 %v7968_v63, %s4980_s9  ;;  %v6498_v6 = vld [vmem:[#allocation13 + $0xa0] sm:$0xff] }
 0x399   : > { %2033 = vrot.lane.b32.xlu0 %v7948_v60, %s4981_s24  ;;  %v2507_v28 = vadd.f32 %v2475_v32, %v2347_v52  ;;  %v6490_v52 = vld [vmem:[#allocation11 + $0xb8] sm:$0xff]  ;;  %v6500_v32 = vld [vmem:[#allocation13 + $0xa8] sm:$0xff] }
 0x39a   : > { %v2225_v38 = vpop.permute.xlu1 %2224  ;;  %v2508_v49 = vadd.f32 %v2476_v24, %v2348_v21  ;;  %v2509_v26 = vadd.f32 %v2477_v33, %v2349_v14  ;;  %v6488_v14 = vld [vmem:[#allocation11 + $0xb0] sm:$0xff]  ;;  %7974 = vst [vmem:[#allocation99_spill] sm:$0xff] %v6490_v52  ;;  %7975 = vst [vmem:[#allocation100_spill] sm:$0xff] %v6500_v32  ;;  %v6502_v24 = vld [vmem:[#allocation10 + $0xa0] sm:$0xff] }
 0x39b   : > { %v2383_v54 = vpop.permute.xlu0 %2382  ;;  %7973 = vst [vmem:[#allocation98_spill] sm:$0xff] %v6488_v14  ;;  %v6504_v33 = vld [vmem:[#allocation10 + $0xa8] sm:$0xff] }
 0x39c   : > { %1876 = vrot.lane.b32.xlu1 %v7969_v48, %s4980_s9  ;;  %v6470_v59 = vpack.c.bf16 %v2508_v49, %v2506_v30  ;;  %v6472_v51 = vpack.c.bf16 %v2509_v26, %v2507_v28  ;;  %v6506_v26 = vld [vmem:[#allocation10 + $0xb0] sm:$0xff]  ;;  %v2191_v62 = vmul.f32 %v6504_v33, %v6028_v42 }
 0x39d   : > { %2065 = vrot.lane.b32.xlu0 %v7949_v37, %s4981_s24 }
 0x39e   : > { %v2385_v12 = vpop.permute.xlu1 %2384 }
 0x39f   : > { %v2255_v11 = vpop.permute.xlu0 %2254 }
 0x3a0   : > { %v2276_v21 = vsel %vm1912_vm0, %v2223_v36, %v2255_v11  ;;  %v2292_v1 = vsel %vm1912_vm0, %v2255_v11, %v2223_v36  ;;  %1908 = vrot.lane.b32.xlu1 %v7972_v46, %s4980_s9 }
 0x3a1   : > { %2037 = vrot.lane.b32.xlu0 %v7952_v3, %s4981_s24  ;;  %v2318_v30 = vmul.f32 %v2276_v21, %v6476_v5  ;;  %v2319_v44 = vmul.f32 %v2292_v1, %v6478_v22  ;;  %v2190_v3 = vmul.f32 %v6502_v24, %v6000_v40 }
 0x3a2   : > { %v2257_v49 = vpop.permute.xlu1 %2256 }
 0x3a3   : > { %v2277_v28 = vsel %vm1912_vm0, %v2225_v38, %v2257_v49  ;;  %v2293_v36 = vsel %vm1912_vm0, %v2257_v49, %v2225_v38  ;;  %v2415_v43 = vpop.permute.xlu0 %2414  ;;  %v6516_v49 = vld [vmem:[#allocation10 + $0xb8] sm:$0xff]  ;;  %v2351_v42 = vadd.f32 %v2319_v44, %v2191_v62 }
 0x3a4   : > { %v2320_v11 = vmul.f32 %v2277_v28, %v6488_v14  ;;  %v2321_v21 = vmul.f32 %v2293_v36, %v6490_v52  ;;  %v2436_v1 = vsel %vm2073_vm1, %v2383_v54, %v2415_v43  ;;  %v2452_v38 = vsel %vm2073_vm1, %v2415_v43, %v2383_v54  ;;  %2035 = vrot.lane.b32.xlu1 %v7959_v7, %s4981_s24  ;;  %v6524_v28 = vld [vmem:[#allocation13 + $0xb0] sm:$0xff]  ;;  %v6526_v36 = vld [vmem:[#allocation13 + $0xb8] sm:$0xff] }
 0x3a5   : > { %2069 = vrot.lane.b32.xlu0 %v7963_v27, %s4981_s24  ;;  %7976 = vst [vmem:[#allocation101_spill] sm:$0xff] %v6524_v28  ;;  %7977 = vst [vmem:[#allocation102_spill] sm:$0xff] %v6526_v36  ;;  %v2192_v54 = vmul.f32 %v6506_v26, %v6062_v39  ;;  %v2193_v43 = vmul.f32 %v6516_v49, %v6082_v23  ;;  %v2478_v7 = vmul.f32 %v2452_v38, %v6498_v6 }
 0x3a6   : > { %v2479_v40 = vmul.f32 %v2436_v1, %v6500_v32  ;;  %v2417_v45 = vpop.permute.xlu1 %2416  ;;  %v2350_v52 = vadd.f32 %v2318_v30, %v2190_v3 }
 0x3a7   : > { %v2437_v27 = vsel %vm2073_vm1, %v2385_v12, %v2417_v45  ;;  %v2453_v14 = vsel %vm2073_vm1, %v2417_v45, %v2385_v12  ;;  %v2227_v22 = vpop.permute.xlu0 %2226  ;;  %v2352_v5 = vadd.f32 %v2320_v11, %v2192_v54  ;;  %v2353_v37 = vadd.f32 %v2321_v21, %v2193_v43  ;;  %v6548_v21 = vld [vmem:[#allocation11 + $0xc0] sm:$0xff] }
 0x3a8   : > { %v2480_v39 = vmul.f32 %v2453_v14, %v6524_v28  ;;  %v2481_v23 = vmul.f32 %v2437_v27, %v6526_v36  ;;  %2067 = vrot.lane.b32.xlu1 %v7968_v63, %s4981_s24  ;;  %v2510_v38 = vadd.f32 %v2478_v7, %v2350_v52  ;;  %v2511_v62 = vadd.f32 %v2479_v40, %v2351_v42  ;;  %v6550_v27 = vld [vmem:[#allocation11 + $0xc8] sm:$0xff]  ;;  %v6560_v52 = vld [vmem:[#allocation11 + $0xd8] sm:$0xff]  ;;  %v6590_v63 = vld [vmem:[#allocation13 + $0xd0] sm:$0xff] }
 0x3a9   : > { %7978 = vst [vmem:[#allocation103_spill] sm:$0xff] %v6548_v21  ;;  %7979 = vst [vmem:[#allocation104_spill] sm:$0xff] %v6550_v27 }
 0x3aa   : > { %v2229_v1 = vpop.permute.xlu1 %2228  ;;  %v2512_v3 = vadd.f32 %v2480_v39, %v2352_v5  ;;  %v2513_v30 = vadd.f32 %v2481_v23, %v2353_v37  ;;  %v6558_v5 = vld [vmem:[#allocation11 + $0xd0] sm:$0xff]  ;;  %7981 = vst [vmem:[#allocation106_spill] sm:$0xff] %v6560_v52  ;;  %v6568_v23 = vld [vmem:[#allocation13 + $0xc0] sm:$0xff]  ;;  %7986 = vst [vmem:[#allocation111_spill] sm:$0xff] %v6590_v63 }
 0x3ab   : > { %v2387_v44 = vpop.permute.xlu0 %2386  ;;  %7980 = vst [vmem:[#allocation105_spill] sm:$0xff] %v6558_v5  ;;  %7982 = vst [vmem:[#allocation107_spill] sm:$0xff] %v6568_v23 }
 0x3ac   : > { %2039 = vrot.lane.b32.xlu1 %v7969_v48, %s4981_s24  ;;  %v6544_v45 = vpack.c.bf16 %v2512_v3, %v2510_v38  ;;  %v6546_v12 = vpack.c.bf16 %v2513_v30, %v2511_v62  ;;  %v6572_v3 = vld [vmem:[#allocation10 + $0xc0] sm:$0xff]  ;;  %v6574_v62 = vld [vmem:[#allocation10 + $0xc8] sm:$0xff]  ;;  %v6576_v30 = vld [vmem:[#allocation10 + $0xd0] sm:$0xff] }
 0x3ad   : > { %7984 = vst [vmem:[#allocation109_spill] sm:$0xff] %v6576_v30  ;;  %v2195_v48 = vmul.f32 %v6574_v62, %v6098_v58 }
 0x3ae   : > { %v2389_v11 = vpop.permute.xlu1 %2388 }
 0x3af   : > { %v2259_v14 = vpop.permute.xlu0 %2258 }
 0x3b0   : > { %v2278_v7 = vsel %vm1912_vm0, %v2227_v22, %v2259_v14  ;;  %v2294_v37 = vsel %vm1912_vm0, %v2259_v14, %v2227_v22  ;;  %2071 = vrot.lane.b32.xlu1 %v7972_v46, %s4981_s24  ;;  %v6570_v22 = vld [vmem:[#allocation13 + $0xc8] sm:$0xff]  ;;  %v2194_v46 = vmul.f32 %v6572_v3, %v6092_v35 }
 0x3b1   : > { %v2322_v43 = vmul.f32 %v2278_v7, %v6548_v21  ;;  %v2323_v40 = vmul.f32 %v2294_v37, %v6550_v27  ;;  %7983 = vst [vmem:[#allocation108_spill] sm:$0xff] %v6570_v22  ;;  %v6592_v27 = vld [vmem:[#allocation13 + $0xd8] sm:$0xff] }
 0x3b2   : > { %v2261_v54 = vpop.permute.xlu1 %2260  ;;  %7987 = vst [vmem:[#allocation112_spill] sm:$0xff] %v6592_v27 }
 0x3b3   : > { %v2279_v42 = vsel %vm1912_vm0, %v2229_v1, %v2261_v54  ;;  %v2295_v39 = vsel %vm1912_vm0, %v2261_v54, %v2229_v1  ;;  %v2419_v38 = vpop.permute.xlu0 %2418  ;;  %v6584_v54 = vld [vmem:[#allocation10 + $0xd8] sm:$0xff]  ;;  %v2355_v35 = vadd.f32 %v2323_v40, %v2195_v48 }
 0x3b4   : > { %v2324_v14 = vmul.f32 %v2279_v42, %v6558_v5  ;;  %v2325_v7 = vmul.f32 %v2295_v39, %v6560_v52  ;;  %v2438_v37 = vsel %vm2073_vm1, %v2387_v44, %v2419_v38  ;;  %v2454_v1 = vsel %vm2073_vm1, %v2419_v38, %v2387_v44  ;;  %7985 = vst [vmem:[#allocation110_spill] sm:$0xff] %v6584_v54 }
 0x3b5   : > { %v2196_v42 = vmul.f32 %v6576_v30, %v6104_v56  ;;  %v2197_v39 = vmul.f32 %v6584_v54, %v6116_v55  ;;  %v2482_v44 = vmul.f32 %v2454_v1, %v6568_v23  ;;  %v2483_v38 = vmul.f32 %v2438_v37, %v6570_v22 }
 0x3b6   : > { %v2421_v52 = vpop.permute.xlu1 %2420  ;;  %v2354_v5 = vadd.f32 %v2322_v43, %v2194_v46 }
 0x3b7   : > { %v2439_v58 = vsel %vm2073_vm1, %v2389_v11, %v2421_v52  ;;  %v2455_v21 = vsel %vm2073_vm1, %v2421_v52, %v2389_v11  ;;  %v2231_v36 = vpop.permute.xlu0 %2230  ;;  %v2356_v28 = vadd.f32 %v2324_v14, %v2196_v42  ;;  %v2357_v32 = vadd.f32 %v2325_v7, %v2197_v39  ;;  %v6610_v52 = vld [vmem:[#allocation11 + $0xe0] sm:$0xff]  ;;  %v6612_v14 = vld [vmem:[#allocation11 + $0xe8] sm:$0xff] }
 0x3b8   : > { %v2484_v56 = vmul.f32 %v2455_v21, %v6590_v63  ;;  %v2485_v55 = vmul.f32 %v2439_v58, %v6592_v27  ;;  %v2514_v1 = vadd.f32 %v2482_v44, %v2354_v5  ;;  %v2515_v37 = vadd.f32 %v2483_v38, %v2355_v35  ;;  %7988 = vst [vmem:[#allocation113_spill] sm:$0xff] %v6610_v52  ;;  %v6626_v39 = vld [vmem:[#allocation13 + $0xe0] sm:$0xff]  ;;  %v6628_v44 = vld [vmem:[#allocation13 + $0xe8] sm:$0xff] }
 0x3b9   : > { %7989 = vst [vmem:[#allocation114_spill] sm:$0xff] %v6612_v14  ;;  %7992 = vst [vmem:[#allocation117_spill] sm:$0xff] %v6626_v39 }
 0x3ba   : > { %v2263_v54 = vpop.permute.xlu1 %2262  ;;  %v2516_v23 = vadd.f32 %v2484_v56, %v2356_v28  ;;  %v2517_v22 = vadd.f32 %v2485_v55, %v2357_v32  ;;  %v6620_v32 = vld [vmem:[#allocation11 + $0xf0] sm:$0xff]  ;;  %7993 = vst [vmem:[#allocation118_spill] sm:$0xff] %v6628_v44  ;;  %v6640_v56 = vld [vmem:[#allocation10 + $0xe0] sm:$0xff]  ;;  %v6642_v55 = vld [vmem:[#allocation10 + $0xe8] sm:$0xff] }
 0x3bb   : > { %v2391_v46 = vpop.permute.xlu0 %2390  ;;  %v2280_v21 = vsel %vm1912_vm0, %v2231_v36, %v2263_v54  ;;  %v2296_v28 = vsel %vm1912_vm0, %v2263_v54, %v2231_v36  ;;  %7990 = vst [vmem:[#allocation115_spill] sm:$0xff] %v6620_v32  ;;  %7994 = vst [vmem:[#allocation119_spill] sm:$0xff] %v6640_v56 }
 0x3bc   : > { %v6606_v48 = vpack.c.bf16 %v2516_v23, %v2514_v1  ;;  %v6608_v43 = vpack.c.bf16 %v2517_v22, %v2515_v37  ;;  %v6622_v23 = vld [vmem:[#allocation11 + $0xf8] sm:$0xff]  ;;  %v2326_v22 = vmul.f32 %v2280_v21, %v6610_v52  ;;  %v2327_v7 = vmul.f32 %v2296_v28, %v6612_v14  ;;  %7995 = vst [vmem:[#allocation120_spill] sm:$0xff] %v6642_v55  ;;  %v6644_v1 = vld [vmem:[#allocation10 + $0xf0] sm:$0xff] }
 0x3bd   : > { %7991 = vst [vmem:[#allocation116_spill] sm:$0xff] %v6622_v23  ;;  %7996 = vst [vmem:[#allocation121_spill] sm:$0xff] %v6644_v1  ;;  %v6648_v28 = vld [vmem:[#allocation10 + $0xf8] sm:$0xff]  ;;  %v2200_v14 = vmul.f32 %v6644_v1, %v6140_v53 }
 0x3be   : > { %v2233_v40 = vpop.permute.xlu1 %2232  ;;  %7997 = vst [vmem:[#allocation122_spill] sm:$0xff] %v6648_v28 }
 0x3bf   : > { %v2423_v30 = vpop.permute.xlu0 %2422 }
 0x3c0   : > { %v2440_v38 = vsel %vm2073_vm1, %v2391_v46, %v2423_v30  ;;  %v2456_v36 = vsel %vm2073_vm1, %v2423_v30, %v2391_v46  ;;  %v2198_v30 = vmul.f32 %v6640_v56, %v6126_v31  ;;  %v2199_v46 = vmul.f32 %v6642_v55, %v6134_v61 }
 0x3c2   : > { %v2393_v11 = vpop.permute.xlu1 %2392  ;;  %v2358_v52 = vadd.f32 %v2326_v22, %v2198_v30  ;;  %v2359_v31 = vadd.f32 %v2327_v7, %v2199_v46 }
 0x3c3   : > { %v6618_v5 = vpop.permute.xlu0 %1858 }
 0x3c6   : > { %v2265_v42 = vpop.permute.xlu1 %2264 }
 0x3c7   : > { %v2281_v54 = vsel %vm1912_vm0, %v2233_v40, %v2265_v42  ;;  %v2297_v35 = vsel %vm1912_vm0, %v2265_v42, %v2233_v40  ;;  %v6638_v58 = vpop.permute.xlu0 %1890  ;;  %v6654_v40 = vld [vmem:[#allocation13 + $0xf0] sm:$0xff]  ;;  %v6656_v42 = vld [vmem:[#allocation13 + $0xf8] sm:$0xff] }
 0x3c8   : > { %v2328_v37 = vmul.f32 %v2281_v54, %v6620_v32  ;;  %v2329_v21 = vmul.f32 %v2297_v35, %v6622_v23  ;;  %7998 = vst [vmem:[#allocation123_spill] sm:$0xff] %v6654_v40  ;;  %7999 = vst [vmem:[#allocation124_spill] sm:$0xff] %v6656_v42  ;;  %v2201_v54 = vmul.f32 %v6648_v28, %v6158_v25 }
 0x3c9   : > { %v2486_v35 = vmul.f32 %v2456_v36, %v6626_v39  ;;  %v2487_v23 = vmul.f32 %v2440_v38, %v6628_v44 }
 0x3ca   : > { %v2425_v32 = vpop.permute.xlu1 %2424  ;;  %v2360_v27 = vadd.f32 %v2328_v37, %v2200_v14  ;;  %v2361_v53 = vadd.f32 %v2329_v21, %v2201_v54  ;;  %v1709_v21 = vpop.f32.mrf.mxu0 }
 0x3cb   : > { %v2441_v61 = vsel %vm2073_vm1, %v2393_v11, %v2425_v32  ;;  %v2457_v55 = vsel %vm2073_vm1, %v2425_v32, %v2393_v11  ;;  %v6668_v56 = vpop.permute.xlu0 %2017  ;;  %v2518_v38 = vadd.f32 %v2486_v35, %v2358_v52  ;;  %v2519_v22 = vadd.f32 %v2487_v23, %v2359_v31 }
 0x3cc   : > { %v2488_v1 = vmul.f32 %v2457_v55, %v6654_v40  ;;  %v2489_v25 = vmul.f32 %v2441_v61, %v6656_v42  ;;  %v6719_v31 = vpop.f32.mrf.mxu0  ;;  %v6732_v61 = vmul.f32 %v6282_v41, %v5735_v4  ;;  %v8002_v4 = vld [vmem:[#allocation29_spill] sm:$0xff] }
 0x3cd   : > { %8000 = vst [vmem:[#allocation125_spill] sm:$0xff] %v6719_v31  ;;  %v8018_v31 = vld [vmem:[#allocation38_spill] sm:$0xff] }
 0x3ce   : > { %v6672_v36 = vpop.permute.xlu1 %1860  ;;  %v2520_v44 = vadd.f32 %v2488_v1, %v2360_v27  ;;  %v2521_v7 = vadd.f32 %v2489_v25, %v2361_v53  ;;  %v6742_v53 = vmul.f32 %v6354_v13, %v5747_v34  ;;  %v8005_v25 = vld [vmem:[#allocation95_spill] sm:$0xff]  ;;  %v8008_v34 = vld [vmem:[#allocation96_spill] sm:$0xff]  ;;  %v1713_v40 = vpop.f32.mrf.mxu0 }
 0x3cf   : > { %v6674_v30 = vpop.permute.xlu0 %2049 }
 0x3d0   : > { %v2545_v46 = vpack.c.bf16 %v2520_v44, %v2518_v38  ;;  %v2553_v39 = vpack.c.bf16 %v2521_v7, %v2519_v22  ;;  %v8007_v22 = vld [vmem:[#allocation33_spill] sm:$0xff]  ;;  %v8010_v7 = vld [vmem:[#allocation34_spill] sm:$0xff] }
 0x3d1   : > { %v6762_v13 = vmul.f32 %v8008_v34, %v8007_v22  ;;  %v8020_v22 = vld [vmem:[#allocation41_spill] sm:$0xff] }
 0x3d2   : > { %v6676_v28 = vpop.permute.xlu1 %1892  ;;  %4076 = vmatprep.subr.bf16.mxu1 %v2545_v46  ;;  %4108 = vmatprep.subr.bf16.mxu0 %v2553_v39  ;;  %v1836_v34 = vmul.f32 %v6506_v26, %v8020_v22  ;;  %v8029_v26 = vld [vmem:[#allocation49_spill] sm:$0xff]  ;;  %v8031_v22 = vld [vmem:[#allocation74_spill] sm:$0xff] }
 0x3d3   : > { %v6678_v11 = vpop.permute.xlu0 %2021  ;;  %4077 = vmatpush3.bf16.xpose.msra.mxu1 %v2545_v46  ;;  %4109 = vmatpush3.bf16.xpose.msra.mxu0 %v2553_v39  ;;  %8009 = vst [vmem:[#allocation29_spill] sm:$0xff] %v6762_v13  ;;  %v8042_v13 = vld [vmem:[#allocation98_spill] sm:$0xff] }
 0x3d4   : > { %4078 = vmatprep.subr.bf16.mxu1 %v6606_v48  ;;  %4110 = vmatprep.subr.bf16.mxu0 %v6608_v43 }
 0x3d6   : > { %v6682_v52 = vpop.permute.xlu1 %2019 }
 0x3d7   : > { %v6684_v27 = vpop.permute.xlu0 %2053 }
 0x3da   : > { %v6686_v14 = vpop.permute.xlu1 %2051 }
 0x3db   : > { %v6688_v32 = vpop.permute.xlu0 %1862  ;;  %4079 = vmatpush3.bf16.xpose.msra.mxu1 %v6606_v48  ;;  %4111 = vmatpush3.bf16.xpose.msra.mxu0 %v6608_v43 }
 0x3dc   : > { %4080 = vmatprep.subr.bf16.mxu1 %v6544_v45  ;;  %4112 = vmatprep.subr.bf16.mxu0 %v6546_v12 }
 0x3de   : > { %v6694_v23 = vpop.permute.xlu1 %2023 }
 0x3df   : > { %v6696_v39 = vpop.permute.xlu0 %1894 }
 0x3e2   : > { %v6698_v44 = vpop.permute.xlu1 %2055 }
 0x3e3   : > { %v1867_v55 = vpop.permute.xlu0 %1866  ;;  %4081 = vmatpush3.bf16.xpose.msra.mxu1 %v6544_v45  ;;  %4113 = vmatpush3.bf16.xpose.msra.mxu0 %v6546_v12 }
 0x3e4   : > { %4082 = vmatprep.subr.bf16.mxu1 %v6470_v59  ;;  %4114 = vmatprep.subr.bf16.mxu0 %v6472_v51 }
 0x3e6   : > { %v6704_v48 = vpop.permute.xlu1 %1864 }
 0x3e7   : > { %v1899_v43 = vpop.permute.xlu0 %1898 }
 0x3ea   : > { %v6706_v1 = vpop.permute.xlu1 %1896 }
 0x3eb   : > { %v6708_v37 = vpop.permute.xlu0 %2025  ;;  %4083 = vmatpush3.bf16.xpose.msra.mxu1 %v6470_v59  ;;  %4115 = vmatpush3.bf16.xpose.msra.mxu0 %v6472_v51  ;;  %v6724_v59 = vmul.f32 %v6278_v20, %v5727_v2  ;;  %v6728_v51 = vmul.f32 %v6280_v18, %v5733_v50  ;;  %v6746_v2 = vmul.f32 %v6356_v16, %v5755_v8  ;;  %v8001_v50 = vld [vmem:[#allocation90_spill] sm:$0xff]  ;;  %v8003_v18 = vld [vmem:[#allocation91_spill] sm:$0xff]  ;;  %v8012_v16 = vld [vmem:[#allocation32_spill] sm:$0xff] }
 0x3ec   : > { %4084 = vmatprep.subr.bf16.mxu1 %v6394_v10  ;;  %4116 = vmatprep.subr.bf16.mxu0 %v6396_v17  ;;  %v6750_v20 = vmul.f32 %v8001_v50, %v5757_v9  ;;  %v6754_v41 = vmul.f32 %v8003_v18, %v8002_v4  ;;  %v6766_v8 = vmul.f32 %v6430_v47, %v8010_v7  ;;  %v8013_v9 = vld [vmem:[#allocation35_spill] sm:$0xff]  ;;  %v8015_v50 = vld [vmem:[#allocation36_spill] sm:$0xff]  ;;  %v8016_v4 = vld [vmem:[#allocation97_spill] sm:$0xff] }
 0x3ed   : > { %v6770_v46 = vpack.c.bf16 %v8013_v9, %v8012_v16  ;;  %v6774_v18 = vmul.f32 %v8016_v4, %v8015_v50  ;;  %v8021_v47 = vld [vmem:[#allocation39_spill] sm:$0xff]  ;;  %v8022_v7 = vld [vmem:[#allocation42_spill] sm:$0xff]  ;;  %v6790_v50 = vmul.f32 %v6572_v3, %v7948_v60 }
 0x3ee   : > { %v1869_v45 = vpop.permute.xlu1 %1868  ;;  %8011 = vst [vmem:[#allocation91_spill] sm:$0xff] %v6766_v8  ;;  %v6784_v63 = vpack.c.bf16 %v8022_v7, %v8021_v47  ;;  %v8024_v16 = vld [vmem:[#allocation43_spill] sm:$0xff]  ;;  %v8032_v47 = vld [vmem:[#allocation72_spill] sm:$0xff] }
 0x3ef   : > { %v6714_v12 = vpop.permute.xlu0 %2057  ;;  %8017 = vst [vmem:[#allocation95_spill] sm:$0xff] %v6774_v18  ;;  %v1837_v9 = vmul.f32 %v6516_v49, %v8024_v16  ;;  %8025 = vst [vmem:[#allocation96_spill] sm:$0xff] %v6790_v50  ;;  %v8026_v4 = vld [vmem:[#allocation47_spill] sm:$0xff]  ;;  %v1917_v7 = vsel %vm1912_vm0, %v8032_v47, %v8031_v22  ;;  %v1933_v60 = vsel %vm1912_vm0, %v8031_v22, %v8032_v47  ;;  %v8036_v22 = vld [vmem:[#allocation73_spill] sm:$0xff] }
 0x3f0   : > { %8023 = vst [vmem:[#allocation33_spill] sm:$0xff] %v6784_v63  ;;  %v1923_v49 = vsel %vm1912_vm0, %v1867_v55, %v1899_v43  ;;  %v1939_v16 = vsel %vm1912_vm0, %v1899_v43, %v1867_v55  ;;  %v8037_v55 = vld [vmem:[#allocation79_spill] sm:$0xff]  ;;  %v8038_v43 = vld [vmem:[#allocation80_spill] sm:$0xff] }
 0x3f2   : > { %v1901_v54 = vpop.permute.xlu1 %1900 }
 0x3f3   : > { %v2030_v35 = vpop.permute.xlu0 %2029  ;;  %4085 = vmatpush3.bf16.xpose.msra.mxu1 %v6394_v10  ;;  %4117 = vmatpush3.bf16.xpose.msra.mxu0 %v6396_v17  ;;  %v6736_v10 = vmul.f32 %v6288_v15, %v5743_v57  ;;  %v8004_v15 = vld [vmem:[#allocation31_spill] sm:$0xff] }
 0x3f4   : > { %4086 = vmatprep.subr.bf16.mxu1 %v6318_v29  ;;  %4118 = vmatprep.subr.bf16.mxu0 %v6320_v19  ;;  %v6758_v38 = vmul.f32 %v8005_v25, %v8004_v15  ;;  %8014 = vst [vmem:[#allocation31_spill] sm:$0xff] %v6770_v46  ;;  %v1834_v15 = vmul.f32 %v6502_v24, %v8018_v31  ;;  %v8019_v25 = vld [vmem:[#allocation40_spill] sm:$0xff]  ;;  %v8028_v31 = vld [vmem:[#allocation46_spill] sm:$0xff]  ;;  %v8039_v46 = vld [vmem:[#allocation81_spill] sm:$0xff] }
 0x3f5   : > { %v1835_v42 = vmul.f32 %v6504_v33, %v8019_v25  ;;  %v6794_v24 = vmul.f32 %v6574_v62, %v8026_v4  ;;  %v6800_v25 = vpack.c.bf16 %v8029_v26, %v8028_v31  ;;  %v6815_v62 = vpack.c.bf16 %v1713_v40, %v1709_v21  ;;  %v8034_v31 = vld [vmem:[#allocation78_spill] sm:$0xff]  ;;  %v8035_v26 = vld [vmem:[#allocation75_spill] sm:$0xff] }
 0x3f6   : > { %v6738_v17 = vpop.permute.xlu1 %2027  ;;  %8006 = vst [vmem:[#allocation90_spill] sm:$0xff] %v6758_v38  ;;  %v1924_v4 = vsel %vm1912_vm0, %v1869_v45, %v1901_v54  ;;  %v1918_v47 = vsel %vm1912_vm0, %v8036_v22, %v8035_v26  ;;  %v1919_v40 = vsel %vm1912_vm0, %v6618_v5, %v6638_v58  ;;  %v1953_v21 = vmul.f32 %v1917_v7, %v8038_v43  ;;  %v8044_v43 = vld [vmem:[#allocation83_spill] sm:$0xff] }
 0x3f7   : > { %v2062_v57 = vpop.permute.xlu0 %2061  ;;  %8027 = vst [vmem:[#allocation34_spill] sm:$0xff] %v6794_v24  ;;  %8030 = vst [vmem:[#allocation32_spill] sm:$0xff] %v6800_v25  ;;  %v1954_v63 = vmul.f32 %v1933_v60, %v8039_v46  ;;  %v1935_v24 = vsel %vm1912_vm0, %v6638_v58, %v6618_v5  ;;  %v8041_v25 = vld [vmem:[#allocation67_spill] sm:$0xff]  ;;  %v8043_v46 = vld [vmem:[#allocation82_spill] sm:$0xff] }
 0x3f8   : > { %v1966_v18 = vmul.f32 %v1939_v16, %v8041_v25  ;;  %v1955_v60 = vmul.f32 %v1918_v47, %v8043_v46  ;;  %v8045_v5 = vld [vmem:[#allocation58_spill] sm:$0xff]  ;;  %v8047_v38 = vld [vmem:[#allocation59_spill] sm:$0xff] }
 0x3f9   : > { %v1957_v58 = vmul.f32 %v1919_v40, %v8045_v5  ;;  %v1958_v25 = vmul.f32 %v1935_v24, %v8047_v38  ;;  %v2095_v38 = vsel %vm2073_vm1, %v6686_v14, %v6682_v52  ;;  %v8049_v5 = vld [vmem:[#allocation101_spill] sm:$0xff] }
 0x3fa   : > { %v6796_v33 = vpop.permute.xlu1 %2059  ;;  %v1998_v40 = vadd.f32 %v1966_v18, %v1835_v42  ;;  %v8052_v42 = vld [vmem:[#allocation84_spill] sm:$0xff] }
 0x3fb   : > { %v6812_v3 = vpop.permute.xlu0 %1870  ;;  %4087 = vmatpush3.bf16.xpose.msra.mxu1 %v6318_v29  ;;  %4119 = vmatpush3.bf16.xpose.msra.mxu0 %v6320_v19  ;;  %v1934_v29 = vsel %vm1912_vm0, %v8035_v26, %v8036_v22  ;;  %v1940_v19 = vsel %vm1912_vm0, %v1901_v54, %v1869_v45  ;;  %v8040_v26 = vld [vmem:[#allocation66_spill] sm:$0xff]  ;;  %v2084_v45 = vsel %vm2073_vm1, %v2030_v35, %v2062_v57 }
 0x3fc   : > { %8033 = vst [vmem:[#allocation35_spill] sm:$0xff] %v6812_v3  ;;  %4088 = vmatprep.subr.bf16.mxu1 %v8034_v31  ;;  %4120 = vmatprep.subr.bf16.mxu0 %v8037_v55  ;;  %v1965_v22 = vmul.f32 %v1923_v49, %v8040_v26  ;;  %v1967_v3 = vmul.f32 %v1924_v4, %v8042_v13  ;;  %v8046_v49 = vld [vmem:[#allocation99_spill] sm:$0xff]  ;;  %v8048_v4 = vld [vmem:[#allocation100_spill] sm:$0xff] }
 0x3fd   : > { %v2100_v54 = vsel %vm2073_vm1, %v2062_v57, %v2030_v35  ;;  %v1956_v8 = vmul.f32 %v1934_v29, %v8044_v43  ;;  %v1968_v26 = vmul.f32 %v1940_v19, %v8046_v49  ;;  %v2078_v13 = vsel %vm2073_vm1, %v6668_v56, %v6674_v30 }
 0x3fe   : > { %v2032_v50 = vpop.permute.xlu1 %2031  ;;  %v2094_v35 = vsel %vm2073_vm1, %v6674_v30, %v6668_v56  ;;  %v1920_v57 = vsel %vm1912_vm0, %v6672_v36, %v6676_v28  ;;  %v1997_v24 = vadd.f32 %v1965_v22, %v1834_v15  ;;  %v2126_v16 = vmul.f32 %v2100_v54, %v6498_v6  ;;  %v8050_v22 = vld [vmem:[#allocation102_spill] sm:$0xff] }
 0x3ff   : > { %v6851_v7 = vpop.permute.xlu0 %1902  ;;  %v2127_v47 = vmul.f32 %v2084_v45, %v8048_v4  ;;  %v1999_v19 = vadd.f32 %v1967_v3, %v1836_v34  ;;  %v2000_v43 = vadd.f32 %v1968_v26, %v1837_v9  ;;  %v8051_v45 = vld [vmem:[#allocation76_spill] sm:$0xff]  ;;  %v2114_v18 = vmul.f32 %v2094_v35, %v8052_v42  ;;  %v8053_v34 = vld [vmem:[#allocation85_spill] sm:$0xff]  ;;  %v8054_v54 = vld [vmem:[#allocation86_spill] sm:$0xff] }
 0x400   : > { %v2115_v3 = vmul.f32 %v2078_v13, %v8053_v34  ;;  %v1959_v49 = vmul.f32 %v1920_v57, %v8054_v54  ;;  %v8055_v9 = vld [vmem:[#allocation77_spill] sm:$0xff]  ;;  %v1985_v13 = vadd.f32 %v1953_v21, %v6724_v59  ;;  %v1986_v57 = vadd.f32 %v1954_v63, %v6728_v51 }
 0x401   : > { %v6897_v26 = vadd.f32 %v2127_v47, %v1998_v40  ;;  %v1987_v47 = vadd.f32 %v1955_v60, %v6732_v61  ;;  %v6921_v63 = vadd.f32 %v1957_v58, %v6742_v53  ;;  %v6924_v51 = vadd.f32 %v1958_v25, %v6746_v2 }
 0x402   : > { %v2064_v29 = vpop.permute.xlu1 %2063  ;;  %v2146_v21 = vadd.f32 %v2114_v18, %v1985_v13  ;;  %v1991_v61 = vadd.f32 %v1959_v49, %v6750_v20  ;;  %v2147_v60 = vadd.f32 %v2115_v3, %v1986_v57  ;;  %v2080_v53 = vsel %vm2073_vm1, %v6678_v11, %v6684_v27  ;;  %v8063_v18 = vld [vmem:[#allocation60_spill] sm:$0xff]  ;;  %v8065_v49 = vld [vmem:[#allocation89_spill] sm:$0xff] }
 0x403   : > { %v2085_v56 = vsel %vm2073_vm1, %v2032_v50, %v2064_v29  ;;  %v2101_v30 = vsel %vm2073_vm1, %v2064_v29, %v2032_v50  ;;  %v6880_v46 = vpop.permute.xlu0 %1874  ;;  %4089 = vmatpush3.bf16.xpose.msra.mxu1 %v8034_v31  ;;  %4121 = vmatpush3.bf16.xpose.msra.mxu0 %v8037_v55  ;;  %v2079_v50 = vsel %vm2073_vm1, %v6682_v52, %v6686_v14  ;;  %v8056_v14 = vld [vmem:[#allocation56_spill] sm:$0xff] }
 0x404   : > { %v2128_v15 = vmul.f32 %v2101_v30, %v8049_v5  ;;  %v2129_v6 = vmul.f32 %v2085_v56, %v8050_v22  ;;  %4090 = vmatprep.subr.bf16.mxu1 %v8051_v45  ;;  %4122 = vmatprep.subr.bf16.mxu0 %v8055_v9  ;;  %v6895_v31 = vadd.f32 %v2126_v16, %v1997_v24  ;;  %v8061_v22 = vld [vmem:[#allocation45_spill] sm:$0xff]  ;;  %v8064_v3 = vld [vmem:[#allocation92_spill] sm:$0xff] }
 0x405   : > { %v1936_v52 = vsel %vm1912_vm0, %v6676_v28, %v6672_v36  ;;  %v2116_v24 = vmul.f32 %v2095_v38, %v8056_v14  ;;  %v1988_v29 = vadd.f32 %v1956_v8, %v6736_v10  ;;  %v8057_v28 = vld [vmem:[#allocation57_spill] sm:$0xff]  ;;  %v8058_v38 = vld [vmem:[#allocation87_spill] sm:$0xff]  ;;  %v1921_v10 = vsel %vm1912_vm0, %v6688_v32, %v6696_v39  ;;  %v8068_v14 = vld [vmem:[#allocation90_spill] sm:$0xff] }
 0x406   : > { %v6899_v55 = vadd.f32 %v2128_v15, %v1999_v19  ;;  %v6901_v4 = vadd.f32 %v2129_v6, %v2000_v43  ;;  %v6903_v35 = vpop.permute.xlu1 %1872  ;;  %v2117_v36 = vmul.f32 %v2079_v50, %v8057_v28  ;;  %v1960_v19 = vmul.f32 %v1936_v52, %v8058_v38  ;;  %v8070_v38 = vld [vmem:[#allocation91_spill] sm:$0xff] }
 0x407   : > { %v6912_v16 = vpop.permute.xlu0 %1906  ;;  %v2096_v2 = vsel %vm2073_vm1, %v6684_v27, %v6678_v11  ;;  %v1922_v20 = vsel %vm1912_vm0, %v6704_v48, %v6706_v1  ;;  %v2148_v25 = vadd.f32 %v2116_v24, %v1987_v47  ;;  %v1937_v56 = vsel %vm1912_vm0, %v6696_v39, %v6688_v32  ;;  %v8059_v27 = vld [vmem:[#allocation62_spill] sm:$0xff]  ;;  %v8069_v47 = vld [vmem:[#allocation65_spill] sm:$0xff] }
 0x408   : > { %v2527_v40 = vpack.c.bf16 %v6899_v55, %v6895_v31  ;;  %v2535_v59 = vpack.c.bf16 %v6901_v4, %v6897_v26  ;;  %v2097_v30 = vsel %vm2073_vm1, %v6698_v44, %v6694_v23  ;;  %v1938_v11 = vsel %vm1912_vm0, %v6706_v1, %v6704_v48  ;;  %v8060_v48 = vld [vmem:[#allocation88_spill] sm:$0xff]  ;;  %v8118_v26 = vld [vmem:[#allocation23_spill] sm:$0xff]  ;;  %v1715_v4 = vpop.f32.mrf.mxu0 }
 0x409   : > { %v1961_v43 = vmul.f32 %v1921_v10, %v8059_v27  ;;  %v2081_v32 = vsel %vm2073_vm1, %v6694_v23, %v6698_v44  ;;  %v2099_v39 = vsel %vm2073_vm1, %v6796_v33, %v6738_v17  ;;  %v2149_v5 = vadd.f32 %v2117_v36, %v1988_v29  ;;  %v8062_v23 = vld [vmem:[#allocation63_spill] sm:$0xff]  ;;  %v8071_v10 = vld [vmem:[#allocation93_spill] sm:$0xff] }
 0x40a   : > { %v1905_v8 = vpop.permute.xlu1 %1904  ;;  %v1992_v15 = vadd.f32 %v1960_v19, %v6754_v41  ;;  %v2118_v1 = vmul.f32 %v2096_v2, %v8060_v48  ;;  %v1963_v6 = vmul.f32 %v1922_v20, %v8061_v22  ;;  %v1962_v44 = vmul.f32 %v1937_v56, %v8062_v23  ;;  %v8072_v2 = vld [vmem:[#allocation35_spill] sm:$0xff]  ;;  %v8073_v56 = vld [vmem:[#allocation70_spill] sm:$0xff]  ;;  %v8080_v48 = vld [vmem:[#allocation69_spill] sm:$0xff] }
 0x40b   : > { %v2034_v58 = vpop.permute.xlu0 %2033  ;;  %4091 = vmatpush3.bf16.xpose.msra.mxu1 %v8051_v45  ;;  %4123 = vmatpush3.bf16.xpose.msra.mxu0 %v8055_v9  ;;  %v2083_v45 = vsel %vm2073_vm1, %v6738_v17, %v6796_v33  ;;  %v2120_v34 = vmul.f32 %v2097_v30, %v8063_v18  ;;  %v1964_v54 = vmul.f32 %v1938_v11, %v8064_v3  ;;  %v8066_v9 = vld [vmem:[#allocation61_spill] sm:$0xff]  ;;  %v8067_v33 = vld [vmem:[#allocation64_spill] sm:$0xff]  ;;  %v8077_v27 = vld [vmem:[#allocation95_spill] sm:$0xff] }
 0x40c   : > { %4140 = vmatprep.subr.bf16.mxu1 %v6815_v62  ;;  %v2098_v41 = vsel %vm2073_vm1, %v6714_v12, %v6708_v37  ;;  %v2119_v50 = vmul.f32 %v2080_v53, %v8065_v49  ;;  %v2121_v13 = vmul.f32 %v2081_v32, %v8066_v9  ;;  %v2082_v17 = vsel %vm2073_vm1, %v6708_v37, %v6714_v12  ;;  %v8074_v30 = vld [vmem:[#allocation68_spill] sm:$0xff]  ;;  %v8078_v32 = vld [vmem:[#allocation94_spill] sm:$0xff]  ;;  %v8082_v18 = vld [vmem:[#allocation103_spill] sm:$0xff] }
 0x40d   : > { %v2124_v57 = vmul.f32 %v2099_v39, %v8067_v33  ;;  %v1993_v24 = vadd.f32 %v1961_v43, %v8068_v14  ;;  %v2125_v29 = vmul.f32 %v2083_v45, %v8069_v47  ;;  %v2524_v28 = vpack.c.bf16 %v2148_v25, %v2146_v21  ;;  %v8076_v21 = vld [vmem:[#allocation29_spill] sm:$0xff] }
 0x40e   : > { %v6976_v42 = vpop.permute.xlu1 %1876  ;;  %v2532_v36 = vpack.c.bf16 %v2149_v5, %v2147_v60  ;;  %v1995_v19 = vadd.f32 %v1963_v6, %v8070_v38  ;;  %v2122_v53 = vmul.f32 %v2098_v41, %v8071_v10  ;;  %v1925_v20 = vsel %vm1912_vm0, %v8072_v2, %v6851_v7  ;;  %v8079_v5 = vld [vmem:[#allocation71_spill] sm:$0xff]  ;;  %v8087_v47 = vld [vmem:[#allocation105_spill] sm:$0xff] }
 0x40f   : > { %v2066_v52 = vpop.permute.xlu0 %2065  ;;  %v1941_v37 = vsel %vm1912_vm0, %v6851_v7, %v8072_v2  ;;  %v8075_v11 = vpack.c.bf16 %v8073_v56, %v8074_v30  ;;  %v1994_v60 = vadd.f32 %v1962_v44, %v8076_v21  ;;  %v2152_v25 = vadd.f32 %v2120_v34, %v1991_v61  ;;  %v8083_v61 = vld [vmem:[#allocation104_spill] sm:$0xff]  ;;  %v8095_v30 = vld [vmem:[#allocation33_spill] sm:$0xff] }
 0x410   : > { %v1996_v43 = vadd.f32 %v1964_v54, %v8077_v27  ;;  %v2123_v39 = vmul.f32 %v2082_v17, %v8078_v32  ;;  %v8081_v22 = vpack.c.bf16 %v8079_v5, %v8080_v48  ;;  %v2153_v6 = vadd.f32 %v2121_v13, %v1992_v15  ;;  %v8084_v54 = vld [vmem:[#allocation48_spill] sm:$0xff]  ;;  %v8085_v15 = vld [vmem:[#allocation109_spill] sm:$0xff] }
 0x411   : > { %v2156_v45 = vadd.f32 %v2124_v57, %v1995_v19  ;;  %v1926_v7 = vsel %vm1912_vm0, %v6903_v35, %v1905_v8  ;;  %v1969_v44 = vmul.f32 %v1925_v20, %v8082_v18  ;;  %v1970_v34 = vmul.f32 %v1941_v37, %v8083_v61  ;;  %v8086_v13 = vld [vmem:[#allocation32_spill] sm:$0xff] }
 0x412   : > { %v1909_v12 = vpop.permute.xlu1 %1908  ;;  %4093 = vmatmul.mubr.bf16.vlgmr.msra.gmra.mxu1 %v8075_v11  ;;  %4125 = vmatmul.mubr.bf16.vlgmr.msra.gmra.mxu0 %v8081_v22  ;;  %v2157_v23 = vadd.f32 %v2125_v29, %v1996_v43  ;;  %v1942_v3 = vsel %vm1912_vm0, %v1905_v8, %v6903_v35  ;;  %v1840_v41 = vmul.f32 %v8085_v15, %v8084_v54  ;;  %v8088_v8 = vld [vmem:[#allocation50_spill] sm:$0xff]  ;;  %v8094_v37 = vld [vmem:[#allocation108_spill] sm:$0xff]  ;;  %v8101_v54 = vld [vmem:[#allocation31_spill] sm:$0xff] }
 0x413   : > { %4096 = vmatprep.mubr.bf16.mxu1 %v2524_v28  ;;  %4128 = vmatprep.mubr.bf16.mxu0 %v2532_v36  ;;  %v2154_v49 = vadd.f32 %v2122_v53, %v1993_v24  ;;  %v2038_v9 = vpop.permute.xlu0 %2037  ;;  %v2150_v33 = vadd.f32 %v2118_v1, %v6921_v63  ;;  %v2151_v57 = vadd.f32 %v2119_v50, %v6924_v51  ;;  %v8089_v28 = vld [vmem:[#allocation110_spill] sm:$0xff]  ;;  %v8091_v53 = vld [vmem:[#allocation96_spill] sm:$0xff] }
 0x414   : > { %4141 = vmatpush3.bf16.msra.mxu1 %v6815_v62  ;;  %v2155_v14 = vadd.f32 %v2123_v39, %v1994_v60  ;;  %v1971_v29 = vmul.f32 %v1926_v7, %v8087_v47  ;;  %v2086_v35 = vsel %vm2073_vm1, %v2034_v58, %v2066_v52  ;;  %v2102_v62 = vsel %vm2073_vm1, %v2066_v52, %v2034_v58  ;;  %v8090_v36 = vld [vmem:[#allocation106_spill] sm:$0xff]  ;;  %v8093_v52 = vld [vmem:[#allocation107_spill] sm:$0xff]  ;;  %v8097_v48 = vld [vmem:[#allocation112_spill] sm:$0xff] }
 0x415   : > { %4142 = vmatprep.subr.bf16.mxu1 %v8086_v13  ;;  %v1841_v24 = vmul.f32 %v8089_v28, %v8088_v8  ;;  %v1972_v38 = vmul.f32 %v1942_v3, %v8090_v36  ;;  %v2525_v19 = vpack.c.bf16 %v2152_v25, %v2150_v33  ;;  %v2533_v10 = vpack.c.bf16 %v2153_v6, %v2151_v57  ;;  %v8092_v1 = vld [vmem:[#allocation34_spill] sm:$0xff]  ;;  %v8096_v39 = vld [vmem:[#allocation111_spill] sm:$0xff]  ;;  %v8106_v47 = vld [vmem:[#allocation116_spill] sm:$0xff] }
 0x416   : > { %v2036_v17 = vpop.permute.xlu1 %2035  ;;  %v2001_v63 = vadd.f32 %v1969_v44, %v8091_v53  ;;  %v2002_v51 = vadd.f32 %v1970_v34, %v8092_v1  ;;  %v2526_v50 = vpack.c.bf16 %v2156_v45, %v2154_v49  ;;  %v2534_v2 = vpack.c.bf16 %v2157_v23, %v2155_v14  ;;  %v8098_v6 = vld [vmem:[#allocation27_spill] sm:$0xff]  ;;  %v8099_v45 = vld [vmem:[#allocation28_spill] sm:$0xff]  ;;  %v8107_v8 = vld [vmem:[#allocation53_spill] sm:$0xff] }
 0x417   : > { %v1927_v58 = vsel %vm1912_vm0, %v6880_v46, %v6912_v16  ;;  %v2130_v20 = vmul.f32 %v2102_v62, %v8093_v52  ;;  %v2131_v56 = vmul.f32 %v2086_v35, %v8094_v37  ;;  %v1943_v21 = vsel %vm1912_vm0, %v6912_v16, %v6880_v46  ;;  %v2070_v32 = vpop.permute.xlu0 %2069  ;;  %v8100_v46 = vld [vmem:[#allocation113_spill] sm:$0xff]  ;;  %v8103_v49 = vld [vmem:[#allocation119_spill] sm:$0xff]  ;;  %v8108_v28 = vld [vmem:[#allocation120_spill] sm:$0xff] }
 0x418   : > { %4143 = vmatpush3.bf16.msra.mxu1 %v8086_v13  ;;  %v2003_v60 = vadd.f32 %v1971_v29, %v1840_v41  ;;  %v2004_v43 = vadd.f32 %v1972_v38, %v1841_v24  ;;  %v2557_v7 = vpack.c.bf16 %v8099_v45, %v8098_v6  ;;  %v1973_v16 = vmul.f32 %v1927_v58, %v8100_v46  ;;  %v8102_v41 = vld [vmem:[#allocation52_spill] sm:$0xff]  ;;  %v8109_v36 = vld [vmem:[#allocation54_spill] sm:$0xff]  ;;  %v8110_v38 = vld [vmem:[#allocation121_spill] sm:$0xff] }
 0x419   : > { %4144 = vmatprep.subr.bf16.mxu1 %v8095_v30  ;;  %v1928_v23 = vsel %vm1912_vm0, %v6976_v42, %v1909_v12  ;;  %v1944_v18 = vsel %vm1912_vm0, %v1909_v12, %v6976_v42  ;;  %v2162_v44 = vadd.f32 %v2130_v20, %v2001_v63  ;;  %v2163_v61 = vadd.f32 %v2131_v56, %v2002_v51  ;;  %v8105_v12 = vld [vmem:[#allocation115_spill] sm:$0xff]  ;;  %v8112_v53 = vld [vmem:[#allocation122_spill] sm:$0xff]  ;;  %v8113_v51 = vld [vmem:[#allocation117_spill] sm:$0xff] }
 0x41a   : > { %v2068_v11 = vpop.permute.xlu1 %2067  ;;  %4097 = vmatmul.mubr.bf16.gmra.mxu1 %v2525_v19  ;;  %4129 = vmatmul.mubr.bf16.gmra.mxu0 %v2533_v10  ;;  %v1842_v13 = vmul.f32 %v8103_v49, %v8102_v41  ;;  %v2088_v57 = vsel %vm2073_vm1, %v2038_v9, %v2070_v32  ;;  %v2104_v42 = vsel %vm2073_vm1, %v2070_v32, %v2038_v9  ;;  %v8111_v10 = vld [vmem:[#allocation55_spill] sm:$0xff] }
 0x41b   : > { %v2087_v25 = vsel %vm2073_vm1, %v2036_v17, %v2068_v11  ;;  %v2103_v27 = vsel %vm2073_vm1, %v2068_v11, %v2036_v17  ;;  %4100 = vmatprep.mubr.bf16.mxu1 %v2526_v50  ;;  %4132 = vmatprep.mubr.bf16.mxu0 %v2534_v2  ;;  %v8104_v17 = vld [vmem:[#allocation114_spill] sm:$0xff]  ;;  %v1975_v14 = vmul.f32 %v1928_v23, %v8105_v12  ;;  %v8115_v11 = vld [vmem:[#allocation123_spill] sm:$0xff] }
 0x41c   : > { %v2132_v5 = vmul.f32 %v2103_v27, %v8096_v39  ;;  %v2133_v22 = vmul.f32 %v2087_v25, %v8097_v48  ;;  %4145 = vmatpush3.bf16.msra.mxu1 %v8095_v30  ;;  %v1974_v33 = vmul.f32 %v1943_v21, %v8104_v17  ;;  %v1976_v29 = vmul.f32 %v1944_v18, %v8106_v47  ;;  %v8114_v50 = vld [vmem:[#allocation118_spill] sm:$0xff] }
 0x41d   : > { %4146 = vmatprep.subr.bf16.mxu1 %v8101_v54  ;;  %v1843_v24 = vmul.f32 %v8108_v28, %v8107_v8  ;;  %v1844_v19 = vmul.f32 %v8110_v38, %v8109_v36  ;;  %v1845_v63 = vmul.f32 %v8112_v53, %v8111_v10  ;;  %v2005_v1 = vadd.f32 %v1973_v16, %v1842_v13 }
 0x41e   : > { %v2164_v34 = vadd.f32 %v2132_v5, %v2003_v60  ;;  %v2165_v3 = vadd.f32 %v2133_v22, %v2004_v43  ;;  %v2040_v15 = vpop.permute.xlu1 %2039  ;;  %v2134_v9 = vmul.f32 %v2104_v42, %v8113_v51  ;;  %v2135_v2 = vmul.f32 %v2088_v57, %v8114_v50  ;;  %v8116_v60 = vld [vmem:[#allocation124_spill] sm:$0xff]  ;;  %v8117_v43 = vld [vmem:[#allocation25_spill] sm:$0xff] }
 0x41f   : > { %v2006_v52 = vadd.f32 %v1974_v33, %v1843_v24  ;;  %v2007_v56 = vadd.f32 %v1975_v14, %v1844_v19  ;;  %v2008_v30 = vadd.f32 %v1976_v29, %v1845_v63  ;;  %v8120_v5 = vld [vmem:[#allocation125_spill] sm:$0xff] }
 0x420   : > { %v2528_v35 = vpack.c.bf16 %v2164_v34, %v2162_v44  ;;  %v2536_v62 = vpack.c.bf16 %v2165_v3, %v2163_v61  ;;  %4147 = vmatpush3.bf16.msra.mxu1 %v8101_v54  ;;  %v2166_v31 = vadd.f32 %v2134_v9, %v2005_v1  ;;  %v7102_v48 = vpack.c.bf16 %v1715_v4, %v8120_v5 }
 0x421   : > { %4148 = vmatprep.subr.bf16.mxu1 %v2557_v7  ;;  %v2167_v55 = vadd.f32 %v2135_v2, %v2006_v52 }
 0x422   : > { %v2072_v58 = vpop.permute.xlu1 %2071  ;;  %4101 = vmatmul.mubr.bf16.gmra.mxu1 %v2527_v40  ;;  %4133 = vmatmul.mubr.bf16.gmra.mxu0 %v2535_v59  ;;  %v8119_v59 = vld [vmem:[#allocation21_spill] sm:$0xff] }
 0x423   : > { %v2089_v20 = vsel %vm2073_vm1, %v2040_v15, %v2072_v58  ;;  %v2105_v37 = vsel %vm2073_vm1, %v2072_v58, %v2040_v15  ;;  %4104 = vmatprep.mubr.bf16.mxu1 %v2528_v35  ;;  %4136 = vmatprep.mubr.bf16.mxu0 %v2536_v62 }
 0x424   : > { %v2136_v21 = vmul.f32 %v2105_v37, %v8115_v11  ;;  %v2137_v25 = vmul.f32 %v2089_v20, %v8116_v60  ;;  %4149 = vmatpush3.bf16.msra.mxu1 %v2557_v7  ;;  %v8121_v7 = vld [vmem:[#allocation20_spill] sm:$0xff] }
 0x425   : > { %4150 = vmatprep.subr.bf16.mxu1 %v8117_v43  ;;  %vm2813_vm2 = vcmp.ge.s32.totalorder %v8121_v7, %v5914_v0  ;;  %v7111_v46 = vadd.s32 16, %v8121_v7  ;;  %v7114_v16 = vadd.s32 8, %v8121_v7  ;;  %v7131_v15 = vadd.s32 24, %v8121_v7 }
 0x426   : > { %v2168_v40 = vadd.f32 %v2136_v21, %v2007_v56  ;;  %v2169_v27 = vadd.f32 %v2137_v25, %v2008_v30  ;;  %v7150_v12 = vadd.s32 32, %v8121_v7  ;;  %v7153_v14 = vadd.s32 40, %v8121_v7 }
 0x427   : > { %vm2815_vm3 = vcmp.ge.s32.totalorder %v7111_v46, %v5914_v0  ;;  %vm2814_vm4 = vcmp.ge.s32.totalorder %v7114_v16, %v5914_v0  ;;  %vm2816_vm5 = vcmp.ge.s32.totalorder %v7131_v15, %v5914_v0  ;;  %v7168_v28 = vadd.s32 48, %v8121_v7 }
 0x428   : > { %v2529_v32 = vpack.c.bf16 %v2168_v40, %v2166_v31  ;;  %v2537_v39 = vpack.c.bf16 %v2169_v27, %v2167_v55  ;;  %4151 = vmatpush3.bf16.msra.mxu1 %v8117_v43  ;;  %vm2817_vm6 = vcmp.ge.s32.totalorder %v7150_v12, %v5914_v0  ;;  %vm2818_vm7 = vcmp.ge.s32.totalorder %v7153_v14, %v5914_v0 }
 0x429   : > { %4152 = vmatprep.subr.bf16.mxu1 %v8118_v26  ;;  %v7171_v24 = vadd.s32 56, %v8121_v7  ;;  %vm2819_vm8 = vcmp.ge.s32.totalorder %v7168_v28, %v5914_v0  ;;  %v7192_v9 = vadd.s32 64, %v8121_v7  ;;  %v7195_v50 = vadd.s32 72, %v8121_v7 }
 0x42a   : > { %4105 = vmatmul.mubr.bf16.gmra.mxu1 %v2529_v32  ;;  %4137 = vmatmul.mubr.bf16.gmra.mxu0 %v2537_v39  ;;  %v7216_v30 = vadd.s32 80, %v8121_v7  ;;  %v7219_v11 = vadd.s32 88, %v8121_v7  ;;  %v7238_v32 = vadd.s32 96, %v8121_v7  ;;  %v7241_v39 = vadd.s32 104, %v8121_v7 }
 0x42b   : > { %vm2820_vm9 = vcmp.ge.s32.totalorder %v7171_v24, %v5914_v0  ;;  %vm2821_vm10 = vcmp.ge.s32.totalorder %v7192_v9, %v5914_v0  ;;  %vm2822_vm11 = vcmp.ge.s32.totalorder %v7195_v50, %v5914_v0 }
 0x42c   : > { %4153 = vmatpush3.bf16.msra.mxu1 %v8118_v26  ;;  %vm2823_vm12 = vcmp.ge.s32.totalorder %v7216_v30, %v5914_v0  ;;  %vm2824_vm13 = vcmp.ge.s32.totalorder %v7219_v11, %v5914_v0  ;;  %vm2825_vm14 = vcmp.ge.s32.totalorder %v7238_v32, %v5914_v0  ;;  %vm2826_vm15 = vcmp.ge.s32.totalorder %v7241_v39, %v5914_v0 }
 0x42d   : > { %4154 = vmatprep.subr.bf16.mxu1 %v8119_v59 }
 0x430   : > { %4155 = vmatpush3.bf16.msra.mxu1 %v8119_v59 }
 0x431   : > { %4172 = vmatprep.subr.bf16.mxu1 %v7102_v48 }
 0x4d2   : > { %v4094_v22 = vpop.f32.mrf.mxu1  ;;  %v7106_v6 = vpop.f32.mrf.mxu0 }
 0x4d3   : > { %v2766_v61 = vmul.f32 0.088388346, %v4094_v22 }
 0x4d4   : > { %v2604_v45 = vpop.f32.mrf.mxu1  ;;  %v7116_v18 = vpop.f32.mrf.mxu0 }
 0x4d5   : > { %v2764_v23 = vmul.f32 0.088388346, %v2604_v45  ;;  %v7136_v17 = vsel %vm2815_vm3, %v2766_v61, -1e+30 }
 0x4d6   : > { %v4095_v44 = vpop.f32.mrf.mxu1  ;;  %v7123_v3 = vpop.f32.mrf.mxu0 }
 0x4d7   : > { %v7121_v34 = vsel %vm2813_vm2, %v2764_v23, -1e+30  ;;  %v2767_v13 = vmul.f32 0.088388346, %v4095_v44  ;;  %v7260_v23 = vadd.s32 112, %v8121_v7  ;;  %v7263_v44 = vadd.s32 120, %v8121_v7 }
 0x4d8   : > { %2861 = vmax.xlane.f32.xlu0 %v7121_v34  ;;  %v2607_v54 = vpop.f32.mrf.mxu1  ;;  %v7143_v57 = vpop.f32.mrf.mxu0 }
 0x4d9   : > { %v2765_v41 = vmul.f32 0.088388346, %v2607_v54  ;;  %v7158_v35 = vsel %vm2816_vm5, %v2767_v13, -1e+30  ;;  %vm2827_vm0 = vcmp.ge.s32.totalorder %v7260_v23, %v5914_v0  ;;  %vm2828_vm1 = vcmp.ge.s32.totalorder %v7263_v44, %v5914_v0 }
 0x4da   : > { %v4098_v49 = vpop.f32.mrf.mxu1  ;;  %v7160_v62 = vpop.f32.mrf.mxu0 }
 0x4db   : > { %v7141_v33 = vsel %vm2814_vm4, %v2765_v41, -1e+30  ;;  %v2770_v38 = vmul.f32 0.088388346, %v4098_v49 }
 0x4dc   : > { %2865 = vmax.xlane.f32.xlu0 %v7136_v17  ;;  %2863 = vmax.xlane.f32.xlu1 %v7141_v33  ;;  %v2620_v42 = vpop.f32.mrf.mxu1  ;;  %v7183_v1 = vpop.f32.mrf.mxu0 }
 0x4dd   : > { %v2768_v29 = vmul.f32 0.088388346, %v2620_v42  ;;  %v7200_v52 = vsel %vm2819_vm8, %v2770_v38, -1e+30 }
 0x4de   : > { %v4099_v47 = vpop.f32.mrf.mxu1  ;;  %v7207_v37 = vpop.f32.mrf.mxu0 }
 0x4df   : > { %v2771_v10 = vmul.f32 0.088388346, %v4099_v47  ;;  %v7176_v53 = vsel %vm2817_vm6, %v2768_v29, -1e+30  ;;  %v2780_v47 = vmul.f32 0.088388346, %v7116_v18 }
 0x4e0   : > { %2867 = vmax.xlane.f32.xlu0 %v7158_v35  ;;  %v2623_v8 = vpop.f32.mrf.mxu1  ;;  %v2720_v27 = vpop.f32.mrf.mxu0  ;;  %v2781_v29 = vmul.f32 0.088388346, %v7143_v57  ;;  %v2783_v18 = vmul.f32 0.088388346, %v7123_v3  ;;  %v2784_v3 = vmul.f32 0.088388346, %v7183_v1 }
 0x4e1   : > { %v2769_v36 = vmul.f32 0.088388346, %v2623_v8  ;;  %v7205_v20 = vsel %vm2820_vm9, %v2771_v10, -1e+30  ;;  %v7300_v57 = vsel %vm2813_vm2, %v2780_v47, -1e+30 }
 0x4e2   : > { %v4102_v19 = vpop.f32.mrf.mxu1  ;;  %v4134_v22 = vpop.f32.mrf.mxu0  ;;  %v7305_v10 = vsel %vm2814_vm4, %v2781_v29, -1e+30  ;;  %v2785_v7 = vmul.f32 0.088388346, %v2720_v27  ;;  %v7327_v46 = vsel %vm2817_vm6, %v2784_v3, -1e+30 }
 0x4e3   : > { %v7181_v63 = vsel %vm2818_vm7, %v2769_v36, -1e+30  ;;  %v2774_v60 = vmul.f32 0.088388346, %v4102_v19  ;;  %v2782_v19 = vmul.f32 0.088388346, %v7106_v6 }
 0x4e4   : > { %2869 = vmax.xlane.f32.xlu0 %v7176_v53  ;;  %2871 = vmax.xlane.f32.xlu1 %v7181_v63  ;;  %v2636_v51 = vpop.f32.mrf.mxu1  ;;  %v2733_v42 = vpop.f32.mrf.mxu0  ;;  %v7332_v15 = vsel %vm2818_vm7, %v2785_v7, -1e+30 }
 0x4e5   : > { %v2772_v58 = vmul.f32 0.088388346, %v2636_v51  ;;  %v7246_v59 = vsel %vm2823_vm12, %v2774_v60, -1e+30  ;;  %v7312_v6 = vsel %vm2815_vm3, %v2782_v19, -1e+30 }
 0x4e6   : > { %v4103_v2 = vpop.f32.mrf.mxu1  ;;  %v4135_v38 = vpop.f32.mrf.mxu0  ;;  %v2790_v60 = vmul.f32 0.088388346, %v4134_v22 }
 0x4e7   : > { %v2775_v31 = vmul.f32 0.088388346, %v4103_v2  ;;  %v7224_v55 = vsel %vm2821_vm10, %v2772_v58, -1e+30  ;;  %v7318_v2 = vsel %vm2816_vm5, %v2783_v18, -1e+30 }
 0x4e8   : > { %2873 = vmax.xlane.f32.xlu0 %v7200_v52  ;;  %2875 = vmax.xlane.f32.xlu1 %v7205_v20  ;;  %v2639_v56 = vpop.f32.mrf.mxu1  ;;  %v2736_v51 = vpop.f32.mrf.mxu0  ;;  %v2786_v58 = vmul.f32 0.088388346, %v7160_v62  ;;  %v7363_v27 = vsel %vm2823_vm12, %v2790_v60, -1e+30 }
 0x4e9   : > { %v2773_v21 = vmul.f32 0.088388346, %v2639_v56  ;;  %v7251_v5 = vsel %vm2824_vm13, %v2775_v31, -1e+30  ;;  %v2787_v56 = vmul.f32 0.088388346, %v7207_v37 }
 0x4ea   : > { %v4106_v25 = vpop.f32.mrf.mxu1  ;;  %v4138_v16 = vpop.f32.mrf.mxu0  ;;  %v7339_v62 = vsel %vm2819_vm8, %v2786_v58, -1e+30  ;;  %v2788_v37 = vmul.f32 0.088388346, %v2733_v42 }
 0x4eb   : > { %v7229_v40 = vsel %vm2822_vm11, %v2773_v21, -1e+30  ;;  %v2778_v54 = vmul.f32 0.088388346, %v4106_v25  ;;  %v2789_v21 = vmul.f32 0.088388346, %v2736_v51 }
 0x4ec   : > { %2877 = vmax.xlane.f32.xlu0 %v7224_v55  ;;  %2879 = vmax.xlane.f32.xlu1 %v7229_v40  ;;  %v2652_v43 = vpop.f32.mrf.mxu1  ;;  %v2749_v1 = vpop.f32.mrf.mxu0  ;;  %v7344_v12 = vsel %vm2820_vm9, %v2787_v56, -1e+30  ;;  %v2791_v25 = vmul.f32 0.088388346, %v4135_v38  ;;  %v7351_v28 = vsel %vm2821_vm10, %v2788_v37, -1e+30 }
 0x4ed   : > { %v2776_v4 = vmul.f32 0.088388346, %v2652_v43  ;;  %v7286_v8 = vsel %vm2827_vm0, %v2778_v54, -1e+30  ;;  %v7356_v31 = vsel %vm2822_vm11, %v2789_v21, -1e+30 }
 0x4ee   : > { %v4107_v26 = vpop.f32.mrf.mxu1  ;;  %v4139_v14 = vpop.f32.mrf.mxu0  ;;  %v2792_v43 = vmul.f32 0.088388346, %v2749_v1  ;;  %v7368_v9 = vsel %vm2824_vm13, %v2791_v25, -1e+30  ;;  %v2794_v50 = vmul.f32 0.088388346, %v4138_v16 }
 0x4ef   : > { %v2779_v41 = vmul.f32 0.088388346, %v4107_v26  ;;  %v7268_v49 = vsel %vm2825_vm14, %v2776_v4, -1e+30  ;;  %v2795_v4 = vmul.f32 0.088388346, %v4139_v14 }
 0x4f0   : > { %2881 = vmax.xlane.f32.xlu0 %v7246_v59  ;;  %2883 = vmax.xlane.f32.xlu1 %v7251_v5  ;;  %v2655_v45 = vpop.f32.mrf.mxu1  ;;  %v2752_v24 = vpop.f32.mrf.mxu0  ;;  %v7375_v22 = vsel %vm2825_vm14, %v2792_v43, -1e+30  ;;  %v7387_v11 = vsel %vm2827_vm0, %v2794_v50, -1e+30 }
 0x4f1   : > { %v2777_v61 = vmul.f32 0.088388346, %v2655_v45  ;;  %v7291_v36 = vsel %vm2828_vm1, %v2779_v41, -1e+30  ;;  %v2793_v26 = vmul.f32 0.088388346, %v2752_v24 }
 0x4f2   : > { %v7392_v32 = vsel %vm2828_vm1, %v2795_v4, -1e+30 }
 0x4f3   : > { %v7273_v13 = vsel %vm2826_vm15, %v2777_v61, -1e+30  ;;  %v7380_v30 = vsel %vm2826_vm15, %v2793_v26, -1e+30 }
 0x4f4   : > { %2885 = vmax.xlane.f32.xlu0 %v7268_v49  ;;  %2887 = vmax.xlane.f32.xlu1 %v7273_v13 }
 0x4f8   : > { %2889 = vmax.xlane.f32.xlu0 %v7286_v8  ;;  %2891 = vmax.xlane.f32.xlu1 %v7291_v36 }
 0x4fc   : > { %2893 = vmax.xlane.f32.xlu0 %v7300_v57  ;;  %2895 = vmax.xlane.f32.xlu1 %v7305_v10 }
 0x500   : > { %2897 = vmax.xlane.f32.xlu0 %v7312_v6  ;;  %2899 = vmax.xlane.f32.xlu1 %v7318_v2 }
 0x504   : > { %2901 = vmax.xlane.f32.xlu0 %v7327_v46  ;;  %2903 = vmax.xlane.f32.xlu1 %v7332_v15 }
 0x508   : > { %2905 = vmax.xlane.f32.xlu0 %v7339_v62  ;;  %2907 = vmax.xlane.f32.xlu1 %v7344_v12 }
 0x50c   : > { %2909 = vmax.xlane.f32.xlu0 %v7351_v28  ;;  %2911 = vmax.xlane.f32.xlu1 %v7356_v31 }
 0x510   : > { %2913 = vmax.xlane.f32.xlu0 %v7363_v27  ;;  %2915 = vmax.xlane.f32.xlu1 %v7368_v9 }
 0x514   : > { %2917 = vmax.xlane.f32.xlu0 %v7375_v22  ;;  %2919 = vmax.xlane.f32.xlu1 %v7380_v30 }
 0x518   : > { %2921 = vmax.xlane.f32.xlu0 %v7387_v11  ;;  %2923 = vmax.xlane.f32.xlu1 %v7392_v32 }
 0x561   : > { %v2862_v39 = vpop.xlane.xlu0 %2861 }
 0x562   : > { %v2925_v45 = vsub.f32 %v7121_v34, %v2862_v39 }
 0x564   : > { %v2957_v61 = vmul.f32 1.442695, %v2925_v45 }
 0x565   : > { %v2864_v54 = vpop.xlane.xlu1 %2863  ;;  %v2866_v41 = vpop.xlane.xlu0 %2865 }
 0x566   : > { %4545 = vpow2.f32 %v2957_v61  ;;  %v2926_v23 = vsub.f32 %v7141_v33, %v2864_v54  ;;  %v2927_v42 = vsub.f32 %v7136_v17, %v2866_v41 }
 0x568   : > { %v2959_v47 = vmul.f32 1.442695, %v2926_v23  ;;  %v2961_v29 = vmul.f32 1.442695, %v2927_v42 }
 0x569   : > { %v2868_v0 = vpop.xlane.xlu0 %2867 }
 0x56a   : > { %4547 = vpow2.f32 %v2959_v47  ;;  %v2928_v44 = vsub.f32 %v7158_v35, %v2868_v0 }
 0x56b   : > { %4549 = vpow2.f32 %v2961_v29 }
 0x56c   : > { %v2963_v38 = vmul.f32 1.442695, %v2928_v44 }
 0x56d   : > { %v2872_v19 = vpop.xlane.xlu1 %2871  ;;  %v2870_v18 = vpop.xlane.xlu0 %2869 }
 0x56e   : > { %4551 = vpow2.f32 %v2963_v38  ;;  %v2930_v34 = vsub.f32 %v7181_v63, %v2872_v19  ;;  %v2929_v51 = vsub.f32 %v7176_v53, %v2870_v18 }
 0x570   : > { %v2967_v3 = vmul.f32 1.442695, %v2930_v34  ;;  %v2965_v7 = vmul.f32 1.442695, %v2929_v51 }
 0x571   : > { %v2876_v33 = vpop.xlane.xlu1 %2875  ;;  %v2874_v16 = vpop.xlane.xlu0 %2873 }
 0x572   : > { %4553 = vpow2.f32 %v2967_v3  ;;  %v2932_v17 = vsub.f32 %v7205_v20, %v2876_v33  ;;  %v2931_v58 = vsub.f32 %v7200_v52, %v2874_v16 }
 0x573   : > { %v7404_v56 = vpop.eup %4545  ;;  %4555 = vpow2.f32 %v2965_v7 }
 0x574   : > { %v2971_v35 = vmul.f32 1.442695, %v2932_v17  ;;  %v2969_v1 = vmul.f32 1.442695, %v2931_v58  ;;  %3021 = vadd.xlane.f32.xlu0 %v7404_v56 }
 0x575   : > { %v2880_v37 = vpop.xlane.xlu1 %2879  ;;  %v2878_v63 = vpop.xlane.xlu0 %2877 }
 0x576   : > { %4557 = vpow2.f32 %v2971_v35  ;;  %v2934_v53 = vsub.f32 %v7229_v40, %v2880_v37  ;;  %v2933_v21 = vsub.f32 %v7224_v55, %v2878_v63 }
 0x577   : > { %v7409_v14 = vpop.eup %4547  ;;  %4559 = vpow2.f32 %v2969_v1 }
 0x578   : > { %v7411_v20 = vpop.eup %4549  ;;  %v2975_v52 = vmul.f32 1.442695, %v2934_v53  ;;  %v2973_v60 = vmul.f32 1.442695, %v2933_v21  ;;  %3023 = vadd.xlane.f32.xlu1 %v7409_v14 }
 0x579   : > { %3025 = vadd.xlane.f32.xlu0 %v7411_v20  ;;  %v2884_v25 = vpop.xlane.xlu1 %2883  ;;  %v2882_v24 = vpop.xlane.xlu0 %2881 }
 0x57a   : > { %4561 = vpow2.f32 %v2975_v52  ;;  %v2936_v43 = vsub.f32 %v7251_v5, %v2884_v25  ;;  %v2935_v40 = vsub.f32 %v7246_v59, %v2882_v24 }
 0x57b   : > { %v7417_v26 = vpop.eup %4551  ;;  %4563 = vpow2.f32 %v2973_v60 }
 0x57c   : > { %v2979_v55 = vmul.f32 1.442695, %v2936_v43  ;;  %v2977_v50 = vmul.f32 1.442695, %v2935_v40  ;;  %3027 = vadd.xlane.f32.xlu1 %v7417_v26 }
 0x57d   : > { %v2888_v4 = vpop.xlane.xlu1 %2887  ;;  %v2886_v39 = vpop.xlane.xlu0 %2885 }
 0x57e   : > { %4565 = vpow2.f32 %v2979_v55  ;;  %v2938_v45 = vsub.f32 %v7273_v13, %v2888_v4  ;;  %v2937_v61 = vsub.f32 %v7268_v49, %v2886_v39 }
 0x57f   : > { %v7422_v54 = vpop.eup %4553  ;;  %4567 = vpow2.f32 %v2977_v50 }
 0x580   : > { %v7424_v5 = vpop.eup %4555  ;;  %v2983_v59 = vmul.f32 1.442695, %v2938_v45  ;;  %v2981_v41 = vmul.f32 1.442695, %v2937_v61  ;;  %3031 = vadd.xlane.f32.xlu1 %v7422_v54 }
 0x581   : > { %3029 = vadd.xlane.f32.xlu0 %v7424_v5  ;;  %v2892_v23 = vpop.xlane.xlu1 %2891  ;;  %v2890_v42 = vpop.xlane.xlu0 %2889 }
 0x582   : > { %4569 = vpow2.f32 %v2983_v59  ;;  %v2940_v47 = vsub.f32 %v7291_v36, %v2892_v23  ;;  %v2939_v13 = vsub.f32 %v7286_v8, %v2890_v42 }
 0x583   : > { %v7430_v29 = vpop.eup %4557  ;;  %4571 = vpow2.f32 %v2981_v41 }
 0x584   : > { %v7432_v49 = vpop.eup %4559  ;;  %v2987_v0 = vmul.f32 1.442695, %v2940_v47  ;;  %v2985_v44 = vmul.f32 1.442695, %v2939_v13  ;;  %3035 = vadd.xlane.f32.xlu1 %v7430_v29 }
 0x585   : > { %3033 = vadd.xlane.f32.xlu0 %v7432_v49  ;;  %v2896_v38 = vpop.xlane.xlu1 %2895  ;;  %v2894_v19 = vpop.xlane.xlu0 %2893 }
 0x586   : > { %4573 = vpow2.f32 %v2987_v0  ;;  %v2942_v18 = vsub.f32 %v7305_v10, %v2896_v38  ;;  %v2941_v36 = vsub.f32 %v7300_v57, %v2894_v19 }
 0x587   : > { %v7438_v34 = vpop.eup %4561  ;;  %4575 = vpow2.f32 %v2985_v44 }
 0x588   : > { %v7440_v8 = vpop.eup %4563  ;;  %v2991_v51 = vmul.f32 1.442695, %v2942_v18  ;;  %v2989_v3 = vmul.f32 1.442695, %v2941_v36  ;;  %3039 = vadd.xlane.f32.xlu1 %v7438_v34 }
 0x589   : > { %3037 = vadd.xlane.f32.xlu0 %v7440_v8  ;;  %v2900_v7 = vpop.xlane.xlu1 %2899  ;;  %v2898_v33 = vpop.xlane.xlu0 %2897 }
 0x58a   : > { %4577 = vpow2.f32 %v2991_v51  ;;  %v2944_v16 = vsub.f32 %v7318_v2, %v2900_v7  ;;  %v2943_v10 = vsub.f32 %v7312_v6, %v2898_v33 }
 0x58b   : > { %v7446_v17 = vpop.eup %4565  ;;  %4579 = vpow2.f32 %v2989_v3 }
 0x58c   : > { %v7448_v57 = vpop.eup %4567  ;;  %v2995_v58 = vmul.f32 1.442695, %v2944_v16  ;;  %v2993_v35 = vmul.f32 1.442695, %v2943_v10  ;;  %3043 = vadd.xlane.f32.xlu1 %v7446_v17 }
 0x58d   : > { %3041 = vadd.xlane.f32.xlu0 %v7448_v57  ;;  %v2904_v1 = vpop.xlane.xlu1 %2903  ;;  %v2902_v37 = vpop.xlane.xlu0 %2901 }
 0x58e   : > { %4581 = vpow2.f32 %v2995_v58  ;;  %v2946_v63 = vsub.f32 %v7332_v15, %v2904_v1  ;;  %v2945_v2 = vsub.f32 %v7327_v46, %v2902_v37 }
 0x58f   : > { %v7454_v53 = vpop.eup %4569  ;;  %4583 = vpow2.f32 %v2993_v35 }
 0x590   : > { %v7456_v6 = vpop.eup %4571  ;;  %v2999_v21 = vmul.f32 1.442695, %v2946_v63  ;;  %v2997_v52 = vmul.f32 1.442695, %v2945_v2  ;;  %3047 = vadd.xlane.f32.xlu1 %v7454_v53 }
 0x591   : > { %3045 = vadd.xlane.f32.xlu0 %v7456_v6  ;;  %v2908_v60 = vpop.xlane.xlu1 %2907  ;;  %v2906_v25 = vpop.xlane.xlu0 %2905 }
 0x592   : > { %4585 = vpow2.f32 %v2999_v21  ;;  %v2948_v24 = vsub.f32 %v7344_v12, %v2908_v60  ;;  %v2947_v15 = vsub.f32 %v7339_v62, %v2906_v25  ;;  %v4467_v60 = vld [vmem:[#allocation8 + $0x74] ss:$8 sps:$4 sm:$0xff]   ;;  %v4470_v25 = vld [vmem:[#allocation8 + $0x64] ss:$8 sps:$4 sm:$0xff]  }
 0x593   : > { %v7462_v43 = vpop.eup %4573  ;;  %4587 = vpow2.f32 %v2997_v52  ;;  %v4465_v52 = vld [vmem:[#allocation8 + $0x70] ss:$8 sps:$4 sm:$0xff]   ;;  %3567 = vmatprep.subr.bf16.mxu0 %v4467_v60 }
 0x594   : > { %v7464_v46 = vpop.eup %4575  ;;  %v3003_v40 = vmul.f32 1.442695, %v2948_v24  ;;  %v3001_v55 = vmul.f32 1.442695, %v2947_v15  ;;  %3051 = vadd.xlane.f32.xlu1 %v7462_v43  ;;  %3568 = vmatpush1.bf16.msra.mxu0 %v4465_v52  ;;  %v4468_v24 = vld [vmem:[#allocation8 + $0x60] ss:$8 sps:$4 sm:$0xff]  }
 0x595   : > { %3049 = vadd.xlane.f32.xlu0 %v7464_v46  ;;  %v2912_v50 = vpop.xlane.xlu1 %2911  ;;  %v2910_v4 = vpop.xlane.xlu0 %2909  ;;  %3569 = vmatprep.subr.bf16.mxu0 %v4470_v25  ;;  %v4473_v15 = vld [vmem:[#allocation8 + $0x54] ss:$8 sps:$4 sm:$0xff]  }
 0x596   : > { %4589 = vpow2.f32 %v3003_v40  ;;  %v2950_v39 = vsub.f32 %v7356_v31, %v2912_v50  ;;  %v2949_v12 = vsub.f32 %v7351_v28, %v2910_v4  ;;  %v4471_v40 = vld [vmem:[#allocation8 + $0x50] ss:$8 sps:$4 sm:$0xff]   ;;  %v4474_v50 = vld [vmem:[#allocation8 + $0x40] ss:$8 sps:$4 sm:$0xff]   ;;  %v4479_v4 = vld [vmem:[#allocation8 + $0x34] ss:$8 sps:$4 sm:$0xff]  }
 0x597   : > { %v7470_v45 = vpop.eup %4577  ;;  %4591 = vpow2.f32 %v3001_v55  ;;  %v4476_v55 = vld [vmem:[#allocation8 + $0x44] ss:$8 sps:$4 sm:$0xff]  }
 0x598   : > { %v7472_v62 = vpop.eup %4579  ;;  %v3007_v61 = vmul.f32 1.442695, %v2950_v39  ;;  %v3005_v59 = vmul.f32 1.442695, %v2949_v12  ;;  %3055 = vadd.xlane.f32.xlu1 %v7470_v45  ;;  %3570 = vmatpush1.bf16.msra.mxu0 %v4468_v24  ;;  %v4477_v39 = vld [vmem:[#allocation8 + $0x30] ss:$8 sps:$4 sm:$0xff]  }
 0x599   : > { %3053 = vadd.xlane.f32.xlu0 %v7472_v62  ;;  %v2916_v41 = vpop.xlane.xlu1 %2915  ;;  %v2914_v23 = vpop.xlane.xlu0 %2913  ;;  %3571 = vmatprep.subr.bf16.mxu0 %v4473_v15  ;;  %v4482_v12 = vld [vmem:[#allocation8 + $0x24] ss:$8 sps:$4 sm:$0xff]  }
 0x59a   : > { %4593 = vpow2.f32 %v3007_v61  ;;  %v2952_v42 = vsub.f32 %v7368_v9, %v2916_v41  ;;  %v2951_v31 = vsub.f32 %v7363_v27, %v2914_v23  ;;  %v4480_v61 = vld [vmem:[#allocation8 + $0x20] ss:$8 sps:$4 sm:$0xff]  }
 0x59b   : > { %v7478_v47 = vpop.eup %4581  ;;  %4595 = vpow2.f32 %v3005_v59 }
 0x59c   : > { %v7480_v28 = vpop.eup %4583  ;;  %v3011_v13 = vmul.f32 1.442695, %v2952_v42  ;;  %v3009_v0 = vmul.f32 1.442695, %v2951_v31  ;;  %3059 = vadd.xlane.f32.xlu1 %v7478_v47  ;;  %3572 = vmatpush1.bf16.msra.mxu0 %v4471_v40 }
 0x59d   : > { %3057 = vadd.xlane.f32.xlu0 %v7480_v28  ;;  %v2920_v44 = vpop.xlane.xlu1 %2919  ;;  %v2918_v38 = vpop.xlane.xlu0 %2917  ;;  %3573 = vmatprep.subr.bf16.mxu0 %v4476_v55  ;;  %v8122_v55 = vld [vmem:[#allocation51_spill] sm:$0xff] }
 0x59e   : > { %4597 = vpow2.f32 %v3011_v13  ;;  %v2954_v19 = vsub.f32 %v7380_v30, %v2920_v44  ;;  %v2953_v9 = vsub.f32 %v7375_v22, %v2918_v38 }
 0x59f   : > { %v7486_v18 = vpop.eup %4585  ;;  %4599 = vpow2.f32 %v3009_v0 }
 0x5a0   : > { %v7488_v27 = vpop.eup %4587  ;;  %v3015_v36 = vmul.f32 1.442695, %v2954_v19  ;;  %v3013_v51 = vmul.f32 1.442695, %v2953_v9  ;;  %3063 = vadd.xlane.f32.xlu1 %v7486_v18  ;;  %3574 = vmatpush1.bf16.msra.mxu0 %v4474_v50 }
 0x5a1   : > { %3061 = vadd.xlane.f32.xlu0 %v7488_v27  ;;  %v2924_v3 = vpop.xlane.xlu1 %2923  ;;  %v2922_v7 = vpop.xlane.xlu0 %2921  ;;  %3575 = vmatprep.subr.bf16.mxu0 %v4479_v4 }
 0x5a2   : > { %4601 = vpow2.f32 %v3015_v36  ;;  %v2956_v33 = vsub.f32 %v7392_v32, %v2924_v3  ;;  %v2955_v30 = vsub.f32 %v7387_v11, %v2922_v7 }
 0x5a3   : > { %v7494_v16 = vpop.eup %4589  ;;  %4603 = vpow2.f32 %v3013_v51 }
 0x5a4   : > { %v7496_v22 = vpop.eup %4591  ;;  %v3019_v10 = vmul.f32 1.442695, %v2956_v33  ;;  %v3017_v58 = vmul.f32 1.442695, %v2955_v30  ;;  %3067 = vadd.xlane.f32.xlu1 %v7494_v16  ;;  %3576 = vmatpush1.bf16.msra.mxu0 %v4477_v39 }
 0x5a5   : > { %3065 = vadd.xlane.f32.xlu0 %v7496_v22  ;;  %3577 = vmatprep.subr.bf16.mxu0 %v4482_v12 }
 0x5a6   : > { %4605 = vpow2.f32 %v3019_v10 }
 0x5a7   : > { %v7500_v35 = vpop.eup %4593  ;;  %4607 = vpow2.f32 %v3017_v58 }
 0x5a8   : > { %v7502_v1 = vpop.eup %4595  ;;  %3071 = vadd.xlane.f32.xlu1 %v7500_v35  ;;  %3578 = vmatpush1.bf16.msra.mxu0 %v4480_v61 }
 0x5a9   : > { %3069 = vadd.xlane.f32.xlu0 %v7502_v1 }
 0x5ab   : > { %v7506_v11 = vpop.eup %4597 }
 0x5ac   : > { %v7508_v32 = vpop.eup %4599  ;;  %3075 = vadd.xlane.f32.xlu1 %v7506_v11 }
 0x5ad   : > { %3073 = vadd.xlane.f32.xlu0 %v7508_v32 }
 0x5af   : > { %v7512_v37 = vpop.eup %4601 }
 0x5b0   : > { %v7514_v63 = vpop.eup %4603  ;;  %3079 = vadd.xlane.f32.xlu1 %v7512_v37 }
 0x5b1   : > { %3077 = vadd.xlane.f32.xlu0 %v7514_v63 }
 0x5b3   : > { %v7518_v2 = vpop.eup %4605 }
 0x5b4   : > { %v7520_v21 = vpop.eup %4607  ;;  %3083 = vadd.xlane.f32.xlu1 %v7518_v2 }
 0x5b5   : > { %3081 = vadd.xlane.f32.xlu0 %v7520_v21 }
 0x5fd   : > { %v3022_v59 = vpop.xlane.xlu0 %3021 }
 0x5fe   : > { %4609 = vrcp.f32 %v3022_v59 }
 0x601   : > { %v3024_v41 = vpop.xlane.xlu1 %3023 }
 0x602   : > { %4611 = vrcp.f32 %v3024_v41  ;;  %v3026_v23 = vpop.xlane.xlu0 %3025 }
 0x603   : > { %4613 = vrcp.f32 %v3026_v23 }
 0x605   : > { %v3028_v42 = vpop.xlane.xlu1 %3027 }
 0x606   : > { %4615 = vrcp.f32 %v3028_v42 }
 0x609   : > { %v3032_v31 = vpop.xlane.xlu1 %3031 }
 0x60a   : > { %4617 = vrcp.f32 %v3032_v31  ;;  %v3030_v13 = vpop.xlane.xlu0 %3029 }
 0x60b   : > { %4619 = vrcp.f32 %v3030_v13  ;;  %v4610_v0 = vpop.eup %4609 }
 0x60c   : > { %v3117_v9 = vmul.f32 %v4610_v0, %v7404_v56 }
 0x60d   : > { %v3036_v44 = vpop.xlane.xlu1 %3035 }
 0x60e   : > { %4621 = vrcp.f32 %v3036_v44  ;;  %v3034_v38 = vpop.xlane.xlu0 %3033 }
 0x60f   : > { %v4612_v19 = vpop.eup %4611  ;;  %4623 = vrcp.f32 %v3034_v38 }
 0x610   : > { %v3118_v36 = vmul.f32 %v4612_v19, %v7409_v14  ;;  %v4614_v51 = vpop.eup %4613 }
 0x611   : > { %v3040_v3 = vpop.xlane.xlu1 %3039  ;;  %v3119_v10 = vmul.f32 %v4614_v51, %v7411_v20 }
 0x612   : > { %4625 = vrcp.f32 %v3040_v3  ;;  %v3038_v7 = vpop.xlane.xlu0 %3037  ;;  %v3149_v33 = vpack.c.bf16 %v3118_v36, %v3117_v9  ;;  %v8125_v36 = vld [vmem:[#allocation30_spill] sm:$0xff] }
 0x613   : > { %v4616_v30 = vpop.eup %4615  ;;  %4627 = vrcp.f32 %v3038_v7 }
 0x614   : > { %4156 = vmatprep.mubr.bf16.mxu1 %v3149_v33  ;;  %v3120_v58 = vmul.f32 %v4616_v30, %v7417_v26 }
 0x615   : > { %v3044_v52 = vpop.xlane.xlu1 %3043 }
 0x616   : > { %4629 = vrcp.f32 %v3044_v52  ;;  %v3042_v60 = vpop.xlane.xlu0 %3041  ;;  %v3150_v25 = vpack.c.bf16 %v3120_v58, %v3119_v10  ;;  %v8126_v10 = vld [vmem:[#allocation26_spill] sm:$0xff] }
 0x617   : > { %v4618_v24 = vpop.eup %4617  ;;  %4631 = vrcp.f32 %v3042_v60 }
 0x618   : > { %v4620_v56 = vpop.eup %4619  ;;  %4157 = vmatmul.mubr.bf16.vlgmr.msra.gmra.mxu1 %v3150_v25  ;;  %v3122_v14 = vmul.f32 %v4618_v24, %v7422_v54 }
 0x619   : > { %4173 = vmatpush3.bf16.msra.mxu1 %v7102_v48  ;;  %v3048_v15 = vpop.xlane.xlu1 %3047  ;;  %v3121_v40 = vmul.f32 %v4620_v56, %v7424_v5  ;;  %v8123_v48 = vld [vmem:[#allocation44_spill] sm:$0xff] }
 0x61a   : > { %4633 = vrcp.f32 %v3048_v15  ;;  %4174 = vmatprep.subr.bf16.mxu1 %v8122_v55  ;;  %v3046_v20 = vpop.xlane.xlu0 %3045  ;;  %v8127_v56 = vld [vmem:[#allocation24_spill] sm:$0xff] }
 0x61b   : > { %v4622_v26 = vpop.eup %4621  ;;  %4635 = vrcp.f32 %v3046_v20  ;;  %v3151_v50 = vpack.c.bf16 %v3122_v14, %v3121_v40 }
 0x61c   : > { %v4624_v4 = vpop.eup %4623  ;;  %v3124_v39 = vmul.f32 %v4622_v26, %v7430_v29  ;;  %v8128_v26 = vld [vmem:[#allocation22_spill] sm:$0xff] }
 0x61d   : > { %4160 = vmatprep.mubr.bf16.mxu1 %v3151_v50  ;;  %4175 = vmatpush3.bf16.msra.mxu1 %v8122_v55  ;;  %v3052_v12 = vpop.xlane.xlu1 %3051  ;;  %v3123_v54 = vmul.f32 %v4624_v4, %v7432_v49  ;;  %v8124_v49 = vld [vmem:[#allocation37_spill] sm:$0xff] }
 0x61e   : > { %4637 = vrcp.f32 %v3052_v12  ;;  %4176 = vmatprep.subr.bf16.mxu1 %v8123_v48  ;;  %v3050_v5 = vpop.xlane.xlu0 %3049 }
 0x61f   : > { %v4626_v61 = vpop.eup %4625  ;;  %4639 = vrcp.f32 %v3050_v5  ;;  %v3152_v59 = vpack.c.bf16 %v3124_v39, %v3123_v54 }
 0x620   : > { %v4628_v41 = vpop.eup %4627  ;;  %v3126_v23 = vmul.f32 %v4626_v61, %v7438_v34 }
 0x621   : > { %4161 = vmatmul.mubr.bf16.gmra.mxu1 %v3152_v59  ;;  %v3056_v42 = vpop.xlane.xlu1 %3055  ;;  %v3125_v29 = vmul.f32 %v4628_v41, %v7440_v8 }
 0x622   : > { %4177 = vmatpush3.bf16.msra.mxu1 %v8123_v48  ;;  %4641 = vrcp.f32 %v3056_v42  ;;  %v3054_v31 = vpop.xlane.xlu0 %3053 }
 0x623   : > { %v4630_v13 = vpop.eup %4629  ;;  %4178 = vmatprep.subr.bf16.mxu1 %v8124_v49  ;;  %4643 = vrcp.f32 %v3054_v31  ;;  %v3153_v0 = vpack.c.bf16 %v3126_v23, %v3125_v29 }
 0x624   : > { %v4632_v44 = vpop.eup %4631  ;;  %v3128_v38 = vmul.f32 %v4630_v13, %v7446_v17 }
 0x625   : > { %4164 = vmatprep.mubr.bf16.mxu1 %v3153_v0  ;;  %v3060_v19 = vpop.xlane.xlu1 %3059  ;;  %v3127_v34 = vmul.f32 %v4632_v44, %v7448_v57 }
 0x626   : > { %4179 = vmatpush3.bf16.msra.mxu1 %v8124_v49  ;;  %4645 = vrcp.f32 %v3060_v19  ;;  %v3058_v8 = vpop.xlane.xlu0 %3057 }
 0x627   : > { %v4634_v9 = vpop.eup %4633  ;;  %4180 = vmatprep.subr.bf16.mxu1 %v8125_v36  ;;  %4647 = vrcp.f32 %v3058_v8  ;;  %v3154_v51 = vpack.c.bf16 %v3128_v38, %v3127_v34 }
 0x628   : > { %v4636_v3 = vpop.eup %4635  ;;  %v3130_v7 = vmul.f32 %v4634_v9, %v7454_v53 }
 0x629   : > { %4165 = vmatmul.mubr.bf16.gmra.mxu1 %v3154_v51  ;;  %v3064_v33 = vpop.xlane.xlu1 %3063  ;;  %v3129_v17 = vmul.f32 %v4636_v3, %v7456_v6 }
 0x62a   : > { %4181 = vmatpush3.bf16.msra.mxu1 %v8125_v36  ;;  %4649 = vrcp.f32 %v3064_v33  ;;  %v3062_v57 = vpop.xlane.xlu0 %3061 }
 0x62b   : > { %v4638_v30 = vpop.eup %4637  ;;  %4182 = vmatprep.subr.bf16.mxu1 %v8126_v10  ;;  %4651 = vrcp.f32 %v3062_v57  ;;  %v3155_v58 = vpack.c.bf16 %v3130_v7, %v3129_v17 }
 0x62c   : > { %v4640_v52 = vpop.eup %4639  ;;  %v3132_v60 = vmul.f32 %v4638_v30, %v7462_v43  ;;  %v4483_v30 = vld [vmem:[#allocation8 + $0x10] ss:$8 sps:$4 sm:$0xff]  }
 0x62d   : > { %4168 = vmatprep.mubr.bf16.mxu1 %v3155_v58  ;;  %v3068_v25 = vpop.xlane.xlu1 %3067  ;;  %v3131_v53 = vmul.f32 %v4640_v52, %v7464_v46  ;;  %v4488_v58 = vld [vmem:[#allocation8 + $0x4] ss:$8 sps:$4 sm:$0xff]   ;;  %v4492_v52 = vld [vmem:[#allocation8 + $0xe0] ss:$8 sps:$4 sm:$0xff]  }
 0x62e   : > { %4183 = vmatpush3.bf16.msra.mxu1 %v8126_v10  ;;  %4653 = vrcp.f32 %v3068_v25  ;;  %v3066_v6 = vpop.xlane.xlu0 %3065  ;;  %v4486_v10 = vld [vmem:[#allocation8] ss:$8 sps:$4 sm:$0xff]  }
 0x62f   : > { %v4642_v24 = vpop.eup %4641  ;;  %4184 = vmatprep.subr.bf16.mxu1 %v8127_v56  ;;  %4655 = vrcp.f32 %v3066_v6  ;;  %v3156_v14 = vpack.c.bf16 %v3132_v60, %v3131_v53  ;;  %v4494_v60 = vld [vmem:[#allocation8 + $0xe4] ss:$8 sps:$4 sm:$0xff]   ;;  %v4498_v25 = vld [vmem:[#allocation8 + $0xc0] ss:$8 sps:$4 sm:$0xff]   ;;  %v4501_v6 = vld [vmem:[#allocation8 + $0xb0] ss:$8 sps:$4 sm:$0xff]  }
 0x630   : > { %v4644_v15 = vpop.eup %4643  ;;  %v3134_v40 = vmul.f32 %v4642_v24, %v7470_v45  ;;  %v4500_v53 = vld [vmem:[#allocation8 + $0xc4] ss:$8 sps:$4 sm:$0xff]   ;;  %v4503_v24 = vld [vmem:[#allocation8 + $0xb4] ss:$8 sps:$4 sm:$0xff]  }
 0x631   : > { %4169 = vmatmul.mubr.bf16.gmra.mxu1 %v3156_v14  ;;  %v3072_v55 = vpop.xlane.xlu1 %3071  ;;  %v3133_v43 = vmul.f32 %v4644_v15, %v7472_v62  ;;  %v4506_v14 = vld [vmem:[#allocation8 + $0xa4] ss:$8 sps:$4 sm:$0xff]   ;;  %v4507_v15 = vld [vmem:[#allocation8 + $0x90] ss:$8 sps:$4 sm:$0xff]  }
 0x632   : > { %4185 = vmatpush3.bf16.msra.mxu1 %v8127_v56  ;;  %4657 = vrcp.f32 %v3072_v55  ;;  %v3070_v46 = vpop.xlane.xlu0 %3069  ;;  %v4504_v56 = vld [vmem:[#allocation8 + $0xa0] ss:$8 sps:$4 sm:$0xff]  }
 0x633   : > { %v4646_v20 = vpop.eup %4645  ;;  %4186 = vmatprep.subr.bf16.mxu1 %v8128_v26  ;;  %4659 = vrcp.f32 %v3070_v46  ;;  %v3157_v50 = vpack.c.bf16 %v3134_v40, %v3133_v43  ;;  %v4509_v40 = vld [vmem:[#allocation8 + $0x94] ss:$8 sps:$4 sm:$0xff]   ;;  %v4510_v55 = vld [vmem:[#allocation8 + $0x80] ss:$8 sps:$4 sm:$0xff]   ;;  %v4512_v43 = vld [vmem:[#allocation8 + $0x84] ss:$8 sps:$4 sm:$0xff]  }
 0x634   : > { %v4648_v4 = vpop.eup %4647  ;;  %v3136_v39 = vmul.f32 %v4646_v20, %v7478_v47 }
 0x635   : > { %4188 = vmatprep.mubr.bf16.mxu1 %v3157_v50  ;;  %v3076_v12 = vpop.xlane.xlu1 %3075  ;;  %v3135_v45 = vmul.f32 %v4648_v4, %v7480_v28 }
 0x636   : > { %4187 = vmatpush3.bf16.msra.mxu1 %v8128_v26  ;;  %4661 = vrcp.f32 %v3076_v12  ;;  %v3074_v62 = vpop.xlane.xlu0 %3073 }
 0x637   : > { %v4650_v54 = vpop.eup %4649  ;;  %4663 = vrcp.f32 %v3074_v62  ;;  %v3158_v48 = vpack.c.bf16 %v3136_v39, %v3135_v45 }
 0x638   : > { %v4652_v5 = vpop.eup %4651  ;;  %v3138_v61 = vmul.f32 %v4650_v54, %v7486_v18 }
 0x639   : > { %4189 = vmatmul.mubr.bf16.vlgmr.msra.gmra.mxu1 %v3158_v48  ;;  %v3080_v59 = vpop.xlane.xlu1 %3079  ;;  %v3137_v41 = vmul.f32 %v4652_v5, %v7488_v27 }
 0x63a   : > { %4665 = vrcp.f32 %v3080_v59  ;;  %v3078_v47 = vpop.xlane.xlu0 %3077 }
 0x63b   : > { %v4654_v23 = vpop.eup %4653  ;;  %4667 = vrcp.f32 %v3078_v47  ;;  %v3159_v42 = vpack.c.bf16 %v3138_v61, %v3137_v41 }
 0x63c   : > { %v4656_v28 = vpop.eup %4655  ;;  %v3140_v29 = vmul.f32 %v4654_v23, %v7494_v16 }
 0x63d   : > { %4192 = vmatprep.mubr.bf16.mxu1 %v3159_v42  ;;  %v3084_v31 = vpop.xlane.xlu1 %3083  ;;  %v3139_v13 = vmul.f32 %v4656_v28, %v7496_v22 }
 0x63e   : > { %4669 = vrcp.f32 %v3084_v31  ;;  %v3082_v49 = vpop.xlane.xlu0 %3081 }
 0x63f   : > { %v4658_v0 = vpop.eup %4657  ;;  %4671 = vrcp.f32 %v3082_v49  ;;  %v3160_v18 = vpack.c.bf16 %v3140_v29, %v3139_v13 }
 0x640   : > { %v4660_v44 = vpop.eup %4659  ;;  %v3142_v27 = vmul.f32 %v4658_v0, %v7500_v35 }
 0x641   : > { %4193 = vmatmul.mubr.bf16.gmra.mxu1 %v3160_v18  ;;  %v3141_v38 = vmul.f32 %v4660_v44, %v7502_v1 }
 0x643   : > { %v4662_v19 = vpop.eup %4661  ;;  %v3161_v34 = vpack.c.bf16 %v3142_v27, %v3141_v38 }
 0x644   : > { %v4664_v8 = vpop.eup %4663  ;;  %v3144_v16 = vmul.f32 %v4662_v19, %v7506_v11 }
 0x645   : > { %4196 = vmatprep.mubr.bf16.mxu1 %v3161_v34  ;;  %v3143_v9 = vmul.f32 %v4664_v8, %v7508_v32  ;;  %v4485_v32 = vld [vmem:[#allocation8 + $0x14] ss:$8 sps:$4 sm:$0xff]  }
 0x646   : > { %3579 = vmatprep.subr.bf16.mxu0 %v4485_v32 }
 0x647   : > { %v4666_v22 = vpop.eup %4665  ;;  %v3162_v36 = vpack.c.bf16 %v3144_v16, %v3143_v9  ;;  %3580 = vmatpush1.bf16.msra.mxu0 %v4483_v30 }
 0x648   : > { %v4668_v51 = vpop.eup %4667  ;;  %v3146_v3 = vmul.f32 %v4666_v22, %v7512_v37  ;;  %3581 = vmatprep.subr.bf16.mxu0 %v4488_v58  ;;  %v4489_v37 = vld [vmem:[#allocation8 + $0xf0] ss:$8 sps:$4 sm:$0xff]  }
 0x649   : > { %4197 = vmatmul.mubr.bf16.gmra.mxu1 %v3162_v36  ;;  %v3145_v7 = vmul.f32 %v4668_v51, %v7514_v63  ;;  %v4491_v63 = vld [vmem:[#allocation8 + $0xf4] ss:$8 sps:$4 sm:$0xff]  }
 0x64b   : > { %v4670_v35 = vpop.eup %4669  ;;  %v3163_v33 = vpack.c.bf16 %v3146_v3, %v3145_v7  ;;  %3582 = vmatpush1.bf16.msra.mxu0 %v4486_v10 }
 0x64c   : > { %v4672_v17 = vpop.eup %4671  ;;  %v3148_v1 = vmul.f32 %v4670_v35, %v7518_v2  ;;  %3583 = vmatprep.subr.bf16.mxu0 %v4491_v63  ;;  %v4495_v2 = vld [vmem:[#allocation8 + $0xd0] ss:$8 sps:$4 sm:$0xff]   ;;  %v4673_v63 = vld [vmem:[%s5216_s10] sm:$0xff] }
 0x64d   : > { %4200 = vmatprep.mubr.bf16.mxu1 %v3163_v33  ;;  %v3147_v57 = vmul.f32 %v4672_v17, %v7520_v21  ;;  %v4497_v21 = vld [vmem:[#allocation8 + $0xd4] ss:$8 sps:$4 sm:$0xff]  }
 0x64f   : > { %v3164_v11 = vpack.c.bf16 %v3148_v1, %v3147_v57  ;;  %3584 = vmatpush2.bf16.msra.mxu0 %v4489_v37 }
 0x650   : > { %3585 = vmatprep.subr.bf16.mxu0 %v4494_v60 }
 0x651   : > { %4201 = vmatmul.mubr.bf16.gmra.mxu1 %v3164_v11 }
 0x653   : > { %3586 = vmatpush2.bf16.msra.mxu0 %v4492_v52 }
 0x654   : > { %3587 = vmatprep.subr.bf16.mxu0 %v4497_v21 }
 0x657   : > { %3588 = vmatpush2.bf16.msra.mxu0 %v4495_v2  ;;  %v4674_v2 = vld [vmem:[%s5216_s10 + $0x8] sm:$0xff] }
 0x658   : > { %3589 = vmatprep.subr.bf16.mxu0 %v4500_v53  ;;  %v4675_v53 = vld [vmem:[%s5216_s10 + $0x10] sm:$0xff] }
 0x65b   : > { %3590 = vmatpush2.bf16.msra.mxu0 %v4498_v25 }
 0x65c   : > { %3591 = vmatprep.subr.bf16.mxu0 %v4503_v24 }
 0x65f   : > { %3592 = vmatpush2.bf16.msra.mxu0 %v4501_v6 }
 0x660   : > { %3593 = vmatprep.subr.bf16.mxu0 %v4506_v14 }
 0x663   : > { %3594 = vmatpush2.bf16.msra.mxu0 %v4504_v56  ;;  %v4676_v56 = vld [vmem:[%s5216_s10 + $0x18] sm:$0xff] }
 0x664   : > { %3595 = vmatprep.subr.bf16.mxu0 %v4509_v40  ;;  %v4677_v40 = vld [vmem:[%s5216_s10 + $0x20] sm:$0xff] }
 0x667   : > { %3596 = vmatpush2.bf16.msra.mxu0 %v4507_v15 }
 0x668   : > { %3597 = vmatprep.subr.bf16.mxu0 %v4512_v43 }
 0x66b   : > { %3598 = vmatpush2.bf16.msra.mxu0 %v4510_v55 }
 0x6d8   : > { %v4158_v46 = vpop.f32.mrf.mxu1 }
 0x6da   : > { %v3199_v20 = vpop.f32.mrf.mxu1 }
 0x6dc   : > { %v4159_v26 = vpop.f32.mrf.mxu1 }
 0x6dd   : > { %v3361_v19 = vpack.c.bf16 %v4159_v26, %v4158_v46  ;;  %v4678_v46 = vld [vmem:[%s5216_s10 + $0x28] sm:$0xff] }
 0x6de   : > { %v3202_v50 = vpop.f32.mrf.mxu1 }
 0x6df   : > { %v3359_v49 = vpack.c.bf16 %v3202_v50, %v3199_v20  ;;  %v4679_v50 = vld [vmem:[%s5216_s10 + $0x30] sm:$0xff] }
 0x6e1   : > { %v4162_v4 = vpop.f32.mrf.mxu1 }
 0x6e3   : > { %v3215_v39 = vpop.f32.mrf.mxu1 }
 0x6e5   : > { %v4163_v12 = vpop.f32.mrf.mxu1 }
 0x6e6   : > { %v3365_v3 = vpack.c.bf16 %v4163_v12, %v4162_v4  ;;  %v4680_v12 = vld [vmem:[%s5216_s10 + $0x38] sm:$0xff] }
 0x6e7   : > { %v3218_v45 = vpop.f32.mrf.mxu1 }
 0x6e8   : > { %v3363_v9 = vpack.c.bf16 %v3218_v45, %v3215_v39 }
 0x6e9   : > { %v4166_v62 = vpop.f32.mrf.mxu1 }
 0x6eb   : > { %v3231_v54 = vpop.f32.mrf.mxu1 }
 0x6ed   : > { %v4167_v48 = vpop.f32.mrf.mxu1 }
 0x6ee   : > { %v3369_v30 = vpack.c.bf16 %v4167_v48, %v4166_v62 }
 0x6ef   : > { %v3234_v5 = vpop.f32.mrf.mxu1 }
 0x6f0   : > { %v3367_v17 = vpack.c.bf16 %v3234_v5, %v3231_v54  ;;  %v4681_v54 = vld [vmem:[%s5216_s10 + $0x40] sm:$0xff] }
 0x6f1   : > { %v4170_v61 = vpop.f32.mrf.mxu1 }
 0x6f3   : > { %v3247_v59 = vpop.f32.mrf.mxu1 }
 0x6f5   : > { %v4171_v41 = vpop.f32.mrf.mxu1 }
 0x6f6   : > { %v3373_v47 = vpack.c.bf16 %v4171_v41, %v4170_v61  ;;  %v4682_v61 = vld [vmem:[%s5216_s10 + $0x48] sm:$0xff] }
 0x6f7   : > { %v3250_v23 = vpop.f32.mrf.mxu1 }
 0x6f8   : > { %v3371_v10 = vpack.c.bf16 %v3250_v23, %v3247_v59 }
 0x6f9   : > { %v4190_v42 = vpop.f32.mrf.mxu1 }
 0x6fb   : > { %v3296_v28 = vpop.f32.mrf.mxu1 }
 0x6fd   : > { %v4191_v29 = vpop.f32.mrf.mxu1 }
 0x6fe   : > { %v3362_v18 = vpack.c.bf16 %v4191_v29, %v4190_v42 }
 0x6ff   : > { %v3299_v31 = vpop.f32.mrf.mxu1 }
 0x700   : > { %v3360_v13 = vpack.c.bf16 %v3299_v31, %v3296_v28  ;;  %v4684_v28 = vld [vmem:[%s5216_s10 + $0x58] sm:$0xff] }
 0x701   : > { %v4194_v0 = vpop.f32.mrf.mxu1 }
 0x702   : > { %3599 = vmatprep.mubr.bf16.mxu0 %v3360_v13  ;;  %v4685_v13 = vld [vmem:[%s5216_s10 + $0x60] sm:$0xff] }
 0x703   : > { %v3312_v44 = vpop.f32.mrf.mxu1  ;;  %3600 = vmatmul.mubr.bf16.vlgmr.msra.gmra.mxu0 %v3359_v49 }
 0x704   : > { %3609 = vmatprep.mubr.bf16.mxu0 %v3362_v18  ;;  %v4686_v18 = vld [vmem:[%s5216_s10 + $0x68] sm:$0xff] }
 0x705   : > { %v4195_v27 = vpop.f32.mrf.mxu1 }
 0x706   : > { %v3366_v22 = vpack.c.bf16 %v4195_v27, %v4194_v0 }
 0x707   : > { %v3315_v38 = vpop.f32.mrf.mxu1 }
 0x708   : > { %v3364_v34 = vpack.c.bf16 %v3315_v38, %v3312_v44  ;;  %v4687_v38 = vld [vmem:[%s5216_s10 + $0x70] sm:$0xff] }
 0x709   : > { %v4198_v8 = vpop.f32.mrf.mxu1 }
 0x70b   : > { %3610 = vmatmul.mubr.bf16.gmra.mxu0 %v3361_v19  ;;  %v3328_v16 = vpop.f32.mrf.mxu1 }
 0x70c   : > { %3619 = vmatprep.mubr.bf16.mxu0 %v3364_v34 }
 0x70d   : > { %v4199_v36 = vpop.f32.mrf.mxu1 }
 0x70e   : > { %v3370_v1 = vpack.c.bf16 %v4199_v36, %v4198_v8  ;;  %v4688_v8 = vld [vmem:[%s5216_s10 + $0x78] sm:$0xff] }
 0x70f   : > { %v3331_v51 = vpop.f32.mrf.mxu1 }
 0x710   : > { %v3368_v7 = vpack.c.bf16 %v3331_v51, %v3328_v16 }
 0x711   : > { %v4202_v35 = vpop.f32.mrf.mxu1 }
 0x713   : > { %3620 = vmatmul.mubr.bf16.gmra.mxu0 %v3363_v9  ;;  %v3344_v33 = vpop.f32.mrf.mxu1 }
 0x714   : > { %3629 = vmatprep.mubr.bf16.mxu0 %v3366_v22  ;;  %v4689_v22 = vld [vmem:[%s5216_s10 + $0x80] sm:$0xff] }
 0x715   : > { %v4203_v57 = vpop.f32.mrf.mxu1 }
 0x716   : > { %v3374_v58 = vpack.c.bf16 %v4203_v57, %v4202_v35  ;;  %v4692_v57 = vld [vmem:[%s5216_s10 + $0x98] sm:$0xff] }
 0x717   : > { %v3347_v11 = vpop.f32.mrf.mxu1 }
 0x718   : > { %v3372_v32 = vpack.c.bf16 %v3347_v11, %v3344_v33  ;;  %v4691_v33 = vld [vmem:[%s5216_s10 + $0x90] sm:$0xff] }
 0x71b   : > { %3630 = vmatmul.mubr.bf16.gmra.mxu0 %v3365_v3  ;;  %v4690_v3 = vld [vmem:[%s5216_s10 + $0x88] sm:$0xff] }
 0x71c   : > { %3639 = vmatprep.mubr.bf16.mxu0 %v3368_v7 }
 0x723   : > { %3640 = vmatmul.mubr.bf16.gmra.mxu0 %v3367_v17 }
 0x724   : > { %3649 = vmatprep.mubr.bf16.mxu0 %v3370_v1 }
 0x72b   : > { %3650 = vmatmul.mubr.bf16.gmra.mxu0 %v3369_v30 }
 0x72c   : > { %3659 = vmatprep.mubr.bf16.mxu0 %v3372_v32  ;;  %v4693_v32 = vld [vmem:[%s5216_s10 + $0xa0] sm:$0xff] }
 0x733   : > { %3660 = vmatmul.mubr.bf16.gmra.mxu0 %v3371_v10 }
 0x734   : > { %3669 = vmatprep.mubr.bf16.mxu0 %v3374_v58 }
 0x73b   : > { %3670 = vmatmul.mubr.bf16.gmra.mxu0 %v3373_v47  ;;  %v4683_v47 = vld [vmem:[%s5216_s10 + $0x50] sm:$0xff] }
 0x7c3   : > { %v3601_v37 = vpop.f32.mrf.mxu0 }
 0x7c4   : > { %v3602_v52 = vadd.f32 %v4673_v63, %v3601_v37  ;;  %v4694_v37 = vld [vmem:[%s5216_s10 + $0xa8] sm:$0xff] }
 0x7c5   : > { %v3603_v60 = vpop.f32.mrf.mxu0 }
 0x7c6   : > { %3680 = vst [vmem:[%s7574_s17] sm:$0xff] %v3602_v52  ;;  %v3604_v21 = vadd.f32 %v4674_v2, %v3603_v60  ;;  %v4695_v60 = vld [vmem:[%s5216_s10 + $0xb0] sm:$0xff] }
 0x7c7   : > { %v3605_v25 = vpop.f32.mrf.mxu0 }
 0x7c8   : > { %3681 = vst [vmem:[%s7574_s17 + $0x8] sm:$0xff] %v3604_v21  ;;  %v3606_v6 = vadd.f32 %v4675_v53, %v3605_v25  ;;  %v4696_v25 = vld [vmem:[%s5216_s10 + $0xb8] sm:$0xff] }
 0x7c9   : > { %v3607_v24 = vpop.f32.mrf.mxu0 }
 0x7ca   : > { %3682 = vst [vmem:[%s7574_s17 + $0x10] sm:$0xff] %v3606_v6  ;;  %v3608_v14 = vadd.f32 %v4676_v56, %v3607_v24  ;;  %v4697_v24 = vld [vmem:[%s5216_s10 + $0xc0] sm:$0xff] }
 0x7cb   : > { %v3611_v15 = vpop.f32.mrf.mxu0 }
 0x7cc   : > { %3683 = vst [vmem:[%s7574_s17 + $0x18] sm:$0xff] %v3608_v14  ;;  %v3612_v55 = vadd.f32 %v4677_v40, %v3611_v15  ;;  %v4698_v15 = vld [vmem:[%s5216_s10 + $0xc8] sm:$0xff] }
 0x7cd   : > { %v3613_v43 = vpop.f32.mrf.mxu0 }
 0x7ce   : > { %3684 = vst [vmem:[%s7574_s17 + $0x20] sm:$0xff] %v3612_v55  ;;  %v3614_v20 = vadd.f32 %v4678_v46, %v3613_v43  ;;  %v4699_v43 = vld [vmem:[%s5216_s10 + $0xd0] sm:$0xff] }
 0x7cf   : > { %v3615_v26 = vpop.f32.mrf.mxu0 }
 0x7d0   : > { %3685 = vst [vmem:[%s7574_s17 + $0x28] sm:$0xff] %v3614_v20  ;;  %v3616_v4 = vadd.f32 %v4679_v50, %v3615_v26  ;;  %v4700_v26 = vld [vmem:[%s5216_s10 + $0xd8] sm:$0xff] }
 0x7d1   : > { %v3617_v39 = vpop.f32.mrf.mxu0 }
 0x7d2   : > { %3686 = vst [vmem:[%s7574_s17 + $0x30] sm:$0xff] %v3616_v4  ;;  %v3618_v45 = vadd.f32 %v4680_v12, %v3617_v39  ;;  %v4701_v39 = vld [vmem:[%s5216_s10 + $0xe0] sm:$0xff] }
 0x7d3   : > { %v3621_v62 = vpop.f32.mrf.mxu0 }
 0x7d4   : > { %3687 = vst [vmem:[%s7574_s17 + $0x38] sm:$0xff] %v3618_v45  ;;  %v3622_v48 = vadd.f32 %v4681_v54, %v3621_v62  ;;  %v4702_v62 = vld [vmem:[%s5216_s10 + $0xe8] sm:$0xff] }
 0x7d5   : > { %v3623_v5 = vpop.f32.mrf.mxu0 }
 0x7d6   : > { %3688 = vst [vmem:[%s7574_s17 + $0x40] sm:$0xff] %v3622_v48  ;;  %v3624_v59 = vadd.f32 %v4682_v61, %v3623_v5  ;;  %v4703_v5 = vld [vmem:[%s5216_s10 + $0xf0] sm:$0xff] }
 0x7d7   : > { %v3625_v41 = vpop.f32.mrf.mxu0 }
 0x7d8   : > { %3689 = vst [vmem:[%s7574_s17 + $0x48] sm:$0xff] %v3624_v59  ;;  %v3626_v23 = vadd.f32 %v4683_v47, %v3625_v41  ;;  %v4704_v41 = vld [vmem:[%s5216_s10 + $0xf8] sm:$0xff] }
 0x7d9   : > { %v3627_v42 = vpop.f32.mrf.mxu0 }
 0x7da   : > { %3690 = vst [vmem:[%s7574_s17 + $0x50] sm:$0xff] %v3626_v23  ;;  %v3628_v29 = vadd.f32 %v4684_v28, %v3627_v42 }
 0x7db   : > { %v3631_v31 = vpop.f32.mrf.mxu0 }
 0x7dc   : > { %3691 = vst [vmem:[%s7574_s17 + $0x58] sm:$0xff] %v3628_v29  ;;  %v3632_v49 = vadd.f32 %v4685_v13, %v3631_v31 }
 0x7dd   : > { %v3633_v0 = vpop.f32.mrf.mxu0 }
 0x7de   : > { %3692 = vst [vmem:[%s7574_s17 + $0x60] sm:$0xff] %v3632_v49  ;;  %v3634_v44 = vadd.f32 %v4686_v18, %v3633_v0 }
 0x7df   : > { %v3635_v27 = vpop.f32.mrf.mxu0 }
 0x7e0   : > { %3693 = vst [vmem:[%s7574_s17 + $0x68] sm:$0xff] %v3634_v44  ;;  %v3636_v19 = vadd.f32 %v4687_v38, %v3635_v27 }
 0x7e1   : > { %v3637_v34 = vpop.f32.mrf.mxu0 }
 0x7e2   : > { %3694 = vst [vmem:[%s7574_s17 + $0x70] sm:$0xff] %v3636_v19  ;;  %v3638_v16 = vadd.f32 %v4688_v8, %v3637_v34 }
 0x7e3   : > { %v3641_v9 = vpop.f32.mrf.mxu0 }
 0x7e4   : > { %3695 = vst [vmem:[%s7574_s17 + $0x78] sm:$0xff] %v3638_v16  ;;  %v3642_v36 = vadd.f32 %v4689_v22, %v3641_v9 }
 0x7e5   : > { %v3643_v51 = vpop.f32.mrf.mxu0 }
 0x7e6   : > { %3696 = vst [vmem:[%s7574_s17 + $0x80] sm:$0xff] %v3642_v36  ;;  %v3644_v7 = vadd.f32 %v4690_v3, %v3643_v51 }
 0x7e7   : > { %v3645_v35 = vpop.f32.mrf.mxu0 }
 0x7e8   : > { %3697 = vst [vmem:[%s7574_s17 + $0x88] sm:$0xff] %v3644_v7  ;;  %v3646_v17 = vadd.f32 %v4691_v33, %v3645_v35 }
 0x7e9   : > { %v3647_v1 = vpop.f32.mrf.mxu0 }
 0x7ea   : > { %3698 = vst [vmem:[%s7574_s17 + $0x90] sm:$0xff] %v3646_v17  ;;  %v3648_v11 = vadd.f32 %v4692_v57, %v3647_v1 }
 0x7eb   : > { %v3651_v30 = vpop.f32.mrf.mxu0 }
 0x7ec   : > { %3699 = vst [vmem:[%s7574_s17 + $0x98] sm:$0xff] %v3648_v11  ;;  %v3652_v10 = vadd.f32 %v4693_v32, %v3651_v30 }
 0x7ed   : > { %v3653_v58 = vpop.f32.mrf.mxu0 }
 0x7ee   : > { %3700 = vst [vmem:[%s7574_s17 + $0xa0] sm:$0xff] %v3652_v10  ;;  %v3654_v63 = vadd.f32 %v4694_v37, %v3653_v58 }
 0x7ef   : > { %v3655_v52 = vpop.f32.mrf.mxu0 }
 0x7f0   : > { %3701 = vst [vmem:[%s7574_s17 + $0xa8] sm:$0xff] %v3654_v63  ;;  %v3656_v2 = vadd.f32 %v4695_v60, %v3655_v52 }
 0x7f1   : > { %v3657_v21 = vpop.f32.mrf.mxu0 }
 0x7f2   : > { %3702 = vst [vmem:[%s7574_s17 + $0xb0] sm:$0xff] %v3656_v2  ;;  %v3658_v53 = vadd.f32 %v4696_v25, %v3657_v21 }
 0x7f3   : > { %v3661_v6 = vpop.f32.mrf.mxu0 }
 0x7f4   : > { %3703 = vst [vmem:[%s7574_s17 + $0xb8] sm:$0xff] %v3658_v53  ;;  %v3662_v56 = vadd.f32 %v4697_v24, %v3661_v6 }
 0x7f5   : > { %v3663_v14 = vpop.f32.mrf.mxu0 }
 0x7f6   : > { %3704 = vst [vmem:[%s7574_s17 + $0xc0] sm:$0xff] %v3662_v56  ;;  %v3664_v40 = vadd.f32 %v4698_v15, %v3663_v14 }
 0x7f7   : > { %v3665_v55 = vpop.f32.mrf.mxu0 }
 0x7f8   : > { %3705 = vst [vmem:[%s7574_s17 + $0xc8] sm:$0xff] %v3664_v40  ;;  %v3666_v46 = vadd.f32 %v4699_v43, %v3665_v55 }
 0x7f9   : > { %v3667_v20 = vpop.f32.mrf.mxu0 }
 0x7fa   : > { %3706 = vst [vmem:[%s7574_s17 + $0xd0] sm:$0xff] %v3666_v46  ;;  %v3668_v50 = vadd.f32 %v4700_v26, %v3667_v20 }
 0x7fb   : > { %v3671_v4 = vpop.f32.mrf.mxu0 }
 0x7fc   : > { %3707 = vst [vmem:[%s7574_s17 + $0xd8] sm:$0xff] %v3668_v50  ;;  %v3672_v12 = vadd.f32 %v4701_v39, %v3671_v4 }
 0x7fd   : > { %v3673_v45 = vpop.f32.mrf.mxu0 }
 0x7fe   : > { %3708 = vst [vmem:[%s7574_s17 + $0xe0] sm:$0xff] %v3672_v12  ;;  %v3674_v54 = vadd.f32 %v4702_v62, %v3673_v45 }
 0x7ff   : > { %v3675_v48 = vpop.f32.mrf.mxu0 }
 0x800   : > { %3709 = vst [vmem:[%s7574_s17 + $0xe8] sm:$0xff] %v3674_v54  ;;  %v3676_v61 = vadd.f32 %v4703_v5, %v3675_v48 }
 0x801   : > { %v3677_v59 = vpop.f32.mrf.mxu0 }
 0x802   : > { %3710 = vst [vmem:[%s7574_s17 + $0xf0] sm:$0xff] %v3676_v61  ;;  %v3678_v47 = vadd.f32 %v4704_v41, %v3677_v59 }
 0x804   : > { %3711 = vst [vmem:[%s7574_s17 + $0xf8] sm:$0xff] %v3678_v47 }
 0x805   : > { %4902 = shalt.err (!%p4899_p3)
}
 0x806   : > { %s4903_s10 = scalar_lea.hbm %s7641_s1, 4096  ;;  %s4907_s24 = scalar_lea.hbm %s7697_s8, 8192 }
 0x807   : > { %p4904_p6 = scmp.ne.s32.totalorder %s7641_s1, %s4903_s10  ;;  %p4908_p10 = scmp.lt.s32.totalorder %s7641_s1, %s7697_s8 }
 0x808   : > { %p4909_p7 = scmp.lt.s32.totalorder %s4907_s24, %s4903_s10 }
 0x809   : > { %p4905_p11 = pnand %p4904_p6, %p8129_p5 }
 0x80a   : > { %p4910_p0 = por %p4909_p7, %p4908_p10 }
 0x80b   : > { %p4906_p12 = pneg %p4905_p11 }
 0x80d   : > { %p4911_p2 = pnand %p4910_p0, %p4906_p12 }
 0x80f   : > { %4914 = shalt.err (!%p4911_p2)
}
 0x810   : > { %s4983_s14 = smov 256   ;;  %s4984_s21 = smov 16  }
 0x811   : > { %4230 = dma.vmem_to_hbm [thread:$0]  (%p8129_p5), %s7643_s26, 4096, %s7641_s1, %s3713_s11, %s4983_s14, %s4983_s14, %s4984_s21  }
 0x812 PF: > { %s3741_s22 = sand.u32 1, %s4953_s27   ;;  %p8130_p9 = scmp.ne.s32.totalorder %s7843_s19, 0 }
 0x813   : > { %p8131_p8 = scmp.ge.s32.totalorder %s4965_s30, 2  ;;  %s3742_s3 = scalar_lea.sflag [#allocation4], %s3741_s22 }
 0x815   : > { %p4256_p4 = pnand %p8131_p8, %p8130_p9 }
 0x817   : > { %p4257_p13 = pneg %p4256_p4 }
 0x819   : > { %4948 = dma.done.wait (%p4257_p13), %s3742_s3, 4096  }
 0x81a   : > { %4950 = vsyncadd (%p4257_p13), %s3742_s3, 4294963200  ;;  %p24_p1 = scmp.ge.s32.totalorder %s5135_s18, 4   ;;  %s8132_s27 = smov %s4957_s28 }
 0x81b   : > { %s8133_s28 = smov %s4961_s29  ;;  %s8134_s29 = smov %s5146_s25 }
 0x81c   : > { %s8135_s30 = smov %s5135_s18  ;;  %26 = sbr.rel (!%p24_p1) target bundleno = 11 (0xb), region = 121 }
 0x821   :  { %3747 = vsyncpa [#allocation3], 1 }
 0x822   :  { %3749 = vsyncpa [#allocation3 + $0x1], 1 }
 0x823   :  { %3750 = vsyncpa [#allocation6], 1 }
 0x824   :  { %3751 = vsyncpa [#allocation9], 1 }
 0x825   :  { %3752 = vsyncpa [#allocation12], 1 }
 0x826   :  { %3753 = vsyncpa [#allocation4], 1 }
 0x827   :  { %3755 = vsyncpa [#allocation4 + $0x1], 1 }

</bundles_post_ra>
